<compile_context>
chip_gen: v6e
topology: v6e:2x2x1
jax: 0.10.0
libtpu: 0.0.40
codegen_flags: <defaults>
</compile_context>

<pallas_src>
import functools
import math

import jax
import jax.numpy as jnp
from jax.experimental import pallas as pl
from jax.experimental.pallas import tpu as pltpu


RES_F = 11          # residual lanes per point (point 3 + scales 3 + rot 4 + opacity 1)
OUT_F = 16          # packed output lanes per point (11 used, padded to 16)


def _round_up(x, m):
    return ((x + m - 1) // m) * m


# -----------------------------------------------------------------------------
# Kernel
# -----------------------------------------------------------------------------
def _deform_kernel(xn_ref, xr_ref,          # packed activations (net lanes / residual lanes)
                   w0_ref,                  # fused layer 0   (P*20, P*W)
                   whall_ref,               # hidden stack + 4 fused head hidden  (P*W, (D+3)*P*W)
                   wout_ref,                # 4 fused head output layers          (4*P*W, P*16)
                   bias_ref,                # all biases, one f32 slab, static row slices
                   out_ref,
                   *, compute_dtype, P, W, depth):
    f32 = jnp.float32
    cd = compute_dtype
    PW = P * W

    # layer 0: one matmul over the packed net-input lanes (flame_net already folded in)
    h = jnp.dot(xn_ref[...].astype(cd), w0_ref[...],
                preferred_element_type=f32) + bias_ref[0:1, 0:PW]

    # feature_out hidden layers: (depth-1) x (ReLU, Linear) -- static unroll
    for i in range(depth - 1):
        h = jnp.dot(jnp.maximum(h, 0.0).astype(cd),
                    whall_ref[:, i * PW:(i + 1) * PW],
                    preferred_element_type=f32) + bias_ref[1 + i:2 + i, 0:PW]

    # 4 deformation heads fused: hidden layers concatenated, output layers block-diag
    g = jnp.dot(jnp.maximum(h, 0.0).astype(cd),
                whall_ref[:, (depth - 1) * PW:(depth + 3) * PW],
                preferred_element_type=f32) + bias_ref[depth:depth + 1, 0:4 * PW]
    delta = jnp.dot(jnp.maximum(g, 0.0).astype(cd), wout_ref[...],
                    preferred_element_type=f32) + bias_ref[depth + 1:depth + 2, 0:P * OUT_F]

    # exact f32 residual add on the VPU (x_res is laid out like the output groups)
    out_ref[...] = (xr_ref[...] + delta).astype(out_ref.dtype)


# -----------------------------------------------------------------------------
# Weight packing (once per call, in the wrapper)
# -----------------------------------------------------------------------------
def pack_weights(p, *, P=8, compute_dtype=jnp.bfloat16):
    W = p["wh"].shape[-1]
    depth = p["wh"].shape[0] + 1
    flame_in = p["wfl"].shape[0]
    net_in = 4 + flame_in                     # point(3) + time(1) + flame embedding

    # ---- single-point fusion -------------------------------------------------
    # layer 0: cat([point, time, flame_net(flame)]) @ w0 folded into one matmul
    w0 = jnp.zeros((net_in, W), jnp.float32)
    w0 = w0.at[0:3].set(p["w0p"])
    w0 = w0.at[3:4].set(p["w0t"])
    w0 = w0.at[4:4 + flame_in].set(p["wfl"] @ p["w0f"])        # fold flame_net Linear
    b0 = p["b0"] + p["bfl"] @ p["w0f"]

    whd = jnp.concatenate([p["whd"][k] for k in range(4)], axis=1)   # (W, 4W)
    bhd = jnp.concatenate([p["bhd"][k] for k in range(4)], axis=1)   # (1, 4W)

    head_dims = (3, 3, 4, 1)
    wout = jnp.zeros((4 * W, OUT_F), jnp.float32)
    bout = jnp.zeros((1, OUT_F), jnp.float32)
    col = 0
    for k, (name, d) in enumerate(zip(("op", "os", "or", "oo"), head_dims)):
        wout = wout.at[k * W:(k + 1) * W, col:col + d].set(p["w" + name])
        bout = bout.at[:, col:col + d].set(p["b" + name])
        col += d

    # ---- block-diagonal replication for P points per lane-row ----------------
    def bd(w):
        a, b = w.shape
        o = jnp.zeros((P * a, P * b), jnp.float32)
        for q in range(P):
            o = o.at[q * a:(q + 1) * a, q * b:(q + 1) * b].set(w)
        return o

    def tile_b(b):
        return jnp.tile(b, (1, P))

    w0p = bd(w0)                                               # (P*net_in, P*W)
    wh_p = [bd(p["wh"][i]) for i in range(depth - 1)]          # each (P*W, P*W)
    whd_p = bd(whd)                                            # (P*W, 4*P*W)
    wout_p = bd(wout)                                          # (4*P*W, P*OUT_F)
    whall = jnp.concatenate(wh_p + [whd_p], axis=1)            # (P*W, (depth+3)*P*W)

    # one f32 bias slab: rows [b0, bh_0..bh_{depth-2}, bhd, bout], padded to 4*P*W
    maxw = 4 * P * W
    def pad_row(b):
        return jnp.pad(b, ((0, 0), (0, maxw - b.shape[1])))
    rows = [pad_row(tile_b(b0))]
    rows += [pad_row(tile_b(p["bh"][i])) for i in range(depth - 1)]
    rows += [pad_row(tile_b(bhd)), pad_row(tile_b(bout))]
    bias = jnp.concatenate(rows, axis=0)
    bias = jnp.pad(bias, ((0, _round_up(bias.shape[0], 8) - bias.shape[0]), (0, 0)))

    cd = compute_dtype
    return dict(w0=w0p.astype(cd), whall=whall.astype(cd),
                wout=wout_p.astype(cd), bias=bias)


# -----------------------------------------------------------------------------
# Wrapper
# -----------------------------------------------------------------------------
def deform_network_forward(params, point, scales, rotations, opacity,
                           times_sel, flame_emb, *,
                           points_per_row=8, tile_rows=None,
                           compute_dtype=jnp.bfloat16):
    N = point.shape[0]
    P = points_per_row
    flame_in = flame_emb.shape[1]
    W = params["wh"].shape[-1]
    depth = params["wh"].shape[0] + 1
    net_in = 4 + flame_in

    pw = pack_weights(params, P=P, compute_dtype=compute_dtype)

    # packed activation slabs (row-major reshape packs P consecutive points per row)
    xn = jnp.concatenate([point, times_sel, flame_emb], axis=-1).astype(jnp.float32)
    xr = jnp.concatenate([point, scales, rotations, opacity,
                          jnp.zeros((N, OUT_F - RES_F), jnp.float32)],
                         axis=-1).astype(jnp.float32)

    rows = -(-N // P)
    if tile_rows is None:
        # >=2 roughly balanced grid steps (v7x has 2 TensorCores), VMEM-safe cap
        tile_rows = min(1024, _round_up(-(-rows // 2), 8))
    tile_rows = max(8, _round_up(tile_rows, 8))
    rows_pad = _round_up(rows, tile_rows)
    n_pad = rows_pad * P
    if n_pad != N:
        xn = jnp.pad(xn, ((0, n_pad - N), (0, 0)))
        xr = jnp.pad(xr, ((0, n_pad - N), (0, 0)))
    xn = xn.reshape(rows_pad, P * net_in)
    xr = xr.reshape(rows_pad, P * OUT_F)

    weights = [pw["w0"], pw["whall"], pw["wout"], pw["bias"]]

    in_specs = ([pl.BlockSpec((tile_rows, P * net_in), lambda i: (i, 0)),
                 pl.BlockSpec((tile_rows, P * OUT_F), lambda i: (i, 0))]
                + [pl.BlockSpec(w.shape, lambda i: (0, 0)) for w in weights])
    out_specs = pl.BlockSpec((tile_rows, P * OUT_F), lambda i: (i, 0))

    kernel = functools.partial(_deform_kernel, compute_dtype=compute_dtype,
                               P=P, W=W, depth=depth)
    out = pl.pallas_call(
        kernel,
        grid=(rows_pad // tile_rows,),
        in_specs=in_specs,
        out_specs=out_specs,
        out_shape=jax.ShapeDtypeStruct((rows_pad, P * OUT_F), jnp.float32),
        compiler_params=pltpu.CompilerParams(
            dimension_semantics=("parallel",),
            vmem_limit_bytes=32 * 1024 * 1024),
    )(xn, xr, *weights)

    out = out.reshape(rows_pad * P, OUT_F)[:N]
    return out[:, 0:3], out[:, 3:6], out[:, 6:10], out[:, 10:11]


# -----------------------------------------------------------------------------
# Deterministic parameter init (xavier-uniform weights, torch-default-ish biases)
# -----------------------------------------------------------------------------
def make_params(key, *, W=32, D=4, flame_in=16, flame_out=8, n_heads=4):
    def xavier(k, fi, fo):
        b = math.sqrt(6.0 / (fi + fo))
        return jax.random.uniform(k, (fi, fo), jnp.float32, -b, b)

    def bias(k, fi, fo):
        b = 1.0 / math.sqrt(fi)
        return jax.random.uniform(k, (1, fo), jnp.float32, -b, b)

    keys = iter(jax.random.split(key, 64))
    p = {}
    p["wfl"] = xavier(next(keys), flame_in, flame_out)
    p["bfl"] = bias(next(keys), flame_in, flame_out)
    fi0 = 3 + 1 + flame_out
    w0 = xavier(next(keys), fi0, W)
    p["w0p"], p["w0t"], p["w0f"] = w0[:3], w0[3:4], w0[4:]
    p["b0"] = bias(next(keys), fi0, W)
    p["wh"] = jnp.stack([xavier(next(keys), W, W) for _ in range(D - 1)])
    p["bh"] = jnp.stack([bias(next(keys), W, W) for _ in range(D - 1)])
    p["whd"] = jnp.stack([xavier(next(keys), W, W) for _ in range(n_heads)])
    p["bhd"] = jnp.stack([bias(next(keys), W, W) for _ in range(n_heads)])
    for name, dout in (("op", 3), ("os", 3), ("or", 4), ("oo", 1)):
        p["w" + name] = xavier(next(keys), W, dout)
        p["b" + name] = bias(next(keys), W, dout)
    return p


# Pure-JAX reference (mirrors the PyTorch forward) for the correctness check.
def ref_forward(p, point, scales, rotations, opacity, times_sel, flame_emb):
    fl = flame_emb @ p["wfl"] + p["bfl"]
    h = point @ p["w0p"] + times_sel @ p["w0t"] + fl @ p["w0f"] + p["b0"]
    for i in range(p["wh"].shape[0]):
        h = jnp.maximum(h, 0.0) @ p["wh"][i] + p["bh"][i]

    def head(i, wout, bout):
        g = jnp.maximum(h, 0.0) @ p["whd"][i] + p["bhd"][i]
        return jnp.maximum(g, 0.0) @ wout + bout

    pts = point + head(0, p["wop"], p["bop"])
    scl = scales + head(1, p["wos"], p["bos"])
    rot = rotations + head(2, p["wor"], p["bor"])
    opa = opacity + head(3, p["woo"], p["boo"])
    return pts, scl, rot, opa


# -----------------------------------------------------------------------------
if __name__ == "__main__":
    N, W, D = 3000, 32, 4          # points (ragged vs tile), net_width, defor_depth
    FLAME_IN, FLAME_OUT = 16, 8    # args.flame_dims

    key = jax.random.PRNGKey(0)
    kp, kd = jax.random.split(key)
    params = make_params(kp, W=W, D=D, flame_in=FLAME_IN, flame_out=FLAME_OUT)

    ks = jax.random.split(kd, 6)
    point = jax.random.normal(ks[0], (N, 3), jnp.float32)
    scales = jax.random.normal(ks[1], (N, 3), jnp.float32)
    rotations = jax.random.normal(ks[2], (N, 4), jnp.float32)
    opacity = jax.random.normal(ks[3], (N, 1), jnp.float32)
    times_sel = jax.random.uniform(ks[4], (N, 1), jnp.float32)
    flame_emb = jax.random.normal(ks[5], (N, FLAME_IN), jnp.float32)

    refs = jax.block_until_ready(
        ref_forward(params, point, scales, rotations, opacity, times_sel, flame_emb))

    # Elementwise tolerance absorbs MXU-precision noise in the small deltas (the
    # residual path is exact f32); the mean-abs check is the layout/packing-bug
    # catcher (a real bug produces mean errors ~O(0.5), 20-30x above threshold).
    def check(outs, refs, atol, rtol, mean_tol):
        for o, r in zip(outs, refs):
            assert o.shape == r.shape and o.dtype == jnp.float32
            assert bool(jnp.all(jnp.isfinite(o)))
            d = jnp.abs(o - r)
            assert bool(jnp.all(d <= atol + rtol * jnp.abs(r))), "elementwise mismatch"
            assert float(jnp.mean(d)) < mean_tol, "mean abs error too high"

    # f32 MXU-input path
    outs_f32 = deform_network_forward(params, point, scales, rotations, opacity,
                                      times_sel, flame_emb,
                                      points_per_row=8, compute_dtype=jnp.float32)
    outs_f32 = jax.block_until_ready(outs_f32)
    check(outs_f32, refs, atol=8e-2, rtol=8e-2, mean_tol=2e-2)

    # default bf16 MXU path (recommended on v5e / v6e / v7x)
    outs_bf16 = deform_network_forward(params, point, scales, rotations, opacity,
                                       times_sel, flame_emb)
    outs_bf16 = jax.block_until_ready(outs_bf16)
    check(outs_bf16, refs, atol=2e-1, rtol=1e-1, mean_tol=5e-2)

    print("KERNEL_OK")
</pallas_src>

<mosaic_0001>
module attributes {stable_mosaic.version = 11 : i64} {
  func.func @_deform_kernel(%arg0: i32, %arg1: memref<192x160xf32, #tpu.memory_space<vmem>>, %arg2: memref<192x128xf32, #tpu.memory_space<vmem>>, %arg3: memref<160x256xf32, #tpu.memory_space<vmem>>, %arg4: memref<256x1792xf32, #tpu.memory_space<vmem>>, %arg5: memref<1024x128xf32, #tpu.memory_space<vmem>>, %arg6: memref<8x1024xf32, #tpu.memory_space<vmem>>, %arg7: memref<192x128xf32, #tpu.memory_space<vmem>>) attributes {dimension_semantics = [#tpu.dimension_semantics<parallel>], iteration_bounds = array<i64: 2>, scalar_prefetch = 0 : i64, scratch_operands = 0 : i64, tpu.core_type = #tpu.core_type<tc>, window_params = [{transform_indices = @transform_0, window_bounds = array<i64: 192, 160>}, {transform_indices = @transform_1, window_bounds = array<i64: 192, 128>}, {pipeline_mode = #tpu.pipeline_mode<synchronous>, transform_indices = @transform_2, window_bounds = array<i64: 160, 256>}, {pipeline_mode = #tpu.pipeline_mode<synchronous>, transform_indices = @transform_3, window_bounds = array<i64: 256, 1792>}, {pipeline_mode = #tpu.pipeline_mode<synchronous>, transform_indices = @transform_4, window_bounds = array<i64: 1024, 128>}, {pipeline_mode = #tpu.pipeline_mode<synchronous>, transform_indices = @transform_5, window_bounds = array<i64: 8, 1024>}, {transform_indices = @transform_6, window_bounds = array<i64: 192, 128>}]} {
    %c0 = arith.constant 0 : index
    %c0_0 = arith.constant 0 : index
    %0 = vector.load %arg1[%c0, %c0_0] : memref<192x160xf32, #tpu.memory_space<vmem>>, vector<192x160xf32>
    %c0_1 = arith.constant 0 : index
    %c0_2 = arith.constant 0 : index
    %1 = vector.load %arg3[%c0_1, %c0_2] : memref<160x256xf32, #tpu.memory_space<vmem>>, vector<160x256xf32>
    %cst = arith.constant dense<0.000000e+00> : vector<192x256xf32>
    %2 = tpu.matmul %0, %1, %cst {dimension_numbers = #tpu.dot_dimension_numbers<[1], [0], [0], [1], [0, 0, 1, 1], [], []>} : vector<192x160xf32>, vector<160x256xf32>, vector<192x256xf32> -> vector<192x256xf32>
    %c0_3 = arith.constant 0 : index
    %c0_4 = arith.constant 0 : index
    %3 = vector.load %arg6[%c0_3, %c0_4] : memref<8x1024xf32, #tpu.memory_space<vmem>>, vector<1x256xf32>
    %4 = vector.broadcast %3 : vector<1x256xf32> to vector<192x256xf32>
    %5 = arith.addf %2, %4 : vector<192x256xf32>
    %cst_5 = arith.constant 0.000000e+00 : f32
    %6 = vector.broadcast %cst_5 : f32 to vector<192x256xf32>
    %7 = arith.maximumf %5, %6 : vector<192x256xf32>
    %c0_6 = arith.constant 0 : index
    %c0_7 = arith.constant 0 : index
    %8 = vector.load %arg4[%c0_6, %c0_7] : memref<256x1792xf32, #tpu.memory_space<vmem>>, vector<256x256xf32>
    %cst_8 = arith.constant dense<0.000000e+00> : vector<192x256xf32>
    %9 = tpu.matmul %7, %8, %cst_8 {dimension_numbers = #tpu.dot_dimension_numbers<[1], [0], [0], [1], [0, 0, 1, 1], [], []>} : vector<192x256xf32>, vector<256x256xf32>, vector<192x256xf32> -> vector<192x256xf32>
    %c1 = arith.constant 1 : index
    %c0_9 = arith.constant 0 : index
    %10 = vector.load %arg6[%c1, %c0_9] : memref<8x1024xf32, #tpu.memory_space<vmem>>, vector<1x256xf32>
    %11 = vector.broadcast %10 : vector<1x256xf32> to vector<192x256xf32>
    %12 = arith.addf %9, %11 : vector<192x256xf32>
    %cst_10 = arith.constant 0.000000e+00 : f32
    %13 = vector.broadcast %cst_10 : f32 to vector<192x256xf32>
    %14 = arith.maximumf %12, %13 : vector<192x256xf32>
    %c0_11 = arith.constant 0 : index
    %c256 = arith.constant 256 : index
    %15 = vector.load %arg4[%c0_11, %c256] : memref<256x1792xf32, #tpu.memory_space<vmem>>, vector<256x256xf32>
    %cst_12 = arith.constant dense<0.000000e+00> : vector<192x256xf32>
    %16 = tpu.matmul %14, %15, %cst_12 {dimension_numbers = #tpu.dot_dimension_numbers<[1], [0], [0], [1], [0, 0, 1, 1], [], []>} : vector<192x256xf32>, vector<256x256xf32>, vector<192x256xf32> -> vector<192x256xf32>
    %c2 = arith.constant 2 : index
    %c0_13 = arith.constant 0 : index
    %17 = vector.load %arg6[%c2, %c0_13] : memref<8x1024xf32, #tpu.memory_space<vmem>>, vector<1x256xf32>
    %18 = vector.broadcast %17 : vector<1x256xf32> to vector<192x256xf32>
    %19 = arith.addf %16, %18 : vector<192x256xf32>
    %cst_14 = arith.constant 0.000000e+00 : f32
    %20 = vector.broadcast %cst_14 : f32 to vector<192x256xf32>
    %21 = arith.maximumf %19, %20 : vector<192x256xf32>
    %c0_15 = arith.constant 0 : index
    %c512 = arith.constant 512 : index
    %22 = vector.load %arg4[%c0_15, %c512] : memref<256x1792xf32, #tpu.memory_space<vmem>>, vector<256x256xf32>
    %cst_16 = arith.constant dense<0.000000e+00> : vector<192x256xf32>
    %23 = tpu.matmul %21, %22, %cst_16 {dimension_numbers = #tpu.dot_dimension_numbers<[1], [0], [0], [1], [0, 0, 1, 1], [], []>} : vector<192x256xf32>, vector<256x256xf32>, vector<192x256xf32> -> vector<192x256xf32>
    %c3 = arith.constant 3 : index
    %c0_17 = arith.constant 0 : index
    %24 = vector.load %arg6[%c3, %c0_17] : memref<8x1024xf32, #tpu.memory_space<vmem>>, vector<1x256xf32>
    %25 = vector.broadcast %24 : vector<1x256xf32> to vector<192x256xf32>
    %26 = arith.addf %23, %25 : vector<192x256xf32>
    %cst_18 = arith.constant 0.000000e+00 : f32
    %27 = vector.broadcast %cst_18 : f32 to vector<192x256xf32>
    %28 = arith.maximumf %26, %27 : vector<192x256xf32>
    %c0_19 = arith.constant 0 : index
    %c768 = arith.constant 768 : index
    %29 = vector.load %arg4[%c0_19, %c768] : memref<256x1792xf32, #tpu.memory_space<vmem>>, vector<256x1024xf32>
    %cst_20 = arith.constant dense<0.000000e+00> : vector<192x1024xf32>
    %30 = tpu.matmul %28, %29, %cst_20 {dimension_numbers = #tpu.dot_dimension_numbers<[1], [0], [0], [1], [0, 0, 1, 1], [], []>} : vector<192x256xf32>, vector<256x1024xf32>, vector<192x1024xf32> -> vector<192x1024xf32>
    %c4 = arith.constant 4 : index
    %c0_21 = arith.constant 0 : index
    %31 = vector.load %arg6[%c4, %c0_21] : memref<8x1024xf32, #tpu.memory_space<vmem>>, vector<1x1024xf32>
    %32 = vector.broadcast %31 : vector<1x1024xf32> to vector<192x1024xf32>
    %33 = arith.addf %30, %32 : vector<192x1024xf32>
    %cst_22 = arith.constant 0.000000e+00 : f32
    %34 = vector.broadcast %cst_22 : f32 to vector<192x1024xf32>
    %35 = arith.maximumf %33, %34 : vector<192x1024xf32>
    %c0_23 = arith.constant 0 : index
    %c0_24 = arith.constant 0 : index
    %36 = vector.load %arg5[%c0_23, %c0_24] : memref<1024x128xf32, #tpu.memory_space<vmem>>, vector<1024x128xf32>
    %cst_25 = arith.constant dense<0.000000e+00> : vector<192x128xf32>
    %37 = tpu.matmul %35, %36, %cst_25 {dimension_numbers = #tpu.dot_dimension_numbers<[1], [0], [0], [1], [0, 0, 1, 1], [], []>} : vector<192x1024xf32>, vector<1024x128xf32>, vector<192x128xf32> -> vector<192x128xf32>
    %c5 = arith.constant 5 : index
    %c0_26 = arith.constant 0 : index
    %38 = vector.load %arg6[%c5, %c0_26] : memref<8x1024xf32, #tpu.memory_space<vmem>>, vector<1x128xf32>
    %39 = vector.broadcast %38 : vector<1x128xf32> to vector<192x128xf32>
    %40 = arith.addf %37, %39 : vector<192x128xf32>
    %c0_27 = arith.constant 0 : index
    %c0_28 = arith.constant 0 : index
    %41 = vector.load %arg2[%c0_27, %c0_28] : memref<192x128xf32, #tpu.memory_space<vmem>>, vector<192x128xf32>
    %42 = arith.addf %41, %40 : vector<192x128xf32>
    %c0_29 = arith.constant 0 : index
    %c0_30 = arith.constant 0 : index
    %43 = vector.load %arg7[%c0_29, %c0_30] : memref<192x128xf32, #tpu.memory_space<vmem>>, vector<192x128xf32>
    tpu.vector_store %arg7[%c0_29, %c0_30], %42 {strides = array<i32>} : memref<192x128xf32, #tpu.memory_space<vmem>>, vector<192x128xf32>,
    return
  }
  func.func @transform_0(%arg0: i32) -> (i32, i32) {
    %c0_i32 = arith.constant 0 : i32
    %c0_i32_0 = arith.constant 0 : i32
    return %arg0, %c0_i32 : i32, i32
  }
  func.func @transform_1(%arg0: i32) -> (i32, i32) {
    %c0_i32 = arith.constant 0 : i32
    %c0_i32_0 = arith.constant 0 : i32
    return %arg0, %c0_i32 : i32, i32
  }
  func.func @transform_2(%arg0: i32) -> (i32, i32) {
    %c0_i32 = arith.constant 0 : i32
    %c0_i32_0 = arith.constant 0 : i32
    %c0_i32_1 = arith.constant 0 : i32
    return %c0_i32, %c0_i32_0 : i32, i32
  }
  func.func @transform_3(%arg0: i32) -> (i32, i32) {
    %c0_i32 = arith.constant 0 : i32
    %c0_i32_0 = arith.constant 0 : i32
    %c0_i32_1 = arith.constant 0 : i32
    return %c0_i32, %c0_i32_0 : i32, i32
  }
  func.func @transform_4(%arg0: i32) -> (i32, i32) {
    %c0_i32 = arith.constant 0 : i32
    %c0_i32_0 = arith.constant 0 : i32
    %c0_i32_1 = arith.constant 0 : i32
    return %c0_i32, %c0_i32_0 : i32, i32
  }
  func.func @transform_5(%arg0: i32) -> (i32, i32) {
    %c0_i32 = arith.constant 0 : i32
    %c0_i32_0 = arith.constant 0 : i32
    %c0_i32_1 = arith.constant 0 : i32
    return %c0_i32, %c0_i32_0 : i32, i32
  }
  func.func @transform_6(%arg0: i32) -> (i32, i32) {
    %c0_i32 = arith.constant 0 : i32
    %c0_i32_0 = arith.constant 0 : i32
    return %arg0, %c0_i32 : i32, i32
  }
}

</mosaic_0001>

<bundles_post_ra>
// kernel: tpu_custom_call.1
= control target key start
LH: loop header
LB: loop body
LE: loop exit
PB: predicated region body
PF: predicated region fallthrough
CT: control target
= control target key end

     0   :  { %11 = vsyncpa [#allocation3], 0  ;;  %s6659_s0 = inlined_call_operand.vmem [shape: f32[384,160], index: 0, kind: input, shape index: {}]   ;;  %s6660_s1 = inlined_call_operand.hbm [shape: f32[384,128], index: 1, kind: input, shape index: {}]   ;;  %s6661_s2 = inlined_call_operand.hbm [shape: f32[160,256], index: 2, kind: input, shape index: {}]   ;;  %s6662_s3 = inlined_call_operand.hbm [shape: f32[256,1792], index: 3, kind: input, shape index: {}]   ;;  %s6663_s4 = inlined_call_operand.hbm [shape: f32[1024,128], index: 4, kind: input, shape index: {}]   ;;  %s6664_s5 = inlined_call_operand.hbm [shape: f32[8,1024], index: 5, kind: input, shape index: {}]   ;;  %s6665_s6 = inlined_call_operand.hbm [shape: f32[384,128], index: 6, kind: output, shape index: {}]  }
   0x1   :  { %13 = vsyncpa [#allocation3 + $0x1], 0 }
   0x2   :  { %14 = vsyncpa [#allocation6], 0 }
   0x3   :  { %15 = vsyncpa [#allocation9], 0 }
   0x4   :  { %16 = vsyncpa [#allocation4], 0 }
   0x5   :  { %18 = vsyncpa [#allocation4 + $0x1], 0  ;;  %s4655_s21 = smov 0   ;;  %s4657_s22 = smov 0  }
   0x6   :  { %s4659_s23 = smov 0   ;;  %s4661_s24 = smov 0  }
   0x7 LB: > { %s4676_s25 = sadd.s32 4294967295, %s4603_s24   ;;  %s4192_s26 = sadd.s32 4294967294, %s4603_s24   ;;  %s4603_s24 = sphi %s4661_s24, %s6720_s24   ;;  %s4599_s23 = sphi %s4659_s23, %s6719_s23   ;;  %s4595_s22 = sphi %s4657_s22, %s6718_s22   ;;  %s4591_s21 = sphi %s4655_s21, %s6717_s21  }
   0x8   : > { %p70_p0 = scmp.ne.s32.totalorder %s4595_s22, %s4591_s21  ;;  %p6666_p1 = scmp.eq.s32.totalorder %s4676_s25, 0 }
   0x9   : > { %p184_p3 = scmp.eq.s32.totalorder %s4192_s26, 1  ;;  %p4193_p5 = scmp.ge.s32.totalorder %s4603_s24, 1 }
   0xa   : > { %p4685_p4 = por %p6666_p1, %p70_p0  ;;  %p191_p7 = scmp.lt.s32.totalorder %s4603_s24, 3 }
   0xb   : > { %p4690_p6 = por %p184_p3, %p70_p0  ;;  %s4605_s30 = smov [#allocation5]  }
   0xc   : > { %s6678_s27 = scalar_select %p4685_p4, 1, 0 }
   0xd   : > { %s6679_s28 = scalar_select %p4690_p6, 1, 0 }
   0xe   : > { %p4695_p8 = pnand %p4193_p5, %p191_p7  ;;  %s203_s7 = sshll.u32 %s4605_s30, 4  ;;  %s204_s7 = int_to_ptr.vmem [resolvable:$true] %s203_s7 }
   0xf   : > { %s4606_s9 = smov [#allocation8]   ;;  %s4410_s11 = scalar_lea.vmem %s204_s7, 5120 }
  0x10   : > { %s6680_s29 = scalar_select %p4695_p8, 1, 0 }
  0x11   : > { %p4323_p9 = pneg %p4695_p8  ;;  %s229_s10 = sshll.u32 %s4606_s9, 4  ;;  %s230_s10 = int_to_ptr.vmem [resolvable:$true] %s229_s10 }
  0x12   : > { %p4411_p13 = scmp.ne.s32.totalorder %s204_s7, %s4410_s11  ;;  %p4418_p5 = scmp.lt.s32.totalorder %s204_s7, %s204_s7 }
  0x13   : > { %p4704_p11 = pnand %p4323_p9, %p6666_p1  ;;  %p4419_p7 = scmp.lt.s32.totalorder %s4410_s11, %s4410_s11 }
  0x15   : > { %p4401_p12 = pneg %p4704_p11  ;;  %p4420_p10 = por %p4419_p7, %p4418_p5 }
  0x17   : > { %p4413_p0 = pnand %p4411_p13, %p4401_p12 }
  0x19   : > { %p4414_p3 = pneg %p4413_p0 }
  0x1b   : > { %p4421_p9 = pnand %p4420_p10, %p4414_p3 }
  0x1d   : > { %4424 = shalt.err (!%p4421_p9)
}
  0x1e   : > { %s4607_s12 = smov 256   ;;  %s4608_s13 = smov 16  }
  0x1f   : > { %4326 = dma.hbm_to_vmem [thread:$0]  (!%p4704_p11), %s6661_s2, 5120, %s204_s7, [#allocation6], %s4607_s12, %s4607_s12, %s4608_s13  }
  0x20   : > { %s4436_s16 = scalar_lea.vmem %s230_s10, 16384  ;;  %p4444_p2 = scmp.lt.s32.totalorder %s230_s10, %s230_s10 }
  0x21   : > { %p4437_p1 = scmp.ne.s32.totalorder %s230_s10, %s4436_s16  ;;  %p4445_p6 = scmp.lt.s32.totalorder %s4436_s16, %s4436_s16 }
  0x23   : > { %p4439_p13 = pnand %p4437_p1, %p4401_p12  ;;  %p4446_p5 = por %p4445_p6, %p4444_p2 }
  0x25   : > { %p4440_p0 = pneg %p4439_p13 }
  0x27   : > { %p4447_p10 = pnand %p4446_p5, %p4440_p0 }
  0x29   : > { %4450 = shalt.err (!%p4447_p10)
}
  0x2a   : > { %s6667_s17 = smov 128   ;;  %s6668_s18 = smov 8  }
  0x2b   : > { %4332 = dma.hbm_to_vmem [thread:$0]  (!%p4704_p11), %s6663_s4, 16384, %s230_s10, [#allocation9], %s6667_s17, %s6667_s17, %s6668_s18  }
  0x2c   : > { %s4611_s26 = smov [#allocation7]  }
  0x2d   : > { %s216_s30 = sshll.u32 %s4611_s26, 4  ;;  %s217_s30 = int_to_ptr.vmem [resolvable:$true] %s216_s30 }
  0x2e   : > { %s4462_s7 = scalar_lea.vmem %s217_s30, 57344  ;;  %p4470_p3 = scmp.lt.s32.totalorder %s217_s30, %s217_s30 }
  0x2f   : > { %p4463_p1 = scmp.ne.s32.totalorder %s217_s30, %s4462_s7  ;;  %p4471_p7 = scmp.lt.s32.totalorder %s4462_s7, %s4462_s7 }
  0x31   : > { %p4465_p2 = pnand %p4463_p1, %p4401_p12  ;;  %p4472_p9 = por %p4471_p7, %p4470_p3 }
  0x33   : > { %p4466_p6 = pneg %p4465_p2 }
  0x35   : > { %p4473_p13 = pnand %p4472_p9, %p4466_p6 }
  0x37   : > { %4476 = shalt.err (!%p4473_p13)
}
  0x38   : > { %s4612_s9 = smov 1792   ;;  %s4613_s11 = smov 112  }
  0x39   : > { %4329 = dma.hbm_to_vmem [thread:$0]  (!%p4704_p11), %s6662_s3, 57344, %s217_s30, [#allocation6], %s4612_s9, %s4612_s9, %s4613_s11  }
  0x3a   : > { %s4614_s13 = smov [#allocation10]  }
  0x3b   : > { %s243_s14 = sshll.u32 %s4614_s13, 4  ;;  %s244_s14 = int_to_ptr.vmem [resolvable:$true] %s243_s14 }
  0x3c   : > { %s4488_s15 = scalar_lea.vmem %s244_s14, 1024  ;;  %p4496_p1 = scmp.lt.s32.totalorder %s244_s14, %s244_s14 }
  0x3d   : > { %p4489_p0 = scmp.ne.s32.totalorder %s244_s14, %s4488_s15  ;;  %p4497_p2 = scmp.lt.s32.totalorder %s4488_s15, %s4488_s15 }
  0x3f   : > { %p4491_p5 = pnand %p4489_p0, %p4401_p12  ;;  %p4498_p6 = por %p4497_p2, %p4496_p1 }
  0x41   : > { %p4492_p10 = pneg %p4491_p5 }
  0x43   : > { %p4499_p3 = pnand %p4498_p6, %p4492_p10 }
  0x45   : > { %4502 = shalt.err (!%p4499_p3)
}
  0x46   : > { %4335 = dma.hbm_to_vmem [thread:$0]  (!%p4704_p11), %s6664_s5, 1024, %s244_s14, [#allocation9]  }
  0x47   : > { %s4746_s20 = sadd.s32 1, %s4603_s24   ;;  %s57_s26 = sadd.s32 1, %s4599_s23 }
  0x48   : > { %s54_s8 = ssub.s32 %s4603_s24, %s4746_s20  ;;  %p64_p12 = scmp.ne.s32.totalorder %s4599_s23, %s4595_s22 }
  0x49   : > { %p55_p7 = scmp.eq.s32.totalorder %s54_s8, 0  ;;  %p65_p9 = scmp.eq.s32.totalorder %s4603_s24, 0 }
  0x4a   : > { %p6682_p13 = scmp.eq.s32.totalorder %s4676_s25, 1  ;;  %p4348_p5 = scmp.lt.s32.totalorder %s4603_s24, 2 }
  0x4b   : > { %s4762_s7 = scalar_select %p55_p7, %s4599_s23, %s57_s26  }
  0x4c   : > { %p4756_p0 = por %p6682_p13, %p64_p12  ;;  %p66_p10 = por %p65_p9, %p64_p12 }
  0x4d   : > { %s264_s9 = sand.u32 1, %s4599_s23   ;;  %s4234_s10 = smul.u32 3072, %s4603_s24 }
  0x4e   : > { %s6683_s30 = scalar_select %p4756_p0, 1, 0 }
  0x4f   : > { %s4301_s11 = smul.u32 192, %s264_s9  ;;  %p4766_p11 = pnand %p4348_p5, %p66_p10 }
  0x50   : > { %s4773_s15 = scalar_lea.hbm %s6660_s1, %s4234_s10  ;;  %s4777_s26 = scalar_lea.sflag [#allocation3], %s264_s9 }
  0x51   : > { %s268_s16 = scalar_lea.vmem [#allocation2], %s4301_s11  ;;  %s4503_s8 = scalar_lea.hbm %s4773_s15, 3072 }
  0x52   : > { %s275_s19 = sshll.u32 %s268_s16, 4  ;;  %p4504_p1 = scmp.ne.s32.totalorder %s4773_s15, %s4503_s8  ;;  %s4775_s19 = int_to_ptr.vmem [resolvable:$true] %s275_s19 }
  0x53   : > { %p4505_p2 = pneg %p4766_p11  ;;  %s4508_s10 = scalar_lea.hbm %s6660_s1, 6144 }
  0x54   : > { %p4509_p12 = scmp.lt.s32.totalorder %s4773_s15, %s6660_s1  ;;  %p4510_p7 = scmp.lt.s32.totalorder %s4508_s10, %s4503_s8 }
  0x55   : > { %p4506_p6 = pnand %p4505_p2, %p4504_p1 }
  0x56   : > { %p4511_p9 = por %p4510_p7, %p4509_p12 }
  0x57   : > { %p4507_p3 = pneg %p4506_p6 }
  0x59   : > { %p4512_p13 = pnand %p4511_p9, %p4507_p3 }
  0x5b   : > { %4515 = shalt.err (!%p4512_p13)
}
  0x5c   : > { %s4516_s9 = scalar_lea.vmem %s4775_s19, 3072  ;;  %s4615_s11 = smov [#allocation2]  }
  0x5d   : > { %p4517_p5 = scmp.ne.s32.totalorder %s4775_s19, %s4516_s9  ;;  %s4521_s16 = sshll.u32 %s4615_s11, 4  ;;  %s4522_s16 = int_to_ptr.vmem [resolvable:$false] %s4521_s16 }
  0x5e   : > { %s4523_s17 = scalar_lea.vmem %s4522_s16, 6144  ;;  %p4524_p6 = scmp.lt.s32.totalorder %s4775_s19, %s4522_s16 }
  0x5f   : > { %p4519_p10 = pnand %p4517_p5, %p4505_p2  ;;  %p4525_p0 = scmp.lt.s32.totalorder %s4523_s17, %s4516_s9 }
  0x61   : > { %p4520_p1 = pneg %p4519_p10  ;;  %p4526_p4 = por %p4525_p0, %p4524_p6 }
  0x63   : > { %p4527_p8 = pnand %p4526_p4, %p4520_p1 }
  0x65   : > { %4530 = shalt.err (!%p4527_p8)
}
  0x66   : > { %s6685_s18 = smov 8   ;;  %s6686_s8 = smov 128  }
  0x67   : > { %4339 = dma.hbm_to_vmem [thread:$0]  (!%p4766_p11), %s4773_s15, 3072, %s4775_s19, %s4777_s26, %s6686_s8, %s6686_s8, %s6685_s18  }
  0x68   : > { %p6687_p2 = scmp.ne.s32.totalorder %s6680_s29, 0 }
  0x6a   : > { %287 = sbr.rel (%p6687_p2) target bundleno = 1609 (0x649), region = 44 }
  0x6f   : > { %s4804_s13 = sand.u32 1, %s4595_s22   ;;  %p6688_p4 = scmp.ne.s32.totalorder %s6678_s27, 0 }
  0x70   : > { %s4302_s10 = smul.u32 192, %s4804_s13  ;;  %s290_s14 = scalar_lea.sflag [#allocation3], %s4804_s13 }
  0x72   : > { %s4810_s12 = scalar_lea.vmem [#allocation2], %s4302_s10 }
  0x73   : > { %4574 = dma.done.wait (%p6688_p4), %s290_s14, 3072  }
  0x74   : > { %4576 = vsyncadd (%p6688_p4), %s290_s14, 4294964224  ;;  %p6689_p8 = scmp.eq.s32.totalorder %s4676_s25, 0 }
  0x76   : > { %4578 = dma.done.wait (%p6689_p8), [#allocation6], 62464   ;;  %p6690_p0 = pmov %p6689_p8 }
  0x78   : > { %4580 = vsyncadd (%p6690_p0), [#allocation6], 4294904832  ;;  %p6691_p11 = pmov %p6690_p0 }
  0x79   : > { %p6692_p3 = pmov %p6690_p0 }
  0x7a   : > { %4582 = dma.done.wait (%p6691_p11), [#allocation9], 17408  }
  0x7b   : > { %4584 = vsyncadd (%p6692_p3), [#allocation9], 4294949888  ;;  %s344_s29 = smul.u32 24, %s4676_s25  ;;  %v432_v0 = vld [vmem:[#allocation5 + $0xf8] sm:$0xff]  ;;  %v431_v1 = vld [vmem:[#allocation5 + $0xf0] sm:$0xff]  ;;  %vm453_vm0 = vcmask 261120  }
  0x7c   : > { %v430_v2 = vld [vmem:[#allocation5 + $0xe8] sm:$0xff]  ;;  %526 = vmatprep.subr.mxu0 %v432_v0  ;;  %v429_v3 = vld [vmem:[#allocation5 + $0xe0] sm:$0xff]  ;;  %v428_v4 = vld [vmem:[#allocation5 + $0xd8] sm:$0xff]  ;;  %s6539_s9 = scalar_lea.vmem [#allocation11], %s4302_s10  ;;  %s4236_s11 = smul.u32 3072, %s4676_s25 }
  0x7d   : > { %p345_p12 = scmp.lt.s32.totalorder %s344_s29, 47  ;;  %527 = vmatpush1.msra.mxu0 %v431_v1  ;;  %v427_v5 = vld [vmem:[#allocation5 + $0xd0] sm:$0xff]  ;;  %v426_v6 = vld [vmem:[#allocation5 + $0xc8] sm:$0xff]  ;;  %v425_v7 = vld [vmem:[#allocation5 + $0xc0] sm:$0xff]  ;;  %s4069_s16 = sshll.u32 %s6539_s9, 4  ;;  %s6615_s16 = int_to_ptr.vmem [resolvable:$true] %s4069_s16 }
  0x7e   : > { %528 = vmatprep.subr.mxu0 %v430_v2  ;;  %v424_v8 = vld [vmem:[#allocation5 + $0xb8] sm:$0xff]  ;;  %v423_v9 = vld [vmem:[#allocation5 + $0xb0] sm:$0xff]  ;;  %v422_v10 = vld [vmem:[#allocation5 + $0xa8] sm:$0xff]  ;;  %s6613_s8 = scalar_lea.hbm %s6665_s6, %s4236_s11  ;;  %s4056_s25 = scalar_lea.sflag [#allocation4], %s4804_s13 }
  0x7f   : > { %s6722_s29 = smov (!%p345_p12, %s344_s29), 47  ;;  %529 = vmatpush1.msra.mxu0 %v429_v3  ;;  %v421_v11 = vld [vmem:[#allocation5 + $0xa0] sm:$0xff]  ;;  %v420_v12 = vld [vmem:[#allocation5 + $0x98] sm:$0xff]  ;;  %v419_v13 = vld [vmem:[#allocation5 + $0x90] sm:$0xff]  ;;  %s4531_s10 = scalar_lea.vmem %s6615_s16, 3072 }
  0x80   : > { %530 = vmatprep.subr.mxu0 %v428_v4  ;;  %s4235_s27 = sshll.u32 %s6722_s29, 4  ;;  %v418_v14 = vld [vmem:[#allocation5 + $0x88] sm:$0xff]  ;;  %v417_v15 = vld [vmem:[#allocation5 + $0x80] sm:$0xff]  ;;  %v416_v17 = vld [vmem:[#allocation5 + $0x78] sm:$0xff]  ;;  %p4532_p7 = scmp.ne.s32.totalorder %s6615_s16, %s4531_s10 }
  0x81   : > { %531 = vmatpush1.msra.mxu0 %v427_v5  ;;  %s4828_s26 = scalar_lea.vmem %s6659_s0, %s4235_s27  ;;  %v415_v18 = vld [vmem:[#allocation5 + $0x70] sm:$0xff]  ;;  %v414_v19 = vld [vmem:[#allocation5 + $0x68] sm:$0xff]  ;;  %v413_v20 = vld [vmem:[#allocation5 + $0x60] sm:$0xff]  ;;  %p6714_p9 = scmp.ne.s32.totalorder %s6683_s30, 0 }
  0x82   : > { %532 = vmatprep.subr.mxu0 %v426_v6  ;;  %v354_v16 = vld [vmem:[%s4828_s26 + $0x8] sm:$0xff]  ;;  %v412_v21 = vld [vmem:[#allocation5 + $0x58] sm:$0xff]  ;;  %v411_v22 = vld [vmem:[#allocation5 + $0x50] sm:$0xff]  ;;  %s4617_s14 = smov [#allocation11]  }
  0x83   : > { %533 = vmatpush1.msra.mxu0 %v425_v7  ;;  %4207 = vmatprep.mubr.msk.f32.mxu0 %vm453_vm0, %v354_v16  ;;  %v410_v23 = vld [vmem:[#allocation5 + $0x48] sm:$0xff]  ;;  %v409_v24 = vld [vmem:[#allocation5 + $0x40] sm:$0xff]  ;;  %v408_v25 = vld [vmem:[#allocation5 + $0x38] sm:$0xff]  ;;  %p4533_p13 = pnand %p4532_p7, %p6714_p9 }
  0x84   : > { %534 = vmatprep.subr.mxu0 %v424_v8  ;;  %v407_v26 = vld [vmem:[#allocation5 + $0x30] sm:$0xff]  ;;  %v406_v27 = vld [vmem:[#allocation5 + $0x28] sm:$0xff]  ;;  %v405_v28 = vld [vmem:[#allocation5 + $0x20] sm:$0xff] }
  0x85   : > { %535 = vmatpush1.msra.mxu0 %v423_v9  ;;  %v404_v29 = vld [vmem:[#allocation5 + $0x18] sm:$0xff]  ;;  %v403_v30 = vld [vmem:[#allocation5 + $0x10] sm:$0xff]  ;;  %v402_v31 = vld [vmem:[#allocation5 + $0x8] sm:$0xff]  ;;  %p4534_p5 = pneg %p4533_p13 }
  0x86   : > { %536 = vmatprep.subr.mxu0 %v422_v10  ;;  %v401_v32 = vld [vmem:[#allocation5] sm:$0xff]  ;;  %v814_v33 = vld [vmem:[#allocation7 + $0x698] sm:$0xff]  ;;  %v813_v34 = vld [vmem:[#allocation7 + $0x690] sm:$0xff] }
  0x87   : > { %537 = vmatpush1.msra.mxu0 %v421_v11  ;;  %v440_v35 = vld [vmem:[#allocation5 + $0x138] sm:$0xff]  ;;  %860 = vmatprep.subr.mxu1 %v814_v33  ;;  %v812_v36 = vld [vmem:[#allocation7 + $0x628] sm:$0xff]  ;;  %v811_v37 = vld [vmem:[#allocation7 + $0x620] sm:$0xff] }
  0x88   : > { %538 = vmatprep.subr.mxu0 %v420_v12  ;;  %v439_v38 = vld [vmem:[#allocation5 + $0x130] sm:$0xff]  ;;  %861 = vmatpush1.msra.mxu1 %v813_v34  ;;  %v810_v39 = vld [vmem:[#allocation7 + $0x5b8] sm:$0xff]  ;;  %v438_v40 = vld [vmem:[#allocation5 + $0x128] sm:$0xff] }
  0x89   : > { %539 = vmatpush1.msra.mxu0 %v419_v13  ;;  %862 = vmatprep.subr.mxu1 %v812_v36  ;;  %v809_v41 = vld [vmem:[#allocation7 + $0x5b0] sm:$0xff]  ;;  %v437_v42 = vld [vmem:[#allocation5 + $0x120] sm:$0xff]  ;;  %v808_v43 = vld [vmem:[#allocation7 + $0x548] sm:$0xff] }
  0x8a   : > { %540 = vmatprep.subr.mxu0 %v418_v14  ;;  %863 = vmatpush1.msra.mxu1 %v811_v37  ;;  %v436_v44 = vld [vmem:[#allocation5 + $0x118] sm:$0xff]  ;;  %v807_v45 = vld [vmem:[#allocation7 + $0x540] sm:$0xff]  ;;  %v435_v46 = vld [vmem:[#allocation5 + $0x110] sm:$0xff] }
  0x8b   : > { %541 = vmatpush1.msra.mxu0 %v417_v15  ;;  %864 = vmatprep.subr.mxu1 %v810_v39  ;;  %v806_v47 = vld [vmem:[#allocation7 + $0x4d8] sm:$0xff]  ;;  %v434_v48 = vld [vmem:[#allocation5 + $0x108] sm:$0xff]  ;;  %v805_v49 = vld [vmem:[#allocation7 + $0x4d0] sm:$0xff] }
  0x8c   : > { %542 = vmatprep.subr.mxu0 %v416_v17  ;;  %865 = vmatpush1.msra.mxu1 %v809_v41  ;;  %v433_v50 = vld [vmem:[#allocation5 + $0x100] sm:$0xff]  ;;  %v804_v51 = vld [vmem:[#allocation7 + $0x468] sm:$0xff]  ;;  %v356_v54 = vld [vmem:[%s4828_s26 + $0x18] sm:$0xff] }
  0x8d   : > { %543 = vmatpush1.msra.mxu0 %v415_v18  ;;  %866 = vmatprep.subr.mxu1 %v808_v43  ;;  %v353_v52 = vld [vmem:[%s4828_s26] sm:$0xff]  ;;  %v802_v55 = vld [vmem:[#allocation7 + $0x3f8] sm:$0xff]  ;;  %v801_v56 = vld [vmem:[#allocation7 + $0x3f0] sm:$0xff] }
  0x8e   : > { %544 = vmatprep.subr.mxu0 %v414_v19  ;;  %867 = vmatpush1.msra.mxu1 %v807_v45  ;;  %v803_v53 = vld [vmem:[#allocation7 + $0x460] sm:$0xff]  ;;  %v800_v57 = vld [vmem:[#allocation7 + $0x388] sm:$0xff]  ;;  %v355_v58 = vld [vmem:[%s4828_s26 + $0x10] sm:$0xff] }
  0x8f   : > { %545 = vmatpush1.msra.mxu0 %v413_v20  ;;  %868 = vmatprep.subr.mxu1 %v806_v47  ;;  %v799_v59 = vld [vmem:[#allocation7 + $0x380] sm:$0xff]  ;;  %v358_v60 = vld [vmem:[%s4828_s26 + $0x28] sm:$0xff]  ;;  %v798_v61 = vld [vmem:[#allocation7 + $0x318] sm:$0xff] }
  0x90   : > { %546 = vmatprep.subr.mxu0 %v412_v21  ;;  %869 = vmatpush1.msra.mxu1 %v805_v49  ;;  %v797_v62 = vld [vmem:[#allocation7 + $0x310] sm:$0xff]  ;;  %v796_v63 = vld [vmem:[#allocation7 + $0x2a8] sm:$0xff]  ;;  %v357_v0 = vld [vmem:[%s4828_s26 + $0x20] sm:$0xff] }
  0x91   : > { %547 = vmatpush1.msra.mxu0 %v411_v22  ;;  %870 = vmatprep.subr.mxu1 %v804_v51  ;;  %v795_v1 = vld [vmem:[#allocation7 + $0x2a0] sm:$0xff]  ;;  %v360_v2 = vld [vmem:[%s4828_s26 + $0x38] sm:$0xff]  ;;  %v793_v4 = vld [vmem:[#allocation7 + $0x230] sm:$0xff] }
  0x92   : > { %548 = vmatprep.subr.mxu0 %v410_v23  ;;  %871 = vmatpush1.msra.mxu1 %v803_v53  ;;  %v794_v3 = vld [vmem:[#allocation7 + $0x238] sm:$0xff]  ;;  %v792_v5 = vld [vmem:[#allocation7 + $0x1c8] sm:$0xff]  ;;  %v359_v6 = vld [vmem:[%s4828_s26 + $0x30] sm:$0xff] }
  0x93   : > { %549 = vmatpush1.msra.mxu0 %v409_v24  ;;  %872 = vmatprep.subr.mxu1 %v802_v55  ;;  %v791_v7 = vld [vmem:[#allocation7 + $0x1c0] sm:$0xff]  ;;  %v362_v8 = vld [vmem:[%s4828_s26 + $0x48] sm:$0xff]  ;;  %v790_v9 = vld [vmem:[#allocation7 + $0x158] sm:$0xff] }
  0x94   : > { %550 = vmatprep.subr.mxu0 %v408_v25  ;;  %873 = vmatpush1.msra.mxu1 %v801_v56  ;;  %v789_v10 = vld [vmem:[#allocation7 + $0x150] sm:$0xff]  ;;  %v788_v11 = vld [vmem:[#allocation7 + $0xe8] sm:$0xff]  ;;  %v361_v12 = vld [vmem:[%s4828_s26 + $0x40] sm:$0xff] }
  0x95   : > { %551 = vmatpush1.msra.mxu0 %v407_v26  ;;  %874 = vmatprep.subr.mxu1 %v800_v57  ;;  %v787_v13 = vld [vmem:[#allocation7 + $0xe0] sm:$0xff]  ;;  %v364_v14 = vld [vmem:[%s4828_s26 + $0x58] sm:$0xff]  ;;  %v785_v16 = vld [vmem:[#allocation7 + $0x70] sm:$0xff] }
  0x96   : > { %552 = vmatprep.subr.mxu0 %v406_v27  ;;  %875 = vmatpush1.msra.mxu1 %v799_v59  ;;  %v786_v15 = vld [vmem:[#allocation7 + $0x78] sm:$0xff]  ;;  %v784_v17 = vld [vmem:[#allocation7 + $0x8] sm:$0xff]  ;;  %v363_v18 = vld [vmem:[%s4828_s26 + $0x50] sm:$0xff] }
  0x97   : > { %553 = vmatpush1.msra.mxu0 %v405_v28  ;;  %876 = vmatprep.subr.mxu1 %v798_v61  ;;  %v783_v19 = vld [vmem:[#allocation7] sm:$0xff]  ;;  %v366_v20 = vld [vmem:[%s4828_s26 + $0x68] sm:$0xff]  ;;  %v846_v21 = vld [vmem:[#allocation7 + $0xd98] sm:$0xff] }
  0x98   : > { %554 = vmatprep.subr.mxu0 %v404_v29  ;;  %877 = vmatpush1.msra.mxu1 %v797_v62  ;;  %v845_v22 = vld [vmem:[#allocation7 + $0xd90] sm:$0xff]  ;;  %v844_v23 = vld [vmem:[#allocation7 + $0xd28] sm:$0xff]  ;;  %v365_v24 = vld [vmem:[%s4828_s26 + $0x60] sm:$0xff] }
  0x99   : > { %555 = vmatpush1.msra.mxu0 %v403_v30  ;;  %878 = vmatprep.subr.mxu1 %v796_v63  ;;  %v843_v25 = vld [vmem:[#allocation7 + $0xd20] sm:$0xff]  ;;  %v368_v26 = vld [vmem:[%s4828_s26 + $0x78] sm:$0xff]  ;;  %v841_v28 = vld [vmem:[#allocation7 + $0xcb0] sm:$0xff] }
  0x9a   : > { %556 = vmatprep.subr.mxu0 %v402_v31  ;;  %879 = vmatpush1.msra.mxu1 %v795_v1  ;;  %v842_v27 = vld [vmem:[#allocation7 + $0xcb8] sm:$0xff]  ;;  %v840_v29 = vld [vmem:[#allocation7 + $0xc48] sm:$0xff]  ;;  %v367_v30 = vld [vmem:[%s4828_s26 + $0x70] sm:$0xff] }
  0x9b   : > { %557 = vmatpush1.msra.mxu0 %v401_v32  ;;  %880 = vmatprep.subr.mxu1 %v794_v3  ;;  %v839_v31 = vld [vmem:[#allocation7 + $0xc40] sm:$0xff]  ;;  %v370_v32 = vld [vmem:[%s4828_s26 + $0x88] sm:$0xff]  ;;  %v838_v33 = vld [vmem:[#allocation7 + $0xbd8] sm:$0xff] }
  0x9c   : > { %582 = vmatprep.subr.mxu0 %v440_v35  ;;  %881 = vmatpush1.msra.mxu1 %v793_v4  ;;  %v837_v34 = vld [vmem:[#allocation7 + $0xbd0] sm:$0xff]  ;;  %v836_v35 = vld [vmem:[#allocation7 + $0xb68] sm:$0xff]  ;;  %v369_v36 = vld [vmem:[%s4828_s26 + $0x80] sm:$0xff] }
  0x9d   : > { %583 = vmatpush2.msra.mxu0 %v439_v38  ;;  %882 = vmatprep.subr.mxu1 %v792_v5  ;;  %v835_v37 = vld [vmem:[#allocation7 + $0xb60] sm:$0xff]  ;;  %v372_v38 = vld [vmem:[%s4828_s26 + $0x98] sm:$0xff]  ;;  %v832_v41 = vld [vmem:[#allocation7 + $0xa88] sm:$0xff] }
  0x9e   : > { %584 = vmatprep.subr.mxu0 %v438_v40  ;;  %883 = vmatpush1.msra.mxu1 %v791_v7  ;;  %v834_v39 = vld [vmem:[#allocation7 + $0xaf8] sm:$0xff]  ;;  %v833_v40 = vld [vmem:[#allocation7 + $0xaf0] sm:$0xff]  ;;  %v831_v43 = vld [vmem:[#allocation7 + $0xa80] sm:$0xff] }
  0x9f   : > { %585 = vmatpush2.msra.mxu0 %v437_v42  ;;  %884 = vmatprep.subr.mxu1 %v790_v9  ;;  %v371_v42 = vld [vmem:[%s4828_s26 + $0x90] sm:$0xff]  ;;  %v830_v45 = vld [vmem:[#allocation7 + $0xa18] sm:$0xff]  ;;  %v828_v47 = vld [vmem:[#allocation7 + $0x9a8] sm:$0xff] }
  0xa0   : > { %586 = vmatprep.subr.mxu0 %v436_v44  ;;  %885 = vmatpush1.msra.mxu1 %v789_v10  ;;  %v374_v44 = vld [vmem:[%s4828_s26 + $0xa8] sm:$0xff]  ;;  %v827_v49 = vld [vmem:[#allocation7 + $0x9a0] sm:$0xff]  ;;  %v826_v51 = vld [vmem:[#allocation7 + $0x938] sm:$0xff] }
  0xa1   : > { %587 = vmatpush2.msra.mxu0 %v435_v46  ;;  %886 = vmatprep.subr.mxu1 %v788_v11  ;;  %v829_v46 = vld [vmem:[#allocation7 + $0xa10] sm:$0xff]  ;;  %v824_v53 = vld [vmem:[#allocation7 + $0x8c8] sm:$0xff]  ;;  %v823_v55 = vld [vmem:[#allocation7 + $0x8c0] sm:$0xff] }
  0xa2   : > { %588 = vmatprep.subr.mxu0 %v434_v48  ;;  %887 = vmatpush1.msra.mxu1 %v787_v13  ;;  %v373_v48 = vld [vmem:[%s4828_s26 + $0xa0] sm:$0xff]  ;;  %v378_v56 = vld [vmem:[%s4828_s26 + $0xc8] sm:$0xff]  ;;  %v379_v59 = vld [vmem:[%s4828_s26 + $0xd0] sm:$0xff] }
  0xa3   : > { %589 = vmatpush2.msra.mxu0 %v433_v50  ;;  %888 = vmatprep.subr.mxu1 %v786_v15  ;;  %v376_v50 = vld [vmem:[%s4828_s26 + $0xb8] sm:$0xff]  ;;  %v377_v57 = vld [vmem:[%s4828_s26 + $0xc0] sm:$0xff]  ;;  %v383_v63 = vld [vmem:[%s4828_s26 + $0xf0] sm:$0xff] }
  0xa4   : > { %591 = vmatmul.mubr.f32.vlgmr.msra.gmra.mxu0 %v353_v52  ;;  %889 = vmatpush1.msra.mxu1 %v785_v16  ;;  %v825_v52 = vld [vmem:[#allocation7 + $0x930] sm:$0xff]  ;;  %v381_v61 = vld [vmem:[%s4828_s26 + $0xe0] sm:$0xff]  ;;  %v384_v62 = vld [vmem:[%s4828_s26 + $0xf8] sm:$0xff] }
  0xa5   : > { %4208 = vmatprep.mubr.msk.f32.mxu0 %vm453_vm0, %v356_v54  ;;  %890 = vmatprep.subr.mxu1 %v784_v17  ;;  %v375_v54 = vld [vmem:[%s4828_s26 + $0xb0] sm:$0xff]  ;;  %v385_v1 = vld [vmem:[%s4828_s26 + $0x100] sm:$0xff]  ;;  %v822_v3 = vld [vmem:[#allocation7 + $0x858] sm:$0xff] }
  0xa6   : > { %891 = vmatpush1.msra.mxu1 %v783_v19  ;;  %v821_v4 = vld [vmem:[#allocation7 + $0x850] sm:$0xff]  ;;  %v390_v7 = vld [vmem:[%s4828_s26 + $0x128] sm:$0xff]  ;;  %v818_v9 = vld [vmem:[#allocation7 + $0x778] sm:$0xff] }
  0xa7   : > { %892 = vmatprep.subr.mxu1 %v846_v21  ;;  %v387_v5 = vld [vmem:[%s4828_s26 + $0x110] sm:$0xff]  ;;  %v389_v11 = vld [vmem:[%s4828_s26 + $0x120] sm:$0xff]  ;;  %v392_v13 = vld [vmem:[%s4828_s26 + $0x138] sm:$0xff] }
  0xa8   : > { %597 = vmatmul.mubr.f32.gmra.mxu0 %v355_v58  ;;  %893 = vmatpush2.msra.mxu1 %v845_v22  ;;  %v380_v58 = vld [vmem:[%s4828_s26 + $0xd8] sm:$0xff]  ;;  %v817_v10 = vld [vmem:[#allocation7 + $0x770] sm:$0xff]  ;;  %v394_v16 = vld [vmem:[%s4828_s26 + $0x148] sm:$0xff] }
  0xa9   : > { %4209 = vmatprep.mubr.msk.f32.mxu0 %vm453_vm0, %v358_v60  ;;  %894 = vmatprep.subr.mxu1 %v844_v23  ;;  %v382_v60 = vld [vmem:[%s4828_s26 + $0xe8] sm:$0xff]  ;;  %v391_v15 = vld [vmem:[%s4828_s26 + $0x130] sm:$0xff]  ;;  %v393_v17 = vld [vmem:[%s4828_s26 + $0x140] sm:$0xff] }
  0xaa   : > { %895 = vmatpush2.msra.mxu1 %v843_v25  ;;  %v395_v19 = vld [vmem:[%s4828_s26 + $0x150] sm:$0xff]  ;;  %v397_v21 = vld [vmem:[%s4828_s26 + $0x160] sm:$0xff]  ;;  %v400_v22 = vld [vmem:[%s4828_s26 + $0x178] sm:$0xff] }
  0xab   : > { %896 = vmatprep.subr.mxu1 %v842_v27  ;;  %v399_v23 = vld [vmem:[%s4828_s26 + $0x170] sm:$0xff]  ;;  %v1147_v25 = vld [vmem:[#allocation7 + $0x6a0] sm:$0xff] }
  0xac   : > { %603 = vmatmul.mubr.f32.gmra.mxu0 %v357_v0  ;;  %897 = vmatpush2.msra.mxu1 %v841_v28  ;;  %v386_v0 = vld [vmem:[%s4828_s26 + $0x108] sm:$0xff]  ;;  %v1145_v27 = vld [vmem:[#allocation7 + $0x630] sm:$0xff] }
  0xad   : > { %4210 = vmatprep.mubr.msk.f32.mxu0 %vm453_vm0, %v360_v2  ;;  %898 = vmatprep.subr.mxu1 %v840_v29  ;;  %v388_v2 = vld [vmem:[%s4828_s26 + $0x118] sm:$0xff]  ;;  %v1144_v28 = vld [vmem:[#allocation7 + $0x5c8] sm:$0xff]  ;;  %v1143_v29 = vld [vmem:[#allocation7 + $0x5c0] sm:$0xff] }
  0xae   : > { %899 = vmatpush2.msra.mxu1 %v839_v31  ;;  %v1141_v31 = vld [vmem:[#allocation7 + $0x550] sm:$0xff] }
  0xaf   : > { %900 = vmatprep.subr.mxu1 %v838_v33  ;;  %v1139_v33 = vld [vmem:[#allocation7 + $0x4e0] sm:$0xff] }
  0xb0   : > { %609 = vmatmul.mubr.f32.gmra.mxu0 %v359_v6  ;;  %901 = vmatpush2.msra.mxu1 %v837_v34  ;;  %v820_v6 = vld [vmem:[#allocation7 + $0x7e8] sm:$0xff]  ;;  %v1138_v34 = vld [vmem:[#allocation7 + $0x478] sm:$0xff] }
  0xb1   : > { %4211 = vmatprep.mubr.msk.f32.mxu0 %vm453_vm0, %v362_v8  ;;  %902 = vmatprep.subr.mxu1 %v836_v35  ;;  %v819_v8 = vld [vmem:[#allocation7 + $0x7e0] sm:$0xff]  ;;  %v1137_v35 = vld [vmem:[#allocation7 + $0x470] sm:$0xff] }
  0xb2   : > { %903 = vmatpush2.msra.mxu1 %v835_v37  ;;  %v1135_v37 = vld [vmem:[#allocation7 + $0x400] sm:$0xff] }
  0xb3   : > { %904 = vmatprep.subr.mxu1 %v834_v39  ;;  %v1133_v39 = vld [vmem:[#allocation7 + $0x390] sm:$0xff] }
  0xb4   : > { %615 = vmatmul.mubr.f32.gmra.mxu0 %v361_v12  ;;  %905 = vmatpush2.msra.mxu1 %v833_v40  ;;  %v816_v12 = vld [vmem:[#allocation7 + $0x708] sm:$0xff]  ;;  %v443_v40 = vlaneseq }
  0xb5   : > { %4212 = vmatprep.mubr.msk.f32.mxu0 %vm453_vm0, %v364_v14  ;;  %906 = vmatprep.subr.mxu1 %v832_v41  ;;  %v815_v14 = vld [vmem:[#allocation7 + $0x700] sm:$0xff]  ;;  %v1132_v41 = vld [vmem:[#allocation7 + $0x328] sm:$0xff] }
  0xb6   : > { %907 = vmatpush2.msra.mxu1 %v831_v43  ;;  %v1130_v43 = vld [vmem:[#allocation7 + $0x2b8] sm:$0xff] }
  0xb7   : > { %908 = vmatprep.subr.mxu1 %v830_v45  ;;  %v4902_v45 = vshrl.u32 %v443_v40, 7 }
  0xb8   : > { %621 = vmatmul.mubr.f32.gmra.mxu0 %v363_v18  ;;  %909 = vmatpush2.msra.mxu1 %v829_v46  ;;  %v396_v18 = vld [vmem:[%s4828_s26 + $0x158] sm:$0xff]  ;;  %v1128_v46 = vld [vmem:[#allocation7 + $0x248] sm:$0xff] }
  0xb9   : > { %4213 = vmatprep.mubr.msk.f32.mxu0 %vm453_vm0, %v366_v20  ;;  %910 = vmatprep.subr.mxu1 %v828_v47  ;;  %v398_v20 = vld [vmem:[%s4828_s26 + $0x168] sm:$0xff]  ;;  %v1127_v47 = vld [vmem:[#allocation7 + $0x240] sm:$0xff] }
  0xba   : > { %911 = vmatpush2.msra.mxu1 %v827_v49  ;;  %v1125_v49 = vld [vmem:[#allocation7 + $0x1d0] sm:$0xff] }
  0xbb   : > { %912 = vmatprep.subr.mxu1 %v826_v51  ;;  %v1124_v51 = vld [vmem:[#allocation7 + $0x168] sm:$0xff] }
  0xbc   : > { %627 = vmatmul.mubr.f32.gmra.mxu0 %v365_v24  ;;  %913 = vmatpush2.msra.mxu1 %v825_v52  ;;  %v1148_v24 = vld [vmem:[#allocation7 + $0x6a8] sm:$0xff] }
  0xbd   : > { %4214 = vmatprep.mubr.msk.f32.mxu0 %vm453_vm0, %v368_v26  ;;  %914 = vmatprep.subr.mxu1 %v824_v53  ;;  %v1146_v26 = vld [vmem:[#allocation7 + $0x638] sm:$0xff]  ;;  %v441_v52 = vld [vmem:[#allocation10] ss:$8 sm:$0x3]  ;;  %v4908_v53 = vsub.s32 1, %v4902_v45 }
  0xbe   : > { %915 = vmatpush2.msra.mxu1 %v823_v55  ;;  %1194 = vmatprep.subr.mxu0 %v1148_v24  ;;  %v1122_v55 = vld [vmem:[#allocation7 + $0xf8] sm:$0xff]  ;;  %v1171_v24 = vld [vmem:[#allocation7 + $0xbe0] sm:$0xff] }
  0xbf   : > { %916 = vmatprep.subr.mxu1 %v822_v3  ;;  %1195 = vmatpush1.msra.mxu0 %v1147_v25 }
  0xc0   : > { %633 = vmatmul.mubr.f32.gmra.mxu0 %v367_v30  ;;  %917 = vmatpush2.msra.mxu1 %v821_v4  ;;  %v1142_v30 = vld [vmem:[#allocation7 + $0x558] sm:$0xff]  ;;  %v1179_v4 = vld [vmem:[#allocation7 + $0xda0] sm:$0xff] }
  0xc1   : > { %4215 = vmatprep.mubr.msk.f32.mxu0 %vm453_vm0, %v370_v32  ;;  %918 = vmatprep.subr.mxu1 %v820_v6  ;;  %v1140_v32 = vld [vmem:[#allocation7 + $0x4e8] sm:$0xff]  ;;  %v1178_v6 = vld [vmem:[#allocation7 + $0xd38] sm:$0xff] }
  0xc2   : > { %919 = vmatpush2.msra.mxu1 %v819_v8  ;;  %1196 = vmatprep.subr.mxu0 %v1146_v26  ;;  %v1177_v8 = vld [vmem:[#allocation7 + $0xd30] sm:$0xff]  ;;  %v1170_v26 = vld [vmem:[#allocation7 + $0xb78] sm:$0xff] }
  0xc3   : > { %920 = vmatprep.subr.mxu1 %v818_v9  ;;  %1197 = vmatpush1.msra.mxu0 %v1145_v27 }
  0xc4   : > { %639 = vmatmul.mubr.f32.gmra.mxu0 %v369_v36  ;;  %921 = vmatpush2.msra.mxu1 %v817_v10  ;;  %v1136_v36 = vld [vmem:[#allocation7 + $0x408] sm:$0xff] }
  0xc5   : > { %4216 = vmatprep.mubr.msk.f32.mxu0 %vm453_vm0, %v372_v38  ;;  %922 = vmatprep.subr.mxu1 %v816_v12  ;;  %v1134_v38 = vld [vmem:[#allocation7 + $0x398] sm:$0xff]  ;;  %v1176_v12 = vld [vmem:[#allocation7 + $0xcc8] sm:$0xff] }
  0xc6   : > { %923 = vmatpush2.msra.mxu1 %v815_v14  ;;  %1198 = vmatprep.subr.mxu0 %v1144_v28  ;;  %v1175_v14 = vld [vmem:[#allocation7 + $0xcc0] sm:$0xff]  ;;  %v1169_v28 = vld [vmem:[#allocation7 + $0xb70] sm:$0xff] }
  0xc7   : > { %1199 = vmatpush1.msra.mxu0 %v1143_v29 }
  0xc8   : > { %645 = vmatmul.mubr.f32.gmra.mxu0 %v371_v42  ;;  %1200 = vmatprep.subr.mxu0 %v1142_v30  ;;  %v1131_v42 = vld [vmem:[#allocation7 + $0x320] sm:$0xff] }
  0xc9   : > { %4217 = vmatprep.mubr.msk.f32.mxu0 %vm453_vm0, %v374_v44  ;;  %1201 = vmatpush1.msra.mxu0 %v1141_v31  ;;  %v1129_v44 = vld [vmem:[#allocation7 + $0x2b0] sm:$0xff] }
  0xca   : > { %1202 = vmatprep.subr.mxu0 %v1140_v32  ;;  %v1168_v32 = vld [vmem:[#allocation7 + $0xb08] sm:$0xff] }
  0xcb   : > { %1203 = vmatpush1.msra.mxu0 %v1139_v33 }
  0xcc   : > { %651 = vmatmul.mubr.f32.gmra.mxu0 %v373_v48  ;;  %1204 = vmatprep.subr.mxu0 %v1138_v34  ;;  %v1126_v48 = vld [vmem:[#allocation7 + $0x1d8] sm:$0xff]  ;;  %v1167_v34 = vld [vmem:[#allocation7 + $0xb00] sm:$0xff] }
  0xcd   : > { %4218 = vmatprep.mubr.msk.f32.mxu0 %vm453_vm0, %v376_v50  ;;  %1205 = vmatpush1.msra.mxu0 %v1137_v35  ;;  %v4905_v50 = vsub.s32 0, %v4902_v45 }
  0xce   : > { %1206 = vmatprep.subr.mxu0 %v1136_v36  ;;  %v1166_v36 = vld [vmem:[#allocation7 + $0xa98] sm:$0xff] }
  0xcf   : > { %1207 = vmatpush1.msra.mxu0 %v1135_v37  ;;  %6693 = vst [vmem:[#allocation16_spill] sm:$0xff] %v4905_v50 }
  0xd0   : > { %657 = vmatmul.mubr.f32.gmra.mxu0 %v375_v54  ;;  %1208 = vmatprep.subr.mxu0 %v1134_v38  ;;  %v1123_v54 = vld [vmem:[#allocation7 + $0x160] sm:$0xff]  ;;  %v1165_v38 = vld [vmem:[#allocation7 + $0xa90] sm:$0xff] }
  0xd1   : > { %4219 = vmatprep.mubr.msk.f32.mxu0 %vm453_vm0, %v378_v56  ;;  %1209 = vmatpush1.msra.mxu0 %v1133_v39  ;;  %v1121_v56 = vld [vmem:[#allocation7 + $0xf0] sm:$0xff] }
  0xd2   : > { %1210 = vmatprep.subr.mxu0 %v1132_v41 }
  0xd3   : > { %1211 = vmatpush1.msra.mxu0 %v1131_v42  ;;  %v1164_v42 = vld [vmem:[#allocation7 + $0xa28] sm:$0xff] }
  0xd4   : > { %663 = vmatmul.mubr.f32.gmra.mxu0 %v377_v57  ;;  %1212 = vmatprep.subr.mxu0 %v1130_v43  ;;  %v4911_v57 = vrot.slane %v441_v52, %v4905_v50 }
  0xd5   : > { %4220 = vmatprep.mubr.msk.f32.mxu0 %vm453_vm0, %v380_v58  ;;  %1213 = vmatpush1.msra.mxu0 %v1129_v44  ;;  %v1120_v58 = vld [vmem:[#allocation7 + $0x88] sm:$0xff]  ;;  %v1163_v44 = vld [vmem:[#allocation7 + $0xa20] sm:$0xff] }
  0xd6   : > { %1214 = vmatprep.subr.mxu0 %v1128_v46 }
  0xd7   : > { %1215 = vmatpush1.msra.mxu0 %v1127_v47  ;;  %v1162_v47 = vld [vmem:[#allocation7 + $0x9b8] sm:$0xff] }
  0xd8   : > { %669 = vmatmul.mubr.f32.gmra.mxu0 %v379_v59  ;;  %1216 = vmatprep.subr.mxu0 %v1126_v48  ;;  %v4914_v59 = vrot.slane %v441_v52, %v4908_v53 }
  0xd9   : > { %4221 = vmatprep.mubr.msk.f32.mxu0 %vm453_vm0, %v382_v60  ;;  %1217 = vmatpush1.msra.mxu0 %v1125_v49  ;;  %v1119_v60 = vld [vmem:[#allocation7 + $0x80] sm:$0xff]  ;;  %v1161_v49 = vld [vmem:[#allocation7 + $0x9b0] sm:$0xff] }
  0xda   : > { %1218 = vmatprep.subr.mxu0 %v1124_v51 }
  0xdb   : > { %1219 = vmatpush1.msra.mxu0 %v1123_v54 }
  0xdc   : > { %675 = vmatmul.mubr.f32.gmra.mxu0 %v381_v61  ;;  %1220 = vmatprep.subr.mxu0 %v1122_v55  ;;  %v1160_v55 = vld [vmem:[#allocation7 + $0x948] sm:$0xff] }
  0xdd   : > { %4222 = vmatprep.mubr.msk.f32.mxu0 %vm453_vm0, %v384_v62  ;;  %1221 = vmatpush1.msra.mxu0 %v1121_v56  ;;  %v1118_v62 = vld [vmem:[#allocation7 + $0x18] sm:$0xff] }
  0xde   : > { %1222 = vmatprep.subr.mxu0 %v1120_v58  ;;  %v1159_v58 = vld [vmem:[#allocation7 + $0x940] sm:$0xff] }
  0xdf   : > { %1223 = vmatpush1.msra.mxu0 %v1119_v60 }
  0xe0   : > { %681 = vmatmul.mubr.f32.gmra.mxu0 %v383_v63  ;;  %v1117_v63 = vld [vmem:[#allocation7 + $0x10] sm:$0xff]  ;;  %1224 = vmatprep.subr.mxu0 %v1118_v62 }
  0xe1   : > { %4223 = vmatprep.mubr.msk.f32.mxu0 %vm453_vm0, %v386_v0  ;;  %1225 = vmatpush1.msra.mxu0 %v1117_v63  ;;  %v1157_v63 = vld [vmem:[#allocation7 + $0x8d0] sm:$0xff] }
  0xe4   : > { %687 = vmatmul.mubr.f32.gmra.mxu0 %v385_v1 }
  0xe5   : > { %4224 = vmatprep.mubr.msk.f32.mxu0 %vm453_vm0, %v388_v2  ;;  %v1180_v2 = vld [vmem:[#allocation7 + $0xda8] sm:$0xff] }
  0xe6   : > { %1226 = vmatprep.subr.mxu0 %v1180_v2 }
  0xe7   : > { %1227 = vmatpush2.msra.mxu0 %v1179_v4 }
  0xe8   : > { %693 = vmatmul.mubr.f32.gmra.mxu0 %v387_v5  ;;  %1228 = vmatprep.subr.mxu0 %v1178_v6 }
  0xe9   : > { %4225 = vmatprep.mubr.msk.f32.mxu0 %vm453_vm0, %v390_v7  ;;  %1229 = vmatpush2.msra.mxu0 %v1177_v8 }
  0xea   : > { %1230 = vmatprep.subr.mxu0 %v1176_v12 }
  0xeb   : > { %1231 = vmatpush2.msra.mxu0 %v1175_v14 }
  0xec   : > { %699 = vmatmul.mubr.f32.gmra.mxu0 %v389_v11 }
  0xed   : > { %4226 = vmatprep.mubr.msk.f32.mxu0 %vm453_vm0, %v392_v13 }
  0xf0   : > { %705 = vmatmul.mubr.f32.gmra.mxu0 %v391_v15 }
  0xf1   : > { %4227 = vmatprep.mubr.msk.f32.mxu0 %vm453_vm0, %v394_v16  ;;  %v1174_v16 = vld [vmem:[#allocation7 + $0xc58] sm:$0xff] }
  0xf2   : > { %1232 = vmatprep.subr.mxu0 %v1174_v16 }
  0xf4   : > { %711 = vmatmul.mubr.f32.gmra.mxu0 %v393_v17 }
  0xf5   : > { %4228 = vmatprep.mubr.msk.f32.mxu0 %vm453_vm0, %v396_v18  ;;  %v1173_v18 = vld [vmem:[#allocation7 + $0xc50] sm:$0xff] }
  0xf6   : > { %1233 = vmatpush2.msra.mxu0 %v1173_v18 }
  0xf8   : > { %717 = vmatmul.mubr.f32.gmra.mxu0 %v395_v19 }
  0xf9   : > { %4229 = vmatprep.mubr.msk.f32.mxu0 %vm453_vm0, %v398_v20 }
  0xfc   : > { %723 = vmatmul.mubr.f32.gmra.mxu0 %v397_v21 }
  0xfd   : > { %4230 = vmatprep.mubr.msk.f32.mxu0 %vm453_vm0, %v400_v22  ;;  %v1172_v22 = vld [vmem:[#allocation7 + $0xbe8] sm:$0xff] }
  0xfe   : > { %1234 = vmatprep.subr.mxu0 %v1172_v22 }
  0xff   : > { %1235 = vmatpush2.msra.mxu0 %v1171_v24 }
 0x100   : > { %729 = vmatmul.mubr.f32.gmra.mxu0 %v399_v23  ;;  %1236 = vmatprep.subr.mxu0 %v1170_v26 }
 0x101   : > { %1237 = vmatpush2.msra.mxu0 %v1169_v28 }
 0x102   : > { %1238 = vmatprep.subr.mxu0 %v1168_v32 }
 0x103   : > { %1239 = vmatpush2.msra.mxu0 %v1167_v34 }
 0x104   : > { %1240 = vmatprep.subr.mxu0 %v1166_v36 }
 0x105   : > { %1241 = vmatpush2.msra.mxu0 %v1165_v38 }
 0x106   : > { %1242 = vmatprep.subr.mxu0 %v1164_v42 }
 0x107   : > { %1243 = vmatpush2.msra.mxu0 %v1163_v44 }
 0x108   : > { %1244 = vmatprep.subr.mxu0 %v1162_v47 }
 0x109   : > { %1245 = vmatpush2.msra.mxu0 %v1161_v49 }
 0x10a   : > { %1246 = vmatprep.subr.mxu0 %v1160_v55 }
 0x10b   : > { %1247 = vmatpush2.msra.mxu0 %v1159_v58 }
 0x164   : > { %v592_v61 = vpop.f32.mrf.mxu0 }
 0x165   : > { %v593_v0 = vadd.f32 %v592_v61, %v4911_v57  ;;  %v1158_v61 = vld [vmem:[#allocation7 + $0x8d8] sm:$0xff] }
 0x166   : > { %v594_v1 = vpop.f32.mrf.mxu0  ;;  %1248 = vmatprep.subr.mxu0 %v1158_v61 }
 0x167   : > { %v595_v3 = vadd.f32 %v594_v1, %v4914_v59  ;;  %v735_v9 = vmax.f32 %v593_v0, 0.0  ;;  %1249 = vmatpush2.msra.mxu0 %v1157_v63 }
 0x168   : > { %v598_v5 = vpop.f32.mrf.mxu0 }
 0x169   : > { %v736_v7 = vmax.f32 %v595_v3, 0.0  ;;  %v599_v10 = vadd.f32 %v598_v5, %v4911_v57  ;;  %v1156_v3 = vld [vmem:[#allocation7 + $0x868] sm:$0xff]  ;;  %v1155_v5 = vld [vmem:[#allocation7 + $0x860] sm:$0xff] }
 0x16a   : > { %v600_v11 = vpop.f32.mrf.mxu0  ;;  %1250 = vmatprep.subr.mxu0 %v1156_v3 }
 0x16b   : > { %v601_v13 = vadd.f32 %v600_v11, %v4914_v59  ;;  %924 = vmatprep.mubr.f32.mxu1 %v736_v7  ;;  %v737_v19 = vmax.f32 %v599_v10, 0.0  ;;  %v1154_v7 = vld [vmem:[#allocation7 + $0x7f8] sm:$0xff]  ;;  %1251 = vmatpush2.msra.mxu0 %v1155_v5 }
 0x16c   : > { %v604_v15 = vpop.f32.mrf.mxu0  ;;  %925 = vmatmul.mubr.f32.vlgmr.msra.gmra.mxu1 %v735_v9  ;;  %v1153_v9 = vld [vmem:[#allocation7 + $0x7f0] sm:$0xff]  ;;  %1252 = vmatprep.subr.mxu0 %v1154_v7 }
 0x16d   : > { %v738_v17 = vmax.f32 %v601_v13, 0.0  ;;  %v605_v20 = vadd.f32 %v604_v15, %v4911_v57  ;;  %1253 = vmatpush2.msra.mxu0 %v1153_v9 }
 0x16e   : > { %v606_v21 = vpop.f32.mrf.mxu0 }
 0x16f   : > { %v607_v23 = vadd.f32 %v606_v21, %v4914_v59  ;;  %930 = vmatprep.mubr.f32.mxu1 %v738_v17  ;;  %v739_v29 = vmax.f32 %v605_v20, 0.0 }
 0x170   : > { %v610_v25 = vpop.f32.mrf.mxu0  ;;  %931 = vmatmul.mubr.f32.gmra.mxu1 %v737_v19 }
 0x171   : > { %v740_v27 = vmax.f32 %v607_v23, 0.0  ;;  %v611_v30 = vadd.f32 %v610_v25, %v4911_v57 }
 0x172   : > { %v612_v31 = vpop.f32.mrf.mxu0 }
 0x173   : > { %v613_v33 = vadd.f32 %v612_v31, %v4914_v59  ;;  %936 = vmatprep.mubr.f32.mxu1 %v740_v27  ;;  %v741_v39 = vmax.f32 %v611_v30, 0.0 }
 0x174   : > { %v616_v35 = vpop.f32.mrf.mxu0  ;;  %937 = vmatmul.mubr.f32.gmra.mxu1 %v739_v29 }
 0x175   : > { %v742_v37 = vmax.f32 %v613_v33, 0.0  ;;  %v617_v40 = vadd.f32 %v616_v35, %v4911_v57 }
 0x176   : > { %v618_v41 = vpop.f32.mrf.mxu0 }
 0x177   : > { %v619_v43 = vadd.f32 %v618_v41, %v4914_v59  ;;  %942 = vmatprep.mubr.f32.mxu1 %v742_v37  ;;  %v743_v51 = vmax.f32 %v617_v40, 0.0 }
 0x178   : > { %v622_v46 = vpop.f32.mrf.mxu0  ;;  %943 = vmatmul.mubr.f32.gmra.mxu1 %v741_v39 }
 0x179   : > { %v744_v48 = vmax.f32 %v619_v43, 0.0  ;;  %v623_v52 = vadd.f32 %v622_v46, %v4911_v57 }
 0x17a   : > { %v624_v54 = vpop.f32.mrf.mxu0 }
 0x17b   : > { %v625_v56 = vadd.f32 %v624_v54, %v4914_v59  ;;  %948 = vmatprep.mubr.f32.mxu1 %v744_v48  ;;  %v745_v0 = vmax.f32 %v623_v52, 0.0 }
 0x17c   : > { %v628_v60 = vpop.f32.mrf.mxu0  ;;  %949 = vmatmul.mubr.f32.gmra.mxu1 %v743_v51 }
 0x17d   : > { %v746_v62 = vmax.f32 %v625_v56, 0.0  ;;  %v629_v1 = vadd.f32 %v628_v60, %v4911_v57 }
 0x17e   : > { %v630_v2 = vpop.f32.mrf.mxu0 }
 0x17f   : > { %v631_v4 = vadd.f32 %v630_v2, %v4914_v59  ;;  %954 = vmatprep.mubr.f32.mxu1 %v746_v62  ;;  %v747_v10 = vmax.f32 %v629_v1, 0.0 }
 0x180   : > { %v634_v6 = vpop.f32.mrf.mxu0  ;;  %955 = vmatmul.mubr.f32.gmra.mxu1 %v745_v0 }
 0x181   : > { %v748_v8 = vmax.f32 %v631_v4, 0.0  ;;  %v635_v11 = vadd.f32 %v634_v6, %v4911_v57 }
 0x182   : > { %v636_v12 = vpop.f32.mrf.mxu0 }
 0x183   : > { %v637_v13 = vadd.f32 %v636_v12, %v4914_v59  ;;  %960 = vmatprep.mubr.f32.mxu1 %v748_v8  ;;  %v749_v16 = vmax.f32 %v635_v11, 0.0 }
 0x184   : > { %v640_v14 = vpop.f32.mrf.mxu0  ;;  %961 = vmatmul.mubr.f32.gmra.mxu1 %v747_v10 }
 0x185   : > { %v750_v15 = vmax.f32 %v637_v13, 0.0  ;;  %v641_v17 = vadd.f32 %v640_v14, %v4911_v57 }
 0x186   : > { %v642_v18 = vpop.f32.mrf.mxu0 }
 0x187   : > { %v643_v19 = vadd.f32 %v642_v18, %v4914_v59  ;;  %966 = vmatprep.mubr.f32.mxu1 %v750_v15  ;;  %v751_v22 = vmax.f32 %v641_v17, 0.0 }
 0x188   : > { %v646_v20 = vpop.f32.mrf.mxu0  ;;  %967 = vmatmul.mubr.f32.gmra.mxu1 %v749_v16 }
 0x189   : > { %v752_v21 = vmax.f32 %v643_v19, 0.0  ;;  %v647_v23 = vadd.f32 %v646_v20, %v4911_v57 }
 0x18a   : > { %v648_v24 = vpop.f32.mrf.mxu0 }
 0x18b   : > { %v649_v25 = vadd.f32 %v648_v24, %v4914_v59  ;;  %972 = vmatprep.mubr.f32.mxu1 %v752_v21  ;;  %v753_v28 = vmax.f32 %v647_v23, 0.0  ;;  %v1152_v21 = vld [vmem:[#allocation7 + $0x788] sm:$0xff]  ;;  %v1151_v23 = vld [vmem:[#allocation7 + $0x780] sm:$0xff] }
 0x18c   : > { %v652_v26 = vpop.f32.mrf.mxu0  ;;  %973 = vmatmul.mubr.f32.gmra.mxu1 %v751_v22  ;;  %1254 = vmatprep.subr.mxu0 %v1152_v21  ;;  %v848_v21 = vld [vmem:[#allocation10 + $0x1] ss:$8 sm:$0x3] }
 0x18d   : > { %v754_v27 = vmax.f32 %v649_v25, 0.0  ;;  %v653_v29 = vadd.f32 %v652_v26, %v4911_v57  ;;  %1255 = vmatpush2.msra.mxu0 %v1151_v23  ;;  %v1150_v25 = vld [vmem:[#allocation7 + $0x718] sm:$0xff]  ;;  %v1456_v23 = vld [vmem:[#allocation7 + $0x108] sm:$0xff] }
 0x18e   : > { %v654_v30 = vpop.f32.mrf.mxu0  ;;  %1256 = vmatprep.subr.mxu0 %v1150_v25  ;;  %v4965_v25 = vrot.slane %v848_v21, %v4905_v50 }
 0x18f   : > { %v655_v31 = vadd.f32 %v654_v30, %v4914_v59  ;;  %978 = vmatprep.mubr.f32.mxu1 %v754_v27  ;;  %v755_v34 = vmax.f32 %v653_v29, 0.0  ;;  %v1149_v29 = vld [vmem:[#allocation7 + $0x710] sm:$0xff] }
 0x190   : > { %v658_v32 = vpop.f32.mrf.mxu0  ;;  %979 = vmatmul.mubr.f32.gmra.mxu1 %v753_v28  ;;  %1257 = vmatpush2.msra.mxu0 %v1149_v29 }
 0x191   : > { %v756_v33 = vmax.f32 %v655_v31, 0.0  ;;  %v659_v35 = vadd.f32 %v658_v32, %v4911_v57 }
 0x192   : > { %v660_v36 = vpop.f32.mrf.mxu0 }
 0x193   : > { %v661_v37 = vadd.f32 %v660_v36, %v4914_v59  ;;  %984 = vmatprep.mubr.f32.mxu1 %v756_v33  ;;  %v757_v40 = vmax.f32 %v659_v35, 0.0 }
 0x194   : > { %v664_v38 = vpop.f32.mrf.mxu0  ;;  %985 = vmatmul.mubr.f32.gmra.mxu1 %v755_v34 }
 0x195   : > { %v758_v39 = vmax.f32 %v661_v37, 0.0  ;;  %v665_v41 = vadd.f32 %v664_v38, %v4911_v57 }
 0x196   : > { %v666_v42 = vpop.f32.mrf.mxu0 }
 0x197   : > { %v667_v43 = vadd.f32 %v666_v42, %v4914_v59  ;;  %990 = vmatprep.mubr.f32.mxu1 %v758_v39  ;;  %v759_v47 = vmax.f32 %v665_v41, 0.0 }
 0x198   : > { %v670_v44 = vpop.f32.mrf.mxu0  ;;  %991 = vmatmul.mubr.f32.gmra.mxu1 %v757_v40 }
 0x199   : > { %v760_v46 = vmax.f32 %v667_v43, 0.0  ;;  %v671_v48 = vadd.f32 %v670_v44, %v4911_v57 }
 0x19a   : > { %v672_v49 = vpop.f32.mrf.mxu0 }
 0x19b   : > { %v673_v51 = vadd.f32 %v672_v49, %v4914_v59  ;;  %996 = vmatprep.mubr.f32.mxu1 %v760_v46  ;;  %v761_v55 = vmax.f32 %v671_v48, 0.0 }
 0x19c   : > { %v676_v52 = vpop.f32.mrf.mxu0  ;;  %997 = vmatmul.mubr.f32.gmra.mxu1 %v759_v47 }
 0x19d   : > { %v762_v54 = vmax.f32 %v673_v51, 0.0  ;;  %v677_v56 = vadd.f32 %v676_v52, %v4911_v57 }
 0x19e   : > { %v678_v58 = vpop.f32.mrf.mxu0 }
 0x19f   : > { %v679_v60 = vadd.f32 %v678_v58, %v4914_v59  ;;  %1002 = vmatprep.mubr.f32.mxu1 %v762_v54  ;;  %v763_v63 = vmax.f32 %v677_v56, 0.0 }
 0x1a0   : > { %v682_v61 = vpop.f32.mrf.mxu0  ;;  %1003 = vmatmul.mubr.f32.gmra.mxu1 %v761_v55 }
 0x1a1   : > { %v764_v62 = vmax.f32 %v679_v60, 0.0  ;;  %v683_v0 = vadd.f32 %v682_v61, %v4911_v57 }
 0x1a2   : > { %v684_v1 = vpop.f32.mrf.mxu0 }
 0x1a3   : > { %v685_v2 = vadd.f32 %v684_v1, %v4914_v59  ;;  %1008 = vmatprep.mubr.f32.mxu1 %v764_v62  ;;  %v765_v5 = vmax.f32 %v683_v0, 0.0  ;;  %v1482_v62 = vld [vmem:[#allocation7 + $0x6b8] sm:$0xff]  ;;  %v1480_v0 = vld [vmem:[#allocation7 + $0x648] sm:$0xff]  ;;  %v1479_v1 = vld [vmem:[#allocation7 + $0x640] sm:$0xff] }
 0x1a4   : > { %v688_v3 = vpop.f32.mrf.mxu0  ;;  %1009 = vmatmul.mubr.f32.gmra.mxu1 %v763_v63  ;;  %v1481_v63 = vld [vmem:[#allocation7 + $0x6b0] sm:$0xff]  ;;  %1528 = vmatprep.subr.mxu1 %v1482_v62 }
 0x1a5   : > { %v766_v4 = vmax.f32 %v685_v2, 0.0  ;;  %v689_v6 = vadd.f32 %v688_v3, %v4911_v57  ;;  %1529 = vmatpush1.msra.mxu1 %v1481_v63  ;;  %v1478_v2 = vld [vmem:[#allocation7 + $0x5d8] sm:$0xff]  ;;  %v1477_v3 = vld [vmem:[#allocation7 + $0x5d0] sm:$0xff]  ;;  %v1504_v63 = vld [vmem:[#allocation7 + $0xb88] sm:$0xff] }
 0x1a6   : > { %v690_v7 = vpop.f32.mrf.mxu0  ;;  %1530 = vmatprep.subr.mxu1 %v1480_v0 }
 0x1a7   : > { %v691_v8 = vadd.f32 %v690_v7, %v4914_v59  ;;  %1014 = vmatprep.mubr.f32.mxu1 %v766_v4  ;;  %v767_v11 = vmax.f32 %v689_v6, 0.0  ;;  %1531 = vmatpush1.msra.mxu1 %v1479_v1  ;;  %v1475_v4 = vld [vmem:[#allocation7 + $0x560] sm:$0xff]  ;;  %v1472_v6 = vld [vmem:[#allocation7 + $0x488] sm:$0xff] }
 0x1a8   : > { %v694_v9 = vpop.f32.mrf.mxu0  ;;  %1015 = vmatmul.mubr.f32.gmra.mxu1 %v765_v5  ;;  %1532 = vmatprep.subr.mxu1 %v1478_v2  ;;  %v1473_v5 = vld [vmem:[#allocation7 + $0x4f0] sm:$0xff]  ;;  %v1471_v7 = vld [vmem:[#allocation7 + $0x480] sm:$0xff] }
 0x1a9   : > { %v768_v10 = vmax.f32 %v691_v8, 0.0  ;;  %v695_v12 = vadd.f32 %v694_v9, %v4911_v57  ;;  %1533 = vmatpush1.msra.mxu1 %v1477_v3  ;;  %v1470_v8 = vld [vmem:[#allocation7 + $0x418] sm:$0xff]  ;;  %v1469_v9 = vld [vmem:[#allocation7 + $0x410] sm:$0xff]  ;;  %v1503_v1 = vld [vmem:[#allocation7 + $0xb80] sm:$0xff] }
 0x1aa   : > { %v696_v13 = vpop.f32.mrf.mxu0 }
 0x1ab   : > { %v697_v14 = vadd.f32 %v696_v13, %v4914_v59  ;;  %1020 = vmatprep.mubr.f32.mxu1 %v768_v10  ;;  %v769_v17 = vmax.f32 %v695_v12, 0.0  ;;  %v1468_v10 = vld [vmem:[#allocation7 + $0x3a8] sm:$0xff]  ;;  %v1466_v12 = vld [vmem:[#allocation7 + $0x338] sm:$0xff]  ;;  %v1465_v13 = vld [vmem:[#allocation7 + $0x330] sm:$0xff] }
 0x1ac   : > { %v700_v15 = vpop.f32.mrf.mxu0  ;;  %1021 = vmatmul.mubr.f32.gmra.mxu1 %v767_v11  ;;  %v1467_v11 = vld [vmem:[#allocation7 + $0x3a0] sm:$0xff] }
 0x1ad   : > { %v770_v16 = vmax.f32 %v697_v14, 0.0  ;;  %v701_v18 = vadd.f32 %v700_v15, %v4911_v57  ;;  %v1464_v14 = vld [vmem:[#allocation7 + $0x2c8] sm:$0xff]  ;;  %v1463_v15 = vld [vmem:[#allocation7 + $0x2c0] sm:$0xff] }
 0x1ae   : > { %v702_v19 = vpop.f32.mrf.mxu0 }
 0x1af   : > { %v703_v20 = vadd.f32 %v702_v19, %v4914_v59  ;;  %1026 = vmatprep.mubr.f32.mxu1 %v770_v16  ;;  %v771_v26 = vmax.f32 %v701_v18, 0.0  ;;  %v1462_v16 = vld [vmem:[#allocation7 + $0x258] sm:$0xff]  ;;  %v1460_v18 = vld [vmem:[#allocation7 + $0x1e8] sm:$0xff]  ;;  %v1459_v19 = vld [vmem:[#allocation7 + $0x1e0] sm:$0xff] }
 0x1b0   : > { %v706_v22 = vpop.f32.mrf.mxu0  ;;  %1027 = vmatmul.mubr.f32.gmra.mxu1 %v769_v17  ;;  %v1461_v17 = vld [vmem:[#allocation7 + $0x250] sm:$0xff] }
 0x1b1   : > { %v772_v24 = vmax.f32 %v703_v20, 0.0  ;;  %v707_v27 = vadd.f32 %v706_v22, %v4911_v57  ;;  %v1458_v20 = vld [vmem:[#allocation7 + $0x178] sm:$0xff]  ;;  %v1457_v22 = vld [vmem:[#allocation7 + $0x170] sm:$0xff] }
 0x1b2   : > { %v708_v28 = vpop.f32.mrf.mxu0 }
 0x1b3   : > { %v709_v30 = vadd.f32 %v708_v28, %v4914_v59  ;;  %1032 = vmatprep.mubr.f32.mxu1 %v772_v24  ;;  %v773_v33 = vmax.f32 %v707_v27, 0.0  ;;  %v1455_v24 = vld [vmem:[#allocation7 + $0x100] sm:$0xff]  ;;  %v4968_v27 = vrot.slane %v848_v21, %v4908_v53  ;;  %v1453_v28 = vld [vmem:[#allocation7 + $0x90] sm:$0xff] }
 0x1b4   : > { %v712_v31 = vpop.f32.mrf.mxu0  ;;  %1033 = vmatmul.mubr.f32.gmra.mxu1 %v771_v26  ;;  %v1454_v26 = vld [vmem:[#allocation7 + $0x98] sm:$0xff] }
 0x1b5   : > { %v774_v32 = vmax.f32 %v709_v30, 0.0  ;;  %v713_v34 = vadd.f32 %v712_v31, %v4911_v57  ;;  %v1452_v30 = vld [vmem:[#allocation7 + $0x28] sm:$0xff]  ;;  %v1451_v31 = vld [vmem:[#allocation7 + $0x20] sm:$0xff] }
 0x1b6   : > { %v714_v35 = vpop.f32.mrf.mxu0 }
 0x1b7   : > { %v715_v36 = vadd.f32 %v714_v35, %v4914_v59  ;;  %1038 = vmatprep.mubr.f32.mxu1 %v774_v32  ;;  %v775_v39 = vmax.f32 %v713_v34, 0.0  ;;  %v1514_v34 = vld [vmem:[#allocation7 + $0xdb8] sm:$0xff] }
 0x1b8   : > { %v718_v37 = vpop.f32.mrf.mxu0  ;;  %1039 = vmatmul.mubr.f32.gmra.mxu1 %v773_v33 }
 0x1b9   : > { %v776_v38 = vmax.f32 %v715_v36, 0.0  ;;  %v719_v40 = vadd.f32 %v718_v37, %v4911_v57  ;;  %v1513_v36 = vld [vmem:[#allocation7 + $0xdb0] sm:$0xff] }
 0x1ba   : > { %v720_v41 = vpop.f32.mrf.mxu0 }
 0x1bb   : > { %v721_v42 = vadd.f32 %v720_v41, %v4914_v59  ;;  %1044 = vmatprep.mubr.f32.mxu1 %v776_v38  ;;  %v777_v46 = vmax.f32 %v719_v40, 0.0  ;;  %v1512_v38 = vld [vmem:[#allocation7 + $0xd48] sm:$0xff]  ;;  %v1511_v40 = vld [vmem:[#allocation7 + $0xd40] sm:$0xff] }
 0x1bc   : > { %v724_v43 = vpop.f32.mrf.mxu0  ;;  %1045 = vmatmul.mubr.f32.gmra.mxu1 %v775_v39 }
 0x1bd   : > { %v778_v44 = vmax.f32 %v721_v42, 0.0  ;;  %v725_v47 = vadd.f32 %v724_v43, %v4911_v57 }
 0x1be   : > { %v726_v48 = vpop.f32.mrf.mxu0 }
 0x1bf   : > { %v727_v49 = vadd.f32 %v726_v48, %v4914_v59  ;;  %1050 = vmatprep.mubr.f32.mxu1 %v778_v44  ;;  %v779_v54 = vmax.f32 %v725_v47, 0.0  ;;  %v1510_v44 = vld [vmem:[#allocation7 + $0xcd8] sm:$0xff]  ;;  %v1509_v47 = vld [vmem:[#allocation7 + $0xcd0] sm:$0xff] }
 0x1c0   : > { %v730_v51 = vpop.f32.mrf.mxu0  ;;  %1051 = vmatmul.mubr.f32.gmra.mxu1 %v777_v46 }
 0x1c1   : > { %v780_v52 = vmax.f32 %v727_v49, 0.0  ;;  %v731_v55 = vadd.f32 %v730_v51, %v4911_v57  ;;  %v1476_v57 = vld [vmem:[#allocation7 + $0x568] sm:$0xff] }
 0x1c2   : > { %v732_v56 = vpop.f32.mrf.mxu0  ;;  %1534 = vmatprep.subr.mxu1 %v1476_v57  ;;  %v1508_v49 = vld [vmem:[#allocation7 + $0xc68] sm:$0xff] }
 0x1c3   : > { %v733_v58 = vadd.f32 %v732_v56, %v4914_v59  ;;  %1056 = vmatprep.mubr.f32.mxu1 %v780_v52  ;;  %v781_v61 = vmax.f32 %v731_v55, 0.0  ;;  %v1474_v59 = vld [vmem:[#allocation7 + $0x4f8] sm:$0xff]  ;;  %1535 = vmatpush1.msra.mxu1 %v1475_v4  ;;  %v1507_v52 = vld [vmem:[#allocation7 + $0xc60] sm:$0xff] }
 0x1c4   : > { %1057 = vmatmul.mubr.f32.gmra.mxu1 %v779_v54  ;;  %1536 = vmatprep.subr.mxu1 %v1474_v59  ;;  %v1502_v4 = vld [vmem:[#allocation7 + $0xb18] sm:$0xff] }
 0x1c5   : > { %v782_v60 = vmax.f32 %v733_v58, 0.0  ;;  %1537 = vmatpush1.msra.mxu1 %v1473_v5  ;;  %v1506_v58 = vld [vmem:[#allocation7 + $0xbf8] sm:$0xff]  ;;  %v1501_v5 = vld [vmem:[#allocation7 + $0xb10] sm:$0xff] }
 0x1c6   : > { %1538 = vmatprep.subr.mxu1 %v1472_v6 }
 0x1c7   : > { %1062 = vmatprep.mubr.f32.mxu1 %v782_v60  ;;  %1539 = vmatpush1.msra.mxu1 %v1471_v7  ;;  %v1500_v7 = vld [vmem:[#allocation7 + $0xaa8] sm:$0xff] }
 0x1c8   : > { %1063 = vmatmul.mubr.f32.gmra.mxu1 %v781_v61  ;;  %1540 = vmatprep.subr.mxu1 %v1470_v8  ;;  %v1505_v61 = vld [vmem:[#allocation7 + $0xbf0] sm:$0xff] }
 0x1c9   : > { %1541 = vmatpush1.msra.mxu1 %v1469_v9  ;;  %v1499_v9 = vld [vmem:[#allocation7 + $0xaa0] sm:$0xff] }
 0x1ca   : > { %1542 = vmatprep.subr.mxu1 %v1468_v10 }
 0x1cb   : > { %1543 = vmatpush1.msra.mxu1 %v1467_v11 }
 0x1cc   : > { %1544 = vmatprep.subr.mxu1 %v1466_v12 }
 0x1cd   : > { %1545 = vmatpush1.msra.mxu1 %v1465_v13  ;;  %v1498_v13 = vld [vmem:[#allocation7 + $0xa38] sm:$0xff] }
 0x1ce   : > { %1546 = vmatprep.subr.mxu1 %v1464_v14 }
 0x1cf   : > { %1547 = vmatpush1.msra.mxu1 %v1463_v15  ;;  %v1497_v15 = vld [vmem:[#allocation7 + $0xa30] sm:$0xff] }
 0x1d0   : > { %1548 = vmatprep.subr.mxu1 %v1462_v16 }
 0x1d1   : > { %1549 = vmatpush1.msra.mxu1 %v1461_v17  ;;  %v1496_v17 = vld [vmem:[#allocation7 + $0x9c8] sm:$0xff] }
 0x1d2   : > { %1550 = vmatprep.subr.mxu1 %v1460_v18 }
 0x1d3   : > { %1551 = vmatpush1.msra.mxu1 %v1459_v19  ;;  %v1495_v19 = vld [vmem:[#allocation7 + $0x9c0] sm:$0xff] }
 0x1d4   : > { %1552 = vmatprep.subr.mxu1 %v1458_v20 }
 0x1d5   : > { %1553 = vmatpush1.msra.mxu1 %v1457_v22 }
 0x1d6   : > { %1554 = vmatprep.subr.mxu1 %v1456_v23  ;;  %v1494_v23 = vld [vmem:[#allocation7 + $0x958] sm:$0xff] }
 0x1d7   : > { %1555 = vmatpush1.msra.mxu1 %v1455_v24 }
 0x1d8   : > { %1556 = vmatprep.subr.mxu1 %v1454_v26  ;;  %v1493_v26 = vld [vmem:[#allocation7 + $0x950] sm:$0xff] }
 0x1d9   : > { %1557 = vmatpush1.msra.mxu1 %v1453_v28 }
 0x1da   : > { %1558 = vmatprep.subr.mxu1 %v1452_v30 }
 0x1db   : > { %1559 = vmatpush1.msra.mxu1 %v1451_v31  ;;  %v1491_v31 = vld [vmem:[#allocation7 + $0x8e0] sm:$0xff] }
 0x1dc   : > { %1560 = vmatprep.subr.mxu1 %v1514_v34 }
 0x1dd   : > { %1561 = vmatpush2.msra.mxu1 %v1513_v36 }
 0x1de   : > { %1562 = vmatprep.subr.mxu1 %v1512_v38 }
 0x1df   : > { %1563 = vmatpush2.msra.mxu1 %v1511_v40 }
 0x1e0   : > { %1564 = vmatprep.subr.mxu1 %v1510_v44 }
 0x1e1   : > { %1565 = vmatpush2.msra.mxu1 %v1509_v47 }
 0x1e2   : > { %1566 = vmatprep.subr.mxu1 %v1508_v49 }
 0x1e3   : > { %1567 = vmatpush2.msra.mxu1 %v1507_v52 }
 0x1e4   : > { %1568 = vmatprep.subr.mxu1 %v1506_v58 }
 0x1e5   : > { %1569 = vmatpush2.msra.mxu1 %v1505_v61 }
 0x1e6   : > { %1570 = vmatprep.subr.mxu1 %v1504_v63 }
 0x1e7   : > { %1571 = vmatpush2.msra.mxu1 %v1503_v1 }
 0x1e8   : > { %1572 = vmatprep.subr.mxu1 %v1502_v4 }
 0x1e9   : > { %1573 = vmatpush2.msra.mxu1 %v1501_v5 }
 0x1ea   : > { %1574 = vmatprep.subr.mxu1 %v1500_v7 }
 0x1eb   : > { %1575 = vmatpush2.msra.mxu1 %v1499_v9 }
 0x1ec   : > { %1576 = vmatprep.subr.mxu1 %v1498_v13 }
 0x1ed   : > { %1577 = vmatpush2.msra.mxu1 %v1497_v15 }
 0x1ee   : > { %1578 = vmatprep.subr.mxu1 %v1496_v17 }
 0x1ef   : > { %1579 = vmatpush2.msra.mxu1 %v1495_v19 }
 0x1f0   : > { %1580 = vmatprep.subr.mxu1 %v1494_v23 }
 0x1f1   : > { %1581 = vmatpush2.msra.mxu1 %v1493_v26 }
 0x22c   : > { %v926_v29 = vpop.f32.mrf.mxu1 }
 0x22d   : > { %v927_v32 = vadd.f32 %v926_v29, %v4965_v25  ;;  %v1492_v29 = vld [vmem:[#allocation7 + $0x8e8] sm:$0xff] }
 0x22e   : > { %v928_v33 = vpop.f32.mrf.mxu1  ;;  %1582 = vmatprep.subr.mxu1 %v1492_v29 }
 0x22f   : > { %v929_v35 = vadd.f32 %v928_v33, %v4968_v27  ;;  %v1069_v41 = vmax.f32 %v927_v32, 0.0  ;;  %1583 = vmatpush2.msra.mxu1 %v1491_v31 }
 0x230   : > { %v932_v37 = vpop.f32.mrf.mxu1 }
 0x231   : > { %v1070_v39 = vmax.f32 %v929_v35, 0.0  ;;  %v933_v42 = vadd.f32 %v932_v37, %v4965_v25  ;;  %v1490_v35 = vld [vmem:[#allocation7 + $0x878] sm:$0xff]  ;;  %v1489_v37 = vld [vmem:[#allocation7 + $0x870] sm:$0xff] }
 0x232   : > { %v934_v43 = vpop.f32.mrf.mxu1  ;;  %1584 = vmatprep.subr.mxu1 %v1490_v35 }
 0x233   : > { %v935_v46 = vadd.f32 %v934_v43, %v4968_v27  ;;  %1258 = vmatprep.mubr.f32.mxu0 %v1070_v39  ;;  %v1071_v54 = vmax.f32 %v933_v42, 0.0  ;;  %v1488_v39 = vld [vmem:[#allocation7 + $0x808] sm:$0xff]  ;;  %1585 = vmatpush2.msra.mxu1 %v1489_v37 }
 0x234   : > { %v938_v48 = vpop.f32.mrf.mxu1  ;;  %1259 = vmatmul.mubr.f32.vlgmr.msra.gmra.mxu0 %v1069_v41  ;;  %v1487_v41 = vld [vmem:[#allocation7 + $0x800] sm:$0xff]  ;;  %1586 = vmatprep.subr.mxu1 %v1488_v39 }
 0x235   : > { %v1072_v51 = vmax.f32 %v935_v46, 0.0  ;;  %v939_v55 = vadd.f32 %v938_v48, %v4965_v25  ;;  %1587 = vmatpush2.msra.mxu1 %v1487_v41 }
 0x236   : > { %v940_v56 = vpop.f32.mrf.mxu1 }
 0x237   : > { %v941_v60 = vadd.f32 %v940_v56, %v4968_v27  ;;  %1264 = vmatprep.mubr.f32.mxu0 %v1072_v51  ;;  %v1073_v2 = vmax.f32 %v939_v55, 0.0 }
 0x238   : > { %v944_v62 = vpop.f32.mrf.mxu1  ;;  %1265 = vmatmul.mubr.f32.gmra.mxu0 %v1071_v54 }
 0x239   : > { %v1074_v0 = vmax.f32 %v941_v60, 0.0  ;;  %v945_v3 = vadd.f32 %v944_v62, %v4965_v25 }
 0x23a   : > { %v946_v57 = vpop.f32.mrf.mxu1 }
 0x23b   : > { %v947_v59 = vadd.f32 %v946_v57, %v4968_v27  ;;  %1270 = vmatprep.mubr.f32.mxu0 %v1074_v0  ;;  %v1075_v10 = vmax.f32 %v945_v3, 0.0 }
 0x23c   : > { %v950_v6 = vpop.f32.mrf.mxu1  ;;  %1271 = vmatmul.mubr.f32.gmra.mxu0 %v1073_v2 }
 0x23d   : > { %v1076_v8 = vmax.f32 %v947_v59, 0.0  ;;  %v951_v11 = vadd.f32 %v950_v6, %v4965_v25 }
 0x23e   : > { %v952_v12 = vpop.f32.mrf.mxu1 }
 0x23f   : > { %v953_v14 = vadd.f32 %v952_v12, %v4968_v27  ;;  %1276 = vmatprep.mubr.f32.mxu0 %v1076_v8  ;;  %v1077_v20 = vmax.f32 %v951_v11, 0.0 }
 0x240   : > { %v956_v16 = vpop.f32.mrf.mxu1  ;;  %1277 = vmatmul.mubr.f32.gmra.mxu0 %v1075_v10 }
 0x241   : > { %v1078_v18 = vmax.f32 %v953_v14, 0.0  ;;  %v957_v21 = vadd.f32 %v956_v16, %v4965_v25 }
 0x242   : > { %v958_v22 = vpop.f32.mrf.mxu1 }
 0x243   : > { %v959_v24 = vadd.f32 %v958_v22, %v4968_v27  ;;  %1282 = vmatprep.mubr.f32.mxu0 %v1078_v18  ;;  %v1079_v32 = vmax.f32 %v957_v21, 0.0 }
 0x244   : > { %v962_v28 = vpop.f32.mrf.mxu1  ;;  %1283 = vmatmul.mubr.f32.gmra.mxu0 %v1077_v20 }
 0x245   : > { %v1080_v30 = vmax.f32 %v959_v24, 0.0  ;;  %v963_v33 = vadd.f32 %v962_v28, %v4965_v25 }
 0x246   : > { %v964_v34 = vpop.f32.mrf.mxu1 }
 0x247   : > { %v965_v36 = vadd.f32 %v964_v34, %v4968_v27  ;;  %1288 = vmatprep.mubr.f32.mxu0 %v1080_v30  ;;  %v1081_v42 = vmax.f32 %v963_v33, 0.0 }
 0x248   : > { %v968_v38 = vpop.f32.mrf.mxu1  ;;  %1289 = vmatmul.mubr.f32.gmra.mxu0 %v1079_v32 }
 0x249   : > { %v1082_v40 = vmax.f32 %v965_v36, 0.0  ;;  %v969_v43 = vadd.f32 %v968_v38, %v4965_v25 }
 0x24a   : > { %v970_v44 = vpop.f32.mrf.mxu1 }
 0x24b   : > { %v971_v46 = vadd.f32 %v970_v44, %v4968_v27  ;;  %1294 = vmatprep.mubr.f32.mxu0 %v1082_v40  ;;  %v1083_v49 = vmax.f32 %v969_v43, 0.0 }
 0x24c   : > { %v974_v47 = vpop.f32.mrf.mxu1  ;;  %1295 = vmatmul.mubr.f32.gmra.mxu0 %v1081_v42 }
 0x24d   : > { %v1084_v48 = vmax.f32 %v971_v46, 0.0  ;;  %v975_v51 = vadd.f32 %v974_v47, %v4965_v25 }
 0x24e   : > { %v976_v52 = vpop.f32.mrf.mxu1 }
 0x24f   : > { %v977_v54 = vadd.f32 %v976_v52, %v4968_v27  ;;  %1300 = vmatprep.mubr.f32.mxu0 %v1084_v48  ;;  %v1085_v58 = vmax.f32 %v975_v51, 0.0 }
 0x250   : > { %v980_v55 = vpop.f32.mrf.mxu1  ;;  %1301 = vmatmul.mubr.f32.gmra.mxu0 %v1083_v49 }
 0x251   : > { %v1086_v56 = vmax.f32 %v977_v54, 0.0  ;;  %v981_v60 = vadd.f32 %v980_v55, %v4965_v25 }
 0x252   : > { %v982_v61 = vpop.f32.mrf.mxu1 }
 0x253   : > { %v983_v62 = vadd.f32 %v982_v61, %v4968_v27  ;;  %1306 = vmatprep.mubr.f32.mxu0 %v1086_v56  ;;  %v1087_v1 = vmax.f32 %v981_v60, 0.0  ;;  %v1486_v56 = vld [vmem:[#allocation7 + $0x798] sm:$0xff]  ;;  %v1485_v60 = vld [vmem:[#allocation7 + $0x790] sm:$0xff] }
 0x254   : > { %v986_v63 = vpop.f32.mrf.mxu1  ;;  %1307 = vmatmul.mubr.f32.gmra.mxu0 %v1085_v58  ;;  %1588 = vmatprep.subr.mxu1 %v1486_v56  ;;  %v1810_v56 = vld [vmem:[#allocation7 + $0x188] sm:$0xff] }
 0x255   : > { %v1088_v0 = vmax.f32 %v983_v62, 0.0  ;;  %v987_v2 = vadd.f32 %v986_v63, %v4965_v25  ;;  %1589 = vmatpush2.msra.mxu1 %v1485_v60  ;;  %v1484_v62 = vld [vmem:[#allocation7 + $0x728] sm:$0xff]  ;;  %v1809_v60 = vld [vmem:[#allocation7 + $0x180] sm:$0xff] }
 0x256   : > { %v988_v3 = vpop.f32.mrf.mxu1  ;;  %1590 = vmatprep.subr.mxu1 %v1484_v62  ;;  %v1801_v62 = vld [vmem:[#allocation7 + $0x110] sm:$0xff] }
 0x257   : > { %v989_v57 = vadd.f32 %v988_v3, %v4968_v27  ;;  %1312 = vmatprep.mubr.f32.mxu0 %v1088_v0  ;;  %v1089_v5 = vmax.f32 %v987_v2, 0.0  ;;  %v1483_v2 = vld [vmem:[#allocation7 + $0x720] sm:$0xff] }
 0x258   : > { %v992_v4 = vpop.f32.mrf.mxu1  ;;  %1313 = vmatmul.mubr.f32.gmra.mxu0 %v1087_v1  ;;  %1591 = vmatpush2.msra.mxu1 %v1483_v2  ;;  %v1793_v2 = vld [vmem:[#allocation7 + $0xa0] sm:$0xff] }
 0x259   : > { %v1090_v59 = vmax.f32 %v989_v57, 0.0  ;;  %v993_v6 = vadd.f32 %v992_v4, %v4965_v25 }
 0x25a   : > { %v994_v7 = vpop.f32.mrf.mxu1 }
 0x25b   : > { %v995_v8 = vadd.f32 %v994_v7, %v4968_v27  ;;  %1318 = vmatprep.mubr.f32.mxu0 %v1090_v59  ;;  %v1091_v11 = vmax.f32 %v993_v6, 0.0 }
 0x25c   : > { %v998_v9 = vpop.f32.mrf.mxu1  ;;  %1319 = vmatmul.mubr.f32.gmra.mxu0 %v1089_v5 }
 0x25d   : > { %v1092_v10 = vmax.f32 %v995_v8, 0.0  ;;  %v999_v12 = vadd.f32 %v998_v9, %v4965_v25 }
 0x25e   : > { %v1000_v13 = vpop.f32.mrf.mxu1 }
 0x25f   : > { %v1001_v14 = vadd.f32 %v1000_v13, %v4968_v27  ;;  %1324 = vmatprep.mubr.f32.mxu0 %v1092_v10  ;;  %v1093_v17 = vmax.f32 %v999_v12, 0.0 }
 0x260   : > { %v1004_v15 = vpop.f32.mrf.mxu1  ;;  %1325 = vmatmul.mubr.f32.gmra.mxu0 %v1091_v11 }
 0x261   : > { %v1094_v16 = vmax.f32 %v1001_v14, 0.0  ;;  %v1005_v18 = vadd.f32 %v1004_v15, %v4965_v25 }
 0x262   : > { %v1006_v19 = vpop.f32.mrf.mxu1 }
 0x263   : > { %v1007_v20 = vadd.f32 %v1006_v19, %v4968_v27  ;;  %1330 = vmatprep.mubr.f32.mxu0 %v1094_v16  ;;  %v1095_v23 = vmax.f32 %v1005_v18, 0.0 }
 0x264   : > { %v1010_v21 = vpop.f32.mrf.mxu1  ;;  %1331 = vmatmul.mubr.f32.gmra.mxu0 %v1093_v17 }
 0x265   : > { %v1096_v22 = vmax.f32 %v1007_v20, 0.0  ;;  %v1011_v24 = vadd.f32 %v1010_v21, %v4965_v25 }
 0x266   : > { %v1012_v26 = vpop.f32.mrf.mxu1 }
 0x267   : > { %v1013_v28 = vadd.f32 %v1012_v26, %v4968_v27  ;;  %1336 = vmatprep.mubr.f32.mxu0 %v1096_v22  ;;  %v1097_v31 = vmax.f32 %v1011_v24, 0.0 }
 0x268   : > { %v1016_v29 = vpop.f32.mrf.mxu1  ;;  %1337 = vmatmul.mubr.f32.gmra.mxu0 %v1095_v23 }
 0x269   : > { %v1098_v30 = vmax.f32 %v1013_v28, 0.0  ;;  %v1017_v32 = vadd.f32 %v1016_v29, %v4965_v25 }
 0x26a   : > { %v1018_v33 = vpop.f32.mrf.mxu1 }
 0x26b   : > { %v1019_v34 = vadd.f32 %v1018_v33, %v4968_v27  ;;  %1342 = vmatprep.mubr.f32.mxu0 %v1098_v30  ;;  %v1099_v37 = vmax.f32 %v1017_v32, 0.0  ;;  %v1906_v30 = vld [vmem:[#allocation7 + $0x6c8] sm:$0xff]  ;;  %v1898_v32 = vld [vmem:[#allocation7 + $0x658] sm:$0xff]  ;;  %v1897_v33 = vld [vmem:[#allocation7 + $0x650] sm:$0xff] }
 0x26c   : > { %v1022_v35 = vpop.f32.mrf.mxu1  ;;  %1343 = vmatmul.mubr.f32.gmra.mxu0 %v1097_v31  ;;  %v1905_v31 = vld [vmem:[#allocation7 + $0x6c0] sm:$0xff]  ;;  %2086 = vmatprep.subr.mxu0 %v1906_v30  ;;  %v1891_v30 = vld [vmem:[#allocation7 + $0x5f0] sm:$0xff] }
 0x26d   : > { %v1100_v36 = vmax.f32 %v1019_v34, 0.0  ;;  %v1023_v38 = vadd.f32 %v1022_v35, %v4965_v25  ;;  %2087 = vmatpush1.msra.mxu0 %v1905_v31  ;;  %v1890_v34 = vld [vmem:[#allocation7 + $0x5e8] sm:$0xff]  ;;  %v1889_v35 = vld [vmem:[#allocation7 + $0x5e0] sm:$0xff]  ;;  %v2010_v31 = vld [vmem:[#allocation7 + $0xc78] sm:$0xff] }
 0x26e   : > { %v1024_v39 = vpop.f32.mrf.mxu1  ;;  %2088 = vmatprep.subr.mxu0 %v1898_v32 }
 0x26f   : > { %v1025_v40 = vadd.f32 %v1024_v39, %v4968_v27  ;;  %1348 = vmatprep.mubr.f32.mxu0 %v1100_v36  ;;  %v1101_v43 = vmax.f32 %v1023_v38, 0.0  ;;  %v1908_v36 = vld [vmem:[#allocation7 + $0x6d8] sm:$0xff]  ;;  %2089 = vmatpush1.msra.mxu0 %v1897_v33  ;;  %v1873_v38 = vld [vmem:[#allocation7 + $0x500] sm:$0xff]  ;;  %v1884_v33 = vld [vmem:[#allocation7 + $0x588] sm:$0xff] }
 0x270   : > { %v1028_v41 = vpop.f32.mrf.mxu1  ;;  %1349 = vmatmul.mubr.f32.gmra.mxu0 %v1099_v37  ;;  %2295 = vmatprep.subr.mxu1 %v1908_v36  ;;  %v1874_v37 = vld [vmem:[#allocation7 + $0x508] sm:$0xff]  ;;  %v1866_v39 = vld [vmem:[#allocation7 + $0x498] sm:$0xff]  ;;  %v1883_v36 = vld [vmem:[#allocation7 + $0x580] sm:$0xff] }
 0x271   : > { %v1102_v42 = vmax.f32 %v1025_v40, 0.0  ;;  %v1029_v44 = vadd.f32 %v1028_v41, %v4965_v25  ;;  %2090 = vmatprep.subr.mxu0 %v1890_v34  ;;  %v1865_v40 = vld [vmem:[#allocation7 + $0x490] sm:$0xff]  ;;  %v1858_v41 = vld [vmem:[#allocation7 + $0x428] sm:$0xff] }
 0x272   : > { %v1030_v46 = vpop.f32.mrf.mxu1  ;;  %2091 = vmatpush1.msra.mxu0 %v1889_v35  ;;  %v2009_v34 = vld [vmem:[#allocation7 + $0xc70] sm:$0xff] }
 0x273   : > { %v1031_v47 = vadd.f32 %v1030_v46, %v4968_v27  ;;  %1354 = vmatprep.mubr.f32.mxu0 %v1102_v42  ;;  %v1103_v51 = vmax.f32 %v1029_v44, 0.0  ;;  %v1857_v42 = vld [vmem:[#allocation7 + $0x420] sm:$0xff]  ;;  %v1849_v44 = vld [vmem:[#allocation7 + $0x3b0] sm:$0xff]  ;;  %v1842_v46 = vld [vmem:[#allocation7 + $0x348] sm:$0xff] }
 0x274   : > { %v1034_v48 = vpop.f32.mrf.mxu1  ;;  %1355 = vmatmul.mubr.f32.gmra.mxu0 %v1101_v43  ;;  %v1850_v43 = vld [vmem:[#allocation7 + $0x3b8] sm:$0xff] }
 0x275   : > { %v1104_v49 = vmax.f32 %v1031_v47, 0.0  ;;  %v1035_v52 = vadd.f32 %v1034_v48, %v4965_v25  ;;  %v1841_v47 = vld [vmem:[#allocation7 + $0x340] sm:$0xff]  ;;  %v1834_v48 = vld [vmem:[#allocation7 + $0x2d8] sm:$0xff] }
 0x276   : > { %v1036_v54 = vpop.f32.mrf.mxu1 }
 0x277   : > { %v1037_v55 = vadd.f32 %v1036_v54, %v4968_v27  ;;  %1360 = vmatprep.mubr.f32.mxu0 %v1104_v49  ;;  %v1105_v63 = vmax.f32 %v1035_v52, 0.0  ;;  %v1833_v49 = vld [vmem:[#allocation7 + $0x2d0] sm:$0xff]  ;;  %v1825_v52 = vld [vmem:[#allocation7 + $0x260] sm:$0xff]  ;;  %v1818_v54 = vld [vmem:[#allocation7 + $0x1f8] sm:$0xff] }
 0x278   : > { %v1040_v58 = vpop.f32.mrf.mxu1  ;;  %1361 = vmatmul.mubr.f32.gmra.mxu0 %v1103_v51  ;;  %v1826_v51 = vld [vmem:[#allocation7 + $0x268] sm:$0xff] }
 0x279   : > { %v1106_v61 = vmax.f32 %v1037_v55, 0.0  ;;  %v1041_v0 = vadd.f32 %v1040_v58, %v4965_v25  ;;  %v1817_v55 = vld [vmem:[#allocation7 + $0x1f0] sm:$0xff]  ;;  %v1182_v58 = vld [vmem:[#allocation10 + $0x2] ss:$8 sm:$0x3] }
 0x27a   : > { %v1042_v1 = vpop.f32.mrf.mxu1 }
 0x27b   : > { %v1043_v3 = vadd.f32 %v1042_v1, %v4968_v27  ;;  %1366 = vmatprep.mubr.f32.mxu0 %v1106_v61  ;;  %v1107_v59 = vmax.f32 %v1041_v0, 0.0  ;;  %v1802_v61 = vld [vmem:[#allocation7 + $0x118] sm:$0xff]  ;;  %v1794_v0 = vld [vmem:[#allocation7 + $0xa8] sm:$0xff]  ;;  %v5022_v1 = vrot.slane %v1182_v58, %v4908_v53 }
 0x27c   : > { %v1046_v57 = vpop.f32.mrf.mxu1  ;;  %1367 = vmatmul.mubr.f32.gmra.mxu0 %v1105_v63  ;;  %v5019_v63 = vrot.slane %v1182_v58, %v4905_v50 }
 0x27d   : > { %v1108_v4 = vmax.f32 %v1043_v3, 0.0  ;;  %v1047_v5 = vadd.f32 %v1046_v57, %v4965_v25  ;;  %v1786_v57 = vld [vmem:[#allocation7 + $0x38] sm:$0xff] }
 0x27e   : > { %v1048_v6 = vpop.f32.mrf.mxu1 }
 0x27f   : > { %v1049_v7 = vadd.f32 %v1048_v6, %v4968_v27  ;;  %1372 = vmatprep.mubr.f32.mxu0 %v1108_v4  ;;  %v1109_v10 = vmax.f32 %v1047_v5, 0.0  ;;  %v1785_v4 = vld [vmem:[#allocation7 + $0x30] sm:$0xff]  ;;  %v2034_v6 = vld [vmem:[#allocation7 + $0xdc8] sm:$0xff] }
 0x280   : > { %v1052_v8 = vpop.f32.mrf.mxu1  ;;  %1373 = vmatmul.mubr.f32.gmra.mxu0 %v1107_v59 }
 0x281   : > { %v1110_v9 = vmax.f32 %v1049_v7, 0.0  ;;  %v1053_v11 = vadd.f32 %v1052_v8, %v4965_v25  ;;  %v2033_v8 = vld [vmem:[#allocation7 + $0xdc0] sm:$0xff] }
 0x282   : > { %v1054_v12 = vpop.f32.mrf.mxu1 }
 0x283   : > { %v1055_v13 = vadd.f32 %v1054_v12, %v4968_v27  ;;  %1378 = vmatprep.mubr.f32.mxu0 %v1110_v9  ;;  %v1111_v16 = vmax.f32 %v1053_v11, 0.0  ;;  %v2025_v12 = vld [vmem:[#allocation7 + $0xd50] sm:$0xff] }
 0x284   : > { %v1058_v14 = vpop.f32.mrf.mxu1  ;;  %1379 = vmatmul.mubr.f32.gmra.mxu0 %v1109_v10  ;;  %v2026_v10 = vld [vmem:[#allocation7 + $0xd58] sm:$0xff] }
 0x285   : > { %v1112_v15 = vmax.f32 %v1055_v13, 0.0  ;;  %v1059_v17 = vadd.f32 %v1058_v14, %v4965_v25 }
 0x286   : > { %v1060_v18 = vpop.f32.mrf.mxu1 }
 0x287   : > { %v1061_v19 = vadd.f32 %v1060_v18, %v4968_v27  ;;  %1384 = vmatprep.mubr.f32.mxu0 %v1112_v15  ;;  %v1113_v22 = vmax.f32 %v1059_v17, 0.0  ;;  %v2018_v17 = vld [vmem:[#allocation7 + $0xce8] sm:$0xff] }
 0x288   : > { %v1064_v20 = vpop.f32.mrf.mxu1  ;;  %1385 = vmatmul.mubr.f32.gmra.mxu0 %v1111_v16  ;;  %v1907_v16 = vld [vmem:[#allocation7 + $0x6d0] sm:$0xff] }
 0x289   : > { %v1114_v21 = vmax.f32 %v1061_v19, 0.0  ;;  %v1065_v23 = vadd.f32 %v1064_v20, %v4965_v25  ;;  %v1882_v25 = vld [vmem:[#allocation7 + $0x578] sm:$0xff]  ;;  %v1900_v19 = vld [vmem:[#allocation7 + $0x668] sm:$0xff]  ;;  %v2017_v20 = vld [vmem:[#allocation7 + $0xce0] sm:$0xff] }
 0x28a   : > { %v1066_v24 = vpop.f32.mrf.mxu1  ;;  %2092 = vmatprep.subr.mxu0 %v1882_v25 }
 0x28b   : > { %v1067_v26 = vadd.f32 %v1066_v24, %v4968_v27  ;;  %1390 = vmatprep.mubr.f32.mxu0 %v1114_v21  ;;  %v1115_v29 = vmax.f32 %v1065_v23, 0.0  ;;  %v1881_v27 = vld [vmem:[#allocation7 + $0x570] sm:$0xff]  ;;  %v1892_v24 = vld [vmem:[#allocation7 + $0x5f8] sm:$0xff] }
 0x28c   : > { %1391 = vmatmul.mubr.f32.gmra.mxu0 %v1113_v22  ;;  %v1899_v22 = vld [vmem:[#allocation7 + $0x660] sm:$0xff] }
 0x28d   : > { %v1116_v28 = vmax.f32 %v1067_v26, 0.0  ;;  %2093 = vmatpush1.msra.mxu0 %v1881_v27  ;;  %v1876_v27 = vld [vmem:[#allocation7 + $0x518] sm:$0xff] }
 0x28e   : > { %2094 = vmatprep.subr.mxu0 %v1874_v37 }
 0x28f   : > { %1396 = vmatprep.mubr.f32.mxu0 %v1116_v28  ;;  %2095 = vmatpush1.msra.mxu0 %v1873_v38 }
 0x290   : > { %1397 = vmatmul.mubr.f32.gmra.mxu0 %v1115_v29  ;;  %2096 = vmatprep.subr.mxu0 %v1866_v39 }
 0x291   : > { %2097 = vmatpush1.msra.mxu0 %v1865_v40  ;;  %v1875_v40 = vld [vmem:[#allocation7 + $0x510] sm:$0xff] }
 0x292   : > { %2098 = vmatprep.subr.mxu0 %v1858_v41  ;;  %v2002_v41 = vld [vmem:[#allocation7 + $0xc08] sm:$0xff] }
 0x293   : > { %2099 = vmatpush1.msra.mxu0 %v1857_v42 }
 0x294   : > { %2100 = vmatprep.subr.mxu0 %v1850_v43  ;;  %v1868_v43 = vld [vmem:[#allocation7 + $0x4a8] sm:$0xff] }
 0x295   : > { %2101 = vmatpush1.msra.mxu0 %v1849_v44  ;;  %v2001_v44 = vld [vmem:[#allocation7 + $0xc00] sm:$0xff] }
 0x296   : > { %2102 = vmatprep.subr.mxu0 %v1842_v46 }
 0x297   : > { %2103 = vmatpush1.msra.mxu0 %v1841_v47  ;;  %v1867_v47 = vld [vmem:[#allocation7 + $0x4a0] sm:$0xff] }
 0x298   : > { %2104 = vmatprep.subr.mxu0 %v1834_v48 }
 0x299   : > { %2105 = vmatpush1.msra.mxu0 %v1833_v49  ;;  %v1860_v49 = vld [vmem:[#allocation7 + $0x438] sm:$0xff] }
 0x29a   : > { %2106 = vmatprep.subr.mxu0 %v1826_v51 }
 0x29b   : > { %2107 = vmatpush1.msra.mxu0 %v1825_v52 }
 0x29c   : > { %2108 = vmatprep.subr.mxu0 %v1818_v54 }
 0x29d   : > { %2109 = vmatpush1.msra.mxu0 %v1817_v55  ;;  %v1859_v55 = vld [vmem:[#allocation7 + $0x430] sm:$0xff] }
 0x29e   : > { %2110 = vmatprep.subr.mxu0 %v1810_v56  ;;  %v1994_v56 = vld [vmem:[#allocation7 + $0xb98] sm:$0xff] }
 0x29f   : > { %2111 = vmatpush1.msra.mxu0 %v1809_v60  ;;  %v1852_v60 = vld [vmem:[#allocation7 + $0x3c8] sm:$0xff] }
 0x2a0   : > { %2112 = vmatprep.subr.mxu0 %v1802_v61  ;;  %v1993_v61 = vld [vmem:[#allocation7 + $0xb90] sm:$0xff] }
 0x2a1   : > { %2113 = vmatpush1.msra.mxu0 %v1801_v62 }
 0x2a2   : > { %2114 = vmatprep.subr.mxu0 %v1794_v0  ;;  %v1851_v0 = vld [vmem:[#allocation7 + $0x3c0] sm:$0xff] }
 0x2a3   : > { %2115 = vmatpush1.msra.mxu0 %v1793_v2 }
 0x2a4   : > { %2116 = vmatprep.subr.mxu0 %v1786_v57 }
 0x2a5   : > { %2117 = vmatpush1.msra.mxu0 %v1785_v4 }
 0x2a6   : > { %2118 = vmatprep.subr.mxu0 %v2034_v6  ;;  %v1986_v6 = vld [vmem:[#allocation7 + $0xb28] sm:$0xff] }
 0x2a7   : > { %2119 = vmatpush2.msra.mxu0 %v2033_v8  ;;  %v1836_v8 = vld [vmem:[#allocation7 + $0x2e8] sm:$0xff] }
 0x2a8   : > { %2120 = vmatprep.subr.mxu0 %v2026_v10 }
 0x2a9   : > { %2121 = vmatpush2.msra.mxu0 %v2025_v12 }
 0x2aa   : > { %2122 = vmatprep.subr.mxu0 %v2018_v17  ;;  %v1827_v17 = vld [vmem:[#allocation7 + $0x270] sm:$0xff] }
 0x2ab   : > { %2123 = vmatpush2.msra.mxu0 %v2017_v20  ;;  %v1820_v20 = vld [vmem:[#allocation7 + $0x208] sm:$0xff] }
 0x2ac   : > { %2124 = vmatprep.subr.mxu0 %v2010_v31  ;;  %v1811_v31 = vld [vmem:[#allocation7 + $0x190] sm:$0xff] }
 0x2ad   : > { %2125 = vmatpush2.msra.mxu0 %v2009_v34  ;;  %v1804_v34 = vld [vmem:[#allocation7 + $0x128] sm:$0xff] }
 0x2ae   : > { %2126 = vmatprep.subr.mxu0 %v2002_v41  ;;  %v1795_v41 = vld [vmem:[#allocation7 + $0xb0] sm:$0xff] }
 0x2af   : > { %2127 = vmatpush2.msra.mxu0 %v2001_v44  ;;  %v1788_v44 = vld [vmem:[#allocation7 + $0x48] sm:$0xff] }
 0x2b0   : > { %2128 = vmatprep.subr.mxu0 %v1994_v56  ;;  %v2035_v56 = vld [vmem:[#allocation7 + $0xdd0] sm:$0xff] }
 0x2b1   : > { %2129 = vmatpush2.msra.mxu0 %v1993_v61  ;;  %v2028_v61 = vld [vmem:[#allocation7 + $0xd68] sm:$0xff] }
 0x2b2   : > { %2130 = vmatprep.subr.mxu0 %v1986_v6  ;;  %v2019_v6 = vld [vmem:[#allocation7 + $0xcf0] sm:$0xff] }
 0x2f4   : > { %v1260_v3 = vpop.f32.mrf.mxu0 }
 0x2f5   : > { %v1261_v59 = vadd.f32 %v1260_v3, %v5019_v63  ;;  %v1844_v3 = vld [vmem:[#allocation7 + $0x358] sm:$0xff] }
 0x2f6   : > { %v1262_v5 = vpop.f32.mrf.mxu0 }
 0x2f7   : > { %v1263_v7 = vadd.f32 %v1262_v5, %v5022_v1  ;;  %v1403_v13 = vmax.f32 %v1261_v59, 0.0  ;;  %v1843_v5 = vld [vmem:[#allocation7 + $0x350] sm:$0xff] }
 0x2f8   : > { %v1266_v9 = vpop.f32.mrf.mxu0 }
 0x2f9   : > { %v1404_v11 = vmax.f32 %v1263_v7, 0.0  ;;  %v1267_v14 = vadd.f32 %v1266_v9, %v5019_v63  ;;  %v1985_v9 = vld [vmem:[#allocation7 + $0xb20] sm:$0xff] }
 0x2fa   : > { %v1268_v15 = vpop.f32.mrf.mxu0  ;;  %2131 = vmatpush2.msra.mxu0 %v1985_v9  ;;  %v2012_v9 = vld [vmem:[#allocation7 + $0xc88] sm:$0xff] }
 0x2fb   : > { %v1269_v18 = vadd.f32 %v1268_v15, %v5022_v1  ;;  %1592 = vmatprep.mubr.f32.mxu1 %v1404_v11  ;;  %v1405_v26 = vmax.f32 %v1267_v14, 0.0  ;;  %v1835_v11 = vld [vmem:[#allocation7 + $0x2e0] sm:$0xff] }
 0x2fc   : > { %v1272_v21 = vpop.f32.mrf.mxu0  ;;  %1593 = vmatmul.mubr.f32.vlgmr.msra.gmra.mxu1 %v1403_v13  ;;  %v1828_v13 = vld [vmem:[#allocation7 + $0x278] sm:$0xff] }
 0x2fd   : > { %v1406_v23 = vmax.f32 %v1269_v18, 0.0  ;;  %2296 = vmatpush1.msra.mxu1 %v1907_v16  ;;  %v1273_v28 = vadd.f32 %v1272_v21, %v5019_v63  ;;  %v1978_v18 = vld [vmem:[#allocation7 + $0xab8] sm:$0xff]  ;;  %v1977_v21 = vld [vmem:[#allocation7 + $0xab0] sm:$0xff] }
 0x2fe   : > { %v1274_v29 = vpop.f32.mrf.mxu0  ;;  %2297 = vmatprep.subr.mxu1 %v1900_v19  ;;  %2132 = vmatprep.subr.mxu0 %v1978_v18  ;;  %v2003_v18 = vld [vmem:[#allocation7 + $0xc10] sm:$0xff] }
 0x2ff   : > { %v1275_v32 = vadd.f32 %v1274_v29, %v5022_v1  ;;  %1598 = vmatprep.mubr.f32.mxu1 %v1406_v23  ;;  %2298 = vmatpush1.msra.mxu1 %v1899_v22  ;;  %v1407_v37 = vmax.f32 %v1273_v28, 0.0  ;;  %v1819_v23 = vld [vmem:[#allocation7 + $0x200] sm:$0xff] }
 0x300   : > { %v1278_v35 = vpop.f32.mrf.mxu0  ;;  %1599 = vmatmul.mubr.f32.gmra.mxu1 %v1405_v26  ;;  %2299 = vmatprep.subr.mxu1 %v1892_v24  ;;  %v1812_v26 = vld [vmem:[#allocation7 + $0x198] sm:$0xff] }
 0x301   : > { %v1408_v25 = vmax.f32 %v1275_v32, 0.0  ;;  %2300 = vmatpush1.msra.mxu1 %v1891_v30  ;;  %v1279_v38 = vadd.f32 %v1278_v35, %v5019_v63  ;;  %2133 = vmatpush2.msra.mxu0 %v1977_v21  ;;  %v1970_v32 = vld [vmem:[#allocation7 + $0xa48] sm:$0xff]  ;;  %v1969_v35 = vld [vmem:[#allocation7 + $0xa40] sm:$0xff] }
 0x302   : > { %v1280_v39 = vpop.f32.mrf.mxu0  ;;  %2301 = vmatprep.subr.mxu1 %v1884_v33  ;;  %2134 = vmatprep.subr.mxu0 %v1970_v32  ;;  %v1996_v21 = vld [vmem:[#allocation7 + $0xba8] sm:$0xff]  ;;  %v1987_v32 = vld [vmem:[#allocation7 + $0xb30] sm:$0xff] }
 0x303   : > { %v1281_v42 = vadd.f32 %v1280_v39, %v5022_v1  ;;  %1604 = vmatprep.mubr.f32.mxu1 %v1408_v25  ;;  %2302 = vmatpush1.msra.mxu1 %v1883_v36  ;;  %v1409_v51 = vmax.f32 %v1279_v38, 0.0  ;;  %v1803_v25 = vld [vmem:[#allocation7 + $0x120] sm:$0xff] }
 0x304   : > { %v1284_v46 = vpop.f32.mrf.mxu0  ;;  %1605 = vmatmul.mubr.f32.gmra.mxu1 %v1407_v37  ;;  %2303 = vmatprep.subr.mxu1 %v1876_v27  ;;  %v1796_v37 = vld [vmem:[#allocation7 + $0xb8] sm:$0xff] }
 0x305   : > { %v1410_v48 = vmax.f32 %v1281_v42, 0.0  ;;  %2304 = vmatpush1.msra.mxu1 %v1875_v40  ;;  %v1285_v52 = vadd.f32 %v1284_v46, %v5019_v63  ;;  %2135 = vmatpush2.msra.mxu0 %v1969_v35  ;;  %v1962_v42 = vld [vmem:[#allocation7 + $0x9d8] sm:$0xff]  ;;  %v1961_v46 = vld [vmem:[#allocation7 + $0x9d0] sm:$0xff]  ;;  %v1980_v35 = vld [vmem:[#allocation7 + $0xac8] sm:$0xff] }
 0x306   : > { %v1286_v54 = vpop.f32.mrf.mxu0  ;;  %2305 = vmatprep.subr.mxu1 %v1868_v43  ;;  %2136 = vmatprep.subr.mxu0 %v1962_v42  ;;  %v1971_v42 = vld [vmem:[#allocation7 + $0xa50] sm:$0xff] }
 0x307   : > { %v1287_v58 = vadd.f32 %v1286_v54, %v5022_v1  ;;  %1610 = vmatprep.mubr.f32.mxu1 %v1410_v48  ;;  %2306 = vmatpush1.msra.mxu1 %v1867_v47  ;;  %v1411_v57 = vmax.f32 %v1285_v52, 0.0  ;;  %v1787_v48 = vld [vmem:[#allocation7 + $0x40] sm:$0xff] }
 0x308   : > { %v1290_v62 = vpop.f32.mrf.mxu0  ;;  %1611 = vmatmul.mubr.f32.gmra.mxu1 %v1409_v51  ;;  %2307 = vmatprep.subr.mxu1 %v1860_v49  ;;  %v2036_v51 = vld [vmem:[#allocation7 + $0xdd8] sm:$0xff] }
 0x309   : > { %v1412_v2 = vmax.f32 %v1287_v58, 0.0  ;;  %2308 = vmatpush1.msra.mxu1 %v1859_v55  ;;  %v1291_v4 = vadd.f32 %v1290_v62, %v5019_v63  ;;  %2137 = vmatpush2.msra.mxu0 %v1961_v46  ;;  %v1954_v58 = vld [vmem:[#allocation7 + $0x968] sm:$0xff]  ;;  %v1953_v62 = vld [vmem:[#allocation7 + $0x960] sm:$0xff] }
 0x30a   : > { %v1292_v59 = vpop.f32.mrf.mxu0  ;;  %2309 = vmatprep.subr.mxu1 %v1852_v60  ;;  %2138 = vmatprep.subr.mxu0 %v1954_v58  ;;  %v1948_v58 = vld [vmem:[#allocation7 + $0x908] sm:$0xff] }
 0x30b   : > { %v1293_v7 = vadd.f32 %v1292_v59, %v5022_v1  ;;  %1616 = vmatprep.mubr.f32.mxu1 %v1412_v2  ;;  %2310 = vmatpush1.msra.mxu1 %v1851_v0  ;;  %v1413_v14 = vmax.f32 %v1291_v4, 0.0  ;;  %v2027_v2 = vld [vmem:[#allocation7 + $0xd60] sm:$0xff] }
 0x30c   : > { %v1296_v10 = vpop.f32.mrf.mxu0  ;;  %1617 = vmatmul.mubr.f32.gmra.mxu1 %v1411_v57  ;;  %2311 = vmatprep.subr.mxu1 %v1844_v3  ;;  %v2020_v57 = vld [vmem:[#allocation7 + $0xcf8] sm:$0xff] }
 0x30d   : > { %v1414_v12 = vmax.f32 %v1293_v7, 0.0  ;;  %2312 = vmatpush1.msra.mxu1 %v1843_v5  ;;  %v1297_v15 = vadd.f32 %v1296_v10, %v5019_v63  ;;  %2139 = vmatpush2.msra.mxu0 %v1953_v62  ;;  %v1946_v7 = vld [vmem:[#allocation7 + $0x8f8] sm:$0xff]  ;;  %v1945_v10 = vld [vmem:[#allocation7 + $0x8f0] sm:$0xff] }
 0x30e   : > { %v1298_v16 = vpop.f32.mrf.mxu0  ;;  %2313 = vmatprep.subr.mxu1 %v1836_v8  ;;  %2140 = vmatprep.subr.mxu0 %v1946_v7 }
 0x30f   : > { %v1299_v19 = vadd.f32 %v1298_v16, %v5022_v1  ;;  %1622 = vmatprep.mubr.f32.mxu1 %v1414_v12  ;;  %2314 = vmatpush1.msra.mxu1 %v1835_v11  ;;  %v1415_v28 = vmax.f32 %v1297_v15, 0.0  ;;  %v2011_v12 = vld [vmem:[#allocation7 + $0xc80] sm:$0xff] }
 0x310   : > { %v1302_v22 = vpop.f32.mrf.mxu0  ;;  %1623 = vmatmul.mubr.f32.gmra.mxu1 %v1413_v14  ;;  %2315 = vmatprep.subr.mxu1 %v1828_v13  ;;  %v2004_v14 = vld [vmem:[#allocation7 + $0xc18] sm:$0xff] }
 0x311   : > { %v1416_v24 = vmax.f32 %v1299_v19, 0.0  ;;  %2316 = vmatpush1.msra.mxu1 %v1827_v17  ;;  %v1303_v29 = vadd.f32 %v1302_v22, %v5019_v63  ;;  %2141 = vmatpush2.msra.mxu0 %v1945_v10  ;;  %v1938_v19 = vld [vmem:[#allocation7 + $0x888] sm:$0xff]  ;;  %v1937_v22 = vld [vmem:[#allocation7 + $0x880] sm:$0xff] }
 0x312   : > { %v1304_v30 = vpop.f32.mrf.mxu0  ;;  %2317 = vmatprep.subr.mxu1 %v1820_v20  ;;  %2142 = vmatprep.subr.mxu0 %v1938_v19  ;;  %v1932_v19 = vld [vmem:[#allocation7 + $0x828] sm:$0xff] }
 0x313   : > { %v1305_v33 = vadd.f32 %v1304_v30, %v5022_v1  ;;  %1628 = vmatprep.mubr.f32.mxu1 %v1416_v24  ;;  %2318 = vmatpush1.msra.mxu1 %v1819_v23  ;;  %v1417_v38 = vmax.f32 %v1303_v29, 0.0  ;;  %v1995_v24 = vld [vmem:[#allocation7 + $0xba0] sm:$0xff] }
 0x314   : > { %v1308_v36 = vpop.f32.mrf.mxu0  ;;  %1629 = vmatmul.mubr.f32.gmra.mxu1 %v1415_v28  ;;  %2319 = vmatprep.subr.mxu1 %v1812_v26  ;;  %v1988_v28 = vld [vmem:[#allocation7 + $0xb38] sm:$0xff] }
 0x315   : > { %v1418_v27 = vmax.f32 %v1305_v33, 0.0  ;;  %2320 = vmatpush1.msra.mxu1 %v1811_v31  ;;  %v1309_v39 = vadd.f32 %v1308_v36, %v5019_v63  ;;  %2143 = vmatpush2.msra.mxu0 %v1937_v22  ;;  %v1930_v33 = vld [vmem:[#allocation7 + $0x818] sm:$0xff]  ;;  %v1929_v36 = vld [vmem:[#allocation7 + $0x810] sm:$0xff] }
 0x316   : > { %v1310_v40 = vpop.f32.mrf.mxu0  ;;  %2321 = vmatprep.subr.mxu1 %v1804_v34  ;;  %2144 = vmatprep.subr.mxu0 %v1930_v33  ;;  %v1914_v33 = vld [vmem:[#allocation7 + $0x738] sm:$0xff] }
 0x317   : > { %v1311_v43 = vadd.f32 %v1310_v40, %v5022_v1  ;;  %1634 = vmatprep.mubr.f32.mxu1 %v1418_v27  ;;  %2322 = vmatpush1.msra.mxu1 %v1803_v25  ;;  %v1419_v52 = vmax.f32 %v1309_v39, 0.0  ;;  %v1979_v27 = vld [vmem:[#allocation7 + $0xac0] sm:$0xff] }
 0x318   : > { %v1314_v47 = vpop.f32.mrf.mxu0  ;;  %1635 = vmatmul.mubr.f32.gmra.mxu1 %v1417_v38  ;;  %2323 = vmatprep.subr.mxu1 %v1796_v37  ;;  %v1972_v38 = vld [vmem:[#allocation7 + $0xa58] sm:$0xff] }
 0x319   : > { %v1420_v49 = vmax.f32 %v1311_v43, 0.0  ;;  %2324 = vmatpush1.msra.mxu1 %v1795_v41  ;;  %v1315_v54 = vadd.f32 %v1314_v47, %v5019_v63  ;;  %2145 = vmatpush2.msra.mxu0 %v1929_v36  ;;  %v1963_v47 = vld [vmem:[#allocation7 + $0x9e0] sm:$0xff] }
 0x31a   : > { %v1316_v55 = vpop.f32.mrf.mxu0  ;;  %2325 = vmatprep.subr.mxu1 %v1788_v44  ;;  %v1964_v44 = vld [vmem:[#allocation7 + $0x9e8] sm:$0xff] }
 0x31b   : > { %v1317_v60 = vadd.f32 %v1316_v55, %v5022_v1  ;;  %1640 = vmatprep.mubr.f32.mxu1 %v1420_v49  ;;  %2326 = vmatpush1.msra.mxu1 %v1787_v48  ;;  %v1421_v4 = vmax.f32 %v1315_v54, 0.0  ;;  %v1956_v49 = vld [vmem:[#allocation7 + $0x978] sm:$0xff]  ;;  %v1955_v55 = vld [vmem:[#allocation7 + $0x970] sm:$0xff] }
 0x31c   : > { %v1320_v0 = vpop.f32.mrf.mxu0  ;;  %1641 = vmatmul.mubr.f32.gmra.mxu1 %v1419_v52  ;;  %2327 = vmatprep.subr.mxu1 %v2036_v51 }
 0x31d   : > { %v1422_v3 = vmax.f32 %v1317_v60, 0.0  ;;  %2328 = vmatpush2.msra.mxu1 %v2035_v56  ;;  %v1321_v59 = vadd.f32 %v1320_v0, %v5019_v63 }
 0x31e   : > { %v1322_v5 = vpop.f32.mrf.mxu0  ;;  %2329 = vmatprep.subr.mxu1 %v2028_v61  ;;  %v1947_v61 = vld [vmem:[#allocation7 + $0x900] sm:$0xff] }
 0x31f   : > { %v1323_v8 = vadd.f32 %v1322_v5, %v5022_v1  ;;  %1646 = vmatprep.mubr.f32.mxu1 %v1422_v3  ;;  %2330 = vmatpush2.msra.mxu1 %v2027_v2  ;;  %v1423_v15 = vmax.f32 %v1321_v59, 0.0 }
 0x320   : > { %v1326_v11 = vpop.f32.mrf.mxu0  ;;  %1647 = vmatmul.mubr.f32.gmra.mxu1 %v1421_v4  ;;  %2331 = vmatprep.subr.mxu1 %v2020_v57 }
 0x321   : > { %v1424_v13 = vmax.f32 %v1323_v8, 0.0  ;;  %2332 = vmatpush2.msra.mxu1 %v2019_v6  ;;  %v1327_v16 = vadd.f32 %v1326_v11, %v5019_v63 }
 0x322   : > { %v1328_v17 = vpop.f32.mrf.mxu0  ;;  %2333 = vmatprep.subr.mxu1 %v2012_v9 }
 0x323   : > { %v1329_v20 = vadd.f32 %v1328_v17, %v5022_v1  ;;  %1652 = vmatprep.mubr.f32.mxu1 %v1424_v13  ;;  %2334 = vmatpush2.msra.mxu1 %v2011_v12  ;;  %v1425_v29 = vmax.f32 %v1327_v16, 0.0  ;;  %v1939_v17 = vld [vmem:[#allocation7 + $0x890] sm:$0xff] }
 0x324   : > { %v1332_v23 = vpop.f32.mrf.mxu0  ;;  %1653 = vmatmul.mubr.f32.gmra.mxu1 %v1423_v15  ;;  %2335 = vmatprep.subr.mxu1 %v2004_v14  ;;  %v1940_v15 = vld [vmem:[#allocation7 + $0x898] sm:$0xff] }
 0x325   : > { %v1426_v26 = vmax.f32 %v1329_v20, 0.0  ;;  %2336 = vmatpush2.msra.mxu1 %v2003_v18  ;;  %v1333_v30 = vadd.f32 %v1332_v23, %v5019_v63  ;;  %v1931_v23 = vld [vmem:[#allocation7 + $0x820] sm:$0xff] }
 0x326   : > { %v1334_v31 = vpop.f32.mrf.mxu0  ;;  %2337 = vmatprep.subr.mxu1 %v1996_v21 }
 0x327   : > { %v1335_v34 = vadd.f32 %v1334_v31, %v5022_v1  ;;  %1658 = vmatprep.mubr.f32.mxu1 %v1426_v26  ;;  %2338 = vmatpush2.msra.mxu1 %v1995_v24  ;;  %v1427_v39 = vmax.f32 %v1333_v30, 0.0  ;;  %v1922_v26 = vld [vmem:[#allocation7 + $0x7a8] sm:$0xff]  ;;  %v1921_v30 = vld [vmem:[#allocation7 + $0x7a0] sm:$0xff]  ;;  %v1923_v31 = vld [vmem:[#allocation7 + $0x7b0] sm:$0xff] }
 0x328   : > { %v1338_v25 = vpop.f32.mrf.mxu0  ;;  %1659 = vmatmul.mubr.f32.gmra.mxu1 %v1425_v29  ;;  %2339 = vmatprep.subr.mxu1 %v1988_v28  ;;  %v1924_v28 = vld [vmem:[#allocation7 + $0x7b8] sm:$0xff] }
 0x329   : > { %v1428_v37 = vmax.f32 %v1335_v34, 0.0  ;;  %2340 = vmatpush2.msra.mxu1 %v1987_v32  ;;  %v1339_v40 = vadd.f32 %v1338_v25, %v5019_v63  ;;  %2146 = vmatprep.subr.mxu0 %v1922_v26  ;;  %v1916_v34 = vld [vmem:[#allocation7 + $0x748] sm:$0xff]  ;;  %v1901_v26 = vld [vmem:[#allocation7 + $0x670] sm:$0xff] }
 0x32a   : > { %v1340_v41 = vpop.f32.mrf.mxu0  ;;  %2341 = vmatprep.subr.mxu1 %v1980_v35  ;;  %2147 = vmatpush2.msra.mxu0 %v1921_v30 }
 0x32b   : > { %v1341_v43 = vadd.f32 %v1340_v41, %v5022_v1  ;;  %1664 = vmatprep.mubr.f32.mxu1 %v1428_v37  ;;  %2342 = vmatpush2.msra.mxu1 %v1979_v27  ;;  %v1429_v51 = vmax.f32 %v1339_v40, 0.0  ;;  %v1913_v27 = vld [vmem:[#allocation7 + $0x730] sm:$0xff]  ;;  %v1915_v37 = vld [vmem:[#allocation7 + $0x740] sm:$0xff]  ;;  %v1910_v41 = vld [vmem:[#allocation7 + $0x6e8] sm:$0xff] }
 0x32c   : > { %v1344_v46 = vpop.f32.mrf.mxu0  ;;  %1665 = vmatmul.mubr.f32.gmra.mxu1 %v1427_v39  ;;  %2343 = vmatprep.subr.mxu1 %v1972_v38 }
 0x32d   : > { %v1430_v48 = vmax.f32 %v1341_v43, 0.0  ;;  %2344 = vmatpush2.msra.mxu1 %v1971_v42  ;;  %v1345_v52 = vadd.f32 %v1344_v46, %v5019_v63  ;;  %2148 = vmatprep.subr.mxu0 %v1914_v33  ;;  %v1893_v33 = vld [vmem:[#allocation7 + $0x600] sm:$0xff] }
 0x32e   : > { %v1346_v54 = vpop.f32.mrf.mxu0  ;;  %2345 = vmatprep.subr.mxu1 %v1964_v44  ;;  %2149 = vmatpush2.msra.mxu0 %v1913_v27 }
 0x32f   : > { %v1347_v56 = vadd.f32 %v1346_v54, %v5022_v1  ;;  %1670 = vmatprep.mubr.f32.mxu1 %v1430_v48  ;;  %2346 = vmatpush2.msra.mxu1 %v1963_v47  ;;  %v1431_v0 = vmax.f32 %v1345_v52, 0.0 }
 0x330   : > { %v1350_v60 = vpop.f32.mrf.mxu0  ;;  %1671 = vmatmul.mubr.f32.gmra.mxu1 %v1429_v51  ;;  %2347 = vmatprep.subr.mxu1 %v1956_v49 }
 0x331   : > { %v1432_v62 = vmax.f32 %v1347_v56, 0.0  ;;  %2348 = vmatpush2.msra.mxu1 %v1955_v55  ;;  %v1351_v2 = vadd.f32 %v1350_v60, %v5019_v63  ;;  %2504 = vmatprep.subr.mxu0 %v1910_v41  ;;  %v1885_v41 = vld [vmem:[#allocation7 + $0x590] sm:$0xff] }
 0x332   : > { %v1352_v3 = vpop.f32.mrf.mxu0  ;;  %2349 = vmatprep.subr.mxu1 %v1948_v58 }
 0x333   : > { %v1353_v57 = vadd.f32 %v1352_v3, %v5022_v1  ;;  %1676 = vmatprep.mubr.f32.mxu1 %v1432_v62  ;;  %2350 = vmatpush2.msra.mxu1 %v1947_v61  ;;  %v1433_v5 = vmax.f32 %v1351_v2, 0.0  ;;  %v1912_v3 = vld [vmem:[#allocation7 + $0x6f8] sm:$0xff] }
 0x334   : > { %v1356_v4 = vpop.f32.mrf.mxu0  ;;  %1677 = vmatmul.mubr.f32.gmra.mxu1 %v1431_v0  ;;  %2351 = vmatprep.subr.mxu1 %v1940_v15 }
 0x335   : > { %v1434_v59 = vmax.f32 %v1353_v57, 0.0  ;;  %v1357_v6 = vadd.f32 %v1356_v4, %v5019_v63  ;;  %2352 = vmatpush2.msra.mxu1 %v1939_v17 }
 0x336   : > { %v1358_v7 = vpop.f32.mrf.mxu0  ;;  %2353 = vmatprep.subr.mxu1 %v1932_v19  ;;  %v1911_v19 = vld [vmem:[#allocation7 + $0x6f0] sm:$0xff] }
 0x337   : > { %v1359_v8 = vadd.f32 %v1358_v7, %v5022_v1  ;;  %1682 = vmatprep.mubr.f32.mxu1 %v1434_v59  ;;  %v1435_v11 = vmax.f32 %v1357_v6, 0.0  ;;  %2354 = vmatpush2.msra.mxu1 %v1931_v23 }
 0x338   : > { %v1362_v9 = vpop.f32.mrf.mxu0  ;;  %1683 = vmatmul.mubr.f32.gmra.mxu1 %v1433_v5  ;;  %2355 = vmatprep.subr.mxu1 %v1924_v28 }
 0x339   : > { %v1436_v10 = vmax.f32 %v1359_v8, 0.0  ;;  %v1363_v12 = vadd.f32 %v1362_v9, %v5019_v63  ;;  %2356 = vmatpush2.msra.mxu1 %v1923_v31  ;;  %v1516_v8 = vld [vmem:[#allocation10 + $0x3] ss:$8 sm:$0x3] }
 0x33a   : > { %v1364_v13 = vpop.f32.mrf.mxu0  ;;  %2357 = vmatprep.subr.mxu1 %v1916_v34  ;;  %v5073_v9 = vrot.slane %v1516_v8, %v4905_v50  ;;  %v1894_v31 = vld [vmem:[#allocation7 + $0x608] sm:$0xff]  ;;  %v1903_v34 = vld [vmem:[#allocation7 + $0x680] sm:$0xff]  ;;  %v1934_v50 = vld [vmem:[#allocation7 + $0x838] sm:$0xff] }
 0x33b   : > { %v1365_v14 = vadd.f32 %v1364_v13, %v5022_v1  ;;  %1688 = vmatprep.mubr.f32.mxu1 %v1436_v10  ;;  %v1437_v20 = vmax.f32 %v1363_v12, 0.0  ;;  %2358 = vmatpush2.msra.mxu1 %v1915_v37  ;;  %v5076_v10 = vrot.slane %v1516_v8, %v4908_v53 }
 0x33c   : > { %v1368_v16 = vpop.f32.mrf.mxu0  ;;  %1689 = vmatmul.mubr.f32.gmra.mxu1 %v1435_v11  ;;  %2713 = vmatprep.subr.mxu1 %v1912_v3 }
 0x33d   : > { %v1438_v18 = vmax.f32 %v1365_v14, 0.0  ;;  %v1369_v21 = vadd.f32 %v1368_v16, %v5019_v63 }
 0x33e   : > { %v1370_v22 = vpop.f32.mrf.mxu0 }
 0x33f   : > { %v1371_v24 = vadd.f32 %v1370_v22, %v5022_v1  ;;  %1694 = vmatprep.mubr.f32.mxu1 %v1438_v18  ;;  %v1439_v35 = vmax.f32 %v1369_v21, 0.0  ;;  %v1909_v18 = vld [vmem:[#allocation7 + $0x6e0] sm:$0xff]  ;;  %v1902_v21 = vld [vmem:[#allocation7 + $0x678] sm:$0xff]  ;;  %v1904_v22 = vld [vmem:[#allocation7 + $0x688] sm:$0xff] }
 0x340   : > { %v1374_v29 = vpop.f32.mrf.mxu0  ;;  %1695 = vmatmul.mubr.f32.gmra.mxu1 %v1437_v20 }
 0x341   : > { %v1440_v32 = vmax.f32 %v1371_v24, 0.0  ;;  %v1375_v36 = vadd.f32 %v1374_v29, %v5019_v63 }
 0x342   : > { %v1376_v25 = vpop.f32.mrf.mxu0 }
 0x343   : > { %v1377_v38 = vadd.f32 %v1376_v25, %v5022_v1  ;;  %1700 = vmatprep.mubr.f32.mxu1 %v1440_v32  ;;  %v1441_v42 = vmax.f32 %v1375_v36, 0.0  ;;  %v1886_v25 = vld [vmem:[#allocation7 + $0x598] sm:$0xff] }
 0x344   : > { %v1380_v39 = vpop.f32.mrf.mxu0  ;;  %1701 = vmatmul.mubr.f32.gmra.mxu1 %v1439_v35 }
 0x345   : > { %v1442_v40 = vmax.f32 %v1377_v38, 0.0  ;;  %v1381_v43 = vadd.f32 %v1380_v39, %v5019_v63  ;;  %v1896_v39 = vld [vmem:[#allocation7 + $0x618] sm:$0xff] }
 0x346   : > { %v1382_v44 = vpop.f32.mrf.mxu0 }
 0x347   : > { %v1383_v46 = vadd.f32 %v1382_v44, %v5022_v1  ;;  %1706 = vmatprep.mubr.f32.mxu1 %v1442_v40  ;;  %v1443_v49 = vmax.f32 %v1381_v43, 0.0 }
 0x348   : > { %v1386_v47 = vpop.f32.mrf.mxu0  ;;  %1707 = vmatmul.mubr.f32.gmra.mxu1 %v1441_v42  ;;  %v1895_v42 = vld [vmem:[#allocation7 + $0x610] sm:$0xff] }
 0x349   : > { %v1444_v48 = vmax.f32 %v1383_v46, 0.0  ;;  %v1387_v51 = vadd.f32 %v1386_v47, %v5019_v63  ;;  %v1878_v46 = vld [vmem:[#allocation7 + $0x528] sm:$0xff] }
 0x34a   : > { %v1388_v52 = vpop.f32.mrf.mxu0 }
 0x34b   : > { %v1389_v54 = vadd.f32 %v1388_v52, %v5022_v1  ;;  %1712 = vmatprep.mubr.f32.mxu1 %v1444_v48  ;;  %v1445_v58 = vmax.f32 %v1387_v51, 0.0 }
 0x34c   : > { %v1392_v55 = vpop.f32.mrf.mxu0  ;;  %1713 = vmatmul.mubr.f32.gmra.mxu1 %v1443_v49  ;;  %v1888_v49 = vld [vmem:[#allocation7 + $0x5a8] sm:$0xff] }
 0x34d   : > { %v1446_v56 = vmax.f32 %v1389_v54, 0.0  ;;  %v1393_v60 = vadd.f32 %v1392_v55, %v5019_v63  ;;  %v1877_v54 = vld [vmem:[#allocation7 + $0x520] sm:$0xff] }
 0x34e   : > { %v1394_v61 = vpop.f32.mrf.mxu0  ;;  %v1887_v55 = vld [vmem:[#allocation7 + $0x5a0] sm:$0xff] }
 0x34f   : > { %v1395_v62 = vadd.f32 %v1394_v61, %v5022_v1  ;;  %1718 = vmatprep.mubr.f32.mxu1 %v1446_v56  ;;  %v1447_v57 = vmax.f32 %v1393_v60, 0.0  ;;  %v1869_v61 = vld [vmem:[#allocation7 + $0x4b0] sm:$0xff] }
 0x350   : > { %v1398_v0 = vpop.f32.mrf.mxu0  ;;  %1719 = vmatmul.mubr.f32.gmra.mxu1 %v1445_v58  ;;  %v1870_v58 = vld [vmem:[#allocation7 + $0x4b8] sm:$0xff] }
 0x351   : > { %v1448_v2 = vmax.f32 %v1395_v62, 0.0  ;;  %v1399_v4 = vadd.f32 %v1398_v0, %v5019_v63 }
 0x352   : > { %v1400_v59 = vpop.f32.mrf.mxu0 }
 0x353   : > { %v1401_v5 = vadd.f32 %v1400_v59, %v5022_v1  ;;  %1724 = vmatprep.mubr.f32.mxu1 %v1448_v2  ;;  %v1449_v7 = vmax.f32 %v1399_v4, 0.0  ;;  %v1880_v4 = vld [vmem:[#allocation7 + $0x538] sm:$0xff] }
 0x354   : > { %1725 = vmatmul.mubr.f32.gmra.mxu1 %v1447_v57  ;;  %v1862_v57 = vld [vmem:[#allocation7 + $0x448] sm:$0xff] }
 0x355   : > { %v1450_v6 = vmax.f32 %v1401_v5, 0.0  ;;  %v1861_v5 = vld [vmem:[#allocation7 + $0x440] sm:$0xff] }
 0x357   : > { %1730 = vmatprep.mubr.f32.mxu1 %v1450_v6 }
 0x358   : > { %1731 = vmatmul.mubr.f32.gmra.mxu1 %v1449_v7  ;;  %v1854_v7 = vld [vmem:[#allocation7 + $0x3d8] sm:$0xff] }
 0x3bc   : > { %v1594_v11 = vpop.f32.mrf.mxu1 }
 0x3bd   : > { %v1595_v63 = vadd.f32 %v1594_v11, %v5073_v9 }
 0x3be   : > { %v1596_v12 = vpop.f32.mrf.mxu1 }
 0x3bf   : > { %v1597_v13 = vadd.f32 %v1596_v12, %v5076_v10  ;;  %v5082_v15 = vmax.f32 %v1595_v63, 0.0 }
 0x3c0   : > { %v1600_v1 = vpop.f32.mrf.mxu1 }
 0x3c1   : > { %v5080_v14 = vmax.f32 %v1597_v13, 0.0  ;;  %v1601_v16 = vadd.f32 %v1600_v1, %v5073_v9  ;;  %v1853_v13 = vld [vmem:[#allocation7 + $0x3d0] sm:$0xff] }
 0x3c2   : > { %v1602_v17 = vpop.f32.mrf.mxu1  ;;  %v1879_v1 = vld [vmem:[#allocation7 + $0x530] sm:$0xff] }
 0x3c3   : > { %v1603_v20 = vadd.f32 %v1602_v17, %v5076_v10  ;;  %2150 = vmatprep.mubr.f32.mxu0 %v5080_v14  ;;  %2359 = vmatprep.mubr.f32.mxu1 %v5080_v14  ;;  %v5092_v28 = vmax.f32 %v1601_v16, 0.0 }
 0x3c4   : > { %v1606_v23 = vpop.f32.mrf.mxu1  ;;  %2151 = vmatmul.mubr.f32.vlgmr.msra.gmra.mxu0 %v5082_v15  ;;  %2360 = vmatmul.mubr.f32.vlgmr.msra.gmra.mxu1 %v5082_v15 }
 0x3c5   : > { %v5090_v24 = vmax.f32 %v1603_v20, 0.0  ;;  %2505 = vmatpush1.msra.mxu0 %v1909_v18  ;;  %2714 = vmatpush1.msra.mxu1 %v1911_v19  ;;  %v1607_v29 = vadd.f32 %v1606_v23, %v5073_v9  ;;  %v1846_v18 = vld [vmem:[#allocation7 + $0x368] sm:$0xff] }
 0x3c6   : > { %v1608_v30 = vpop.f32.mrf.mxu1  ;;  %2506 = vmatprep.subr.mxu0 %v1902_v21  ;;  %2715 = vmatprep.subr.mxu1 %v1904_v22  ;;  %v1872_v19 = vld [vmem:[#allocation7 + $0x4c8] sm:$0xff] }
 0x3c7   : > { %v1609_v32 = vadd.f32 %v1608_v30, %v5076_v10  ;;  %2156 = vmatprep.mubr.f32.mxu0 %v5090_v24  ;;  %2365 = vmatprep.mubr.f32.mxu1 %v5090_v24  ;;  %v5102_v27 = vmax.f32 %v1607_v29, 0.0  ;;  %v1871_v29 = vld [vmem:[#allocation7 + $0x4c0] sm:$0xff] }
 0x3c8   : > { %2507 = vmatpush1.msra.mxu0 %v1901_v26  ;;  %v1612_v35 = vpop.f32.mrf.mxu1  ;;  %2366 = vmatmul.mubr.f32.gmra.mxu1 %v5092_v28  ;;  %v1845_v26 = vld [vmem:[#allocation7 + $0x360] sm:$0xff] }
 0x3c9   : > { %v5099_v36 = vmax.f32 %v1609_v32, 0.0  ;;  %2157 = vmatmul.mubr.f32.gmra.mxu0 %v5092_v28  ;;  %2508 = vmatprep.subr.mxu0 %v1894_v31  ;;  %v1613_v37 = vadd.f32 %v1612_v35, %v5073_v9  ;;  %v1838_v31 = vld [vmem:[#allocation7 + $0x2f8] sm:$0xff] }
 0x3ca   : > { %v1614_v38 = vpop.f32.mrf.mxu1  ;;  %2509 = vmatpush1.msra.mxu0 %v1893_v33  ;;  %2716 = vmatpush1.msra.mxu1 %v1903_v34  ;;  %v1837_v33 = vld [vmem:[#allocation7 + $0x2f0] sm:$0xff] }
 0x3cb   : > { %v1615_v40 = vadd.f32 %v1614_v38, %v5076_v10  ;;  %2162 = vmatprep.mubr.f32.mxu0 %v5099_v36  ;;  %2371 = vmatprep.mubr.f32.mxu1 %v5099_v36  ;;  %v5112_v47 = vmax.f32 %v1613_v37, 0.0  ;;  %v1830_v38 = vld [vmem:[#allocation7 + $0x288] sm:$0xff] }
 0x3cc   : > { %v1618_v43 = vpop.f32.mrf.mxu1  ;;  %2372 = vmatmul.mubr.f32.gmra.mxu1 %v5102_v27  ;;  %2510 = vmatprep.subr.mxu0 %v1886_v25 }
 0x3cd   : > { %v5109_v44 = vmax.f32 %v1615_v40, 0.0  ;;  %2163 = vmatmul.mubr.f32.gmra.mxu0 %v5102_v27  ;;  %2717 = vmatprep.subr.mxu1 %v1896_v39  ;;  %v1619_v51 = vadd.f32 %v1618_v43, %v5073_v9  ;;  %v1864_v39 = vld [vmem:[#allocation7 + $0x458] sm:$0xff] }
 0x3ce   : > { %2511 = vmatpush1.msra.mxu0 %v1885_v41  ;;  %v1620_v48 = vpop.f32.mrf.mxu1  ;;  %2718 = vmatpush1.msra.mxu1 %v1895_v42  ;;  %v1829_v41 = vld [vmem:[#allocation7 + $0x280] sm:$0xff]  ;;  %v1863_v42 = vld [vmem:[#allocation7 + $0x450] sm:$0xff] }
 0x3cf   : > { %v1621_v52 = vadd.f32 %v1620_v48, %v5076_v10  ;;  %2168 = vmatprep.mubr.f32.mxu0 %v5109_v44  ;;  %2377 = vmatprep.mubr.f32.mxu1 %v5109_v44  ;;  %v5122_v0 = vmax.f32 %v1619_v51, 0.0  ;;  %v1822_v51 = vld [vmem:[#allocation7 + $0x218] sm:$0xff] }
 0x3d0   : > { %2512 = vmatprep.subr.mxu0 %v1878_v46  ;;  %v1624_v56 = vpop.f32.mrf.mxu1  ;;  %2378 = vmatmul.mubr.f32.gmra.mxu1 %v5112_v47 }
 0x3d1   : > { %v5119_v60 = vmax.f32 %v1621_v52, 0.0  ;;  %2169 = vmatmul.mubr.f32.gmra.mxu0 %v5112_v47  ;;  %2719 = vmatprep.subr.mxu1 %v1888_v49  ;;  %v1625_v2 = vadd.f32 %v1624_v56, %v5073_v9  ;;  %v1856_v52 = vld [vmem:[#allocation7 + $0x3e8] sm:$0xff]  ;;  %v1821_v56 = vld [vmem:[#allocation7 + $0x210] sm:$0xff] }
 0x3d2   : > { %2513 = vmatpush1.msra.mxu0 %v1877_v54  ;;  %v1626_v62 = vpop.f32.mrf.mxu1  ;;  %2720 = vmatpush1.msra.mxu1 %v1887_v55 }
 0x3d3   : > { %v1627_v3 = vadd.f32 %v1626_v62, %v5076_v10  ;;  %2514 = vmatprep.subr.mxu0 %v1870_v58  ;;  %2174 = vmatprep.mubr.f32.mxu0 %v5119_v60  ;;  %v5132_v11 = vmax.f32 %v1625_v2, 0.0  ;;  %v1855_v58 = vld [vmem:[#allocation7 + $0x3e0] sm:$0xff]  ;;  %v1814_v2 = vld [vmem:[#allocation7 + $0x1a8] sm:$0xff] }
 0x3d4   : > { %2383 = vmatprep.mubr.f32.mxu1 %v5119_v60  ;;  %2515 = vmatpush1.msra.mxu0 %v1869_v61  ;;  %v1630_v59 = vpop.f32.mrf.mxu1 }
 0x3d5   : > { %v5128_v6 = vmax.f32 %v1627_v3, 0.0  ;;  %2175 = vmatmul.mubr.f32.gmra.mxu0 %v5122_v0  ;;  %2384 = vmatmul.mubr.f32.gmra.mxu1 %v5122_v0  ;;  %v1631_v63 = vadd.f32 %v1630_v59, %v5073_v9  ;;  %v1848_v3 = vld [vmem:[#allocation7 + $0x378] sm:$0xff] }
 0x3d6   : > { %2516 = vmatprep.subr.mxu0 %v1862_v57  ;;  %v1632_v8 = vpop.f32.mrf.mxu1  ;;  %2721 = vmatprep.subr.mxu1 %v1880_v4 }
 0x3d7   : > { %v1633_v12 = vadd.f32 %v1632_v8, %v5076_v10  ;;  %2517 = vmatpush1.msra.mxu0 %v1861_v5  ;;  %2180 = vmatprep.mubr.f32.mxu0 %v5128_v6  ;;  %v5142_v21 = vmax.f32 %v1631_v63, 0.0  ;;  %v1813_v5 = vld [vmem:[#allocation7 + $0x1a0] sm:$0xff] }
 0x3d8   : > { %2389 = vmatprep.mubr.f32.mxu1 %v5128_v6  ;;  %v1636_v16 = vpop.f32.mrf.mxu1  ;;  %2518 = vmatprep.subr.mxu0 %v1854_v7  ;;  %v1847_v7 = vld [vmem:[#allocation7 + $0x370] sm:$0xff] }
 0x3d9   : > { %v5138_v17 = vmax.f32 %v1633_v12, 0.0  ;;  %2181 = vmatmul.mubr.f32.gmra.mxu0 %v5132_v11  ;;  %2390 = vmatmul.mubr.f32.gmra.mxu1 %v5132_v11  ;;  %v1637_v22 = vadd.f32 %v1636_v16, %v5073_v9  ;;  %v1806_v12 = vld [vmem:[#allocation7 + $0x138] sm:$0xff] }
 0x3da   : > { %2519 = vmatpush1.msra.mxu0 %v1853_v13  ;;  %v1638_v20 = vpop.f32.mrf.mxu1  ;;  %2722 = vmatpush1.msra.mxu1 %v1879_v1  ;;  %v1840_v13 = vld [vmem:[#allocation7 + $0x308] sm:$0xff] }
 0x3db   : > { %v1639_v23 = vadd.f32 %v1638_v20, %v5076_v10  ;;  %2186 = vmatprep.mubr.f32.mxu0 %v5138_v17  ;;  %2395 = vmatprep.mubr.f32.mxu1 %v5138_v17  ;;  %v5152_v35 = vmax.f32 %v1637_v22, 0.0 }
 0x3dc   : > { %2520 = vmatprep.subr.mxu0 %v1846_v18  ;;  %v1642_v30 = vpop.f32.mrf.mxu1  ;;  %2723 = vmatprep.subr.mxu1 %v1872_v19  ;;  %v1805_v18 = vld [vmem:[#allocation7 + $0x130] sm:$0xff]  ;;  %v1839_v19 = vld [vmem:[#allocation7 + $0x300] sm:$0xff] }
 0x3dd   : > { %v5148_v32 = vmax.f32 %v1639_v23, 0.0  ;;  %2187 = vmatmul.mubr.f32.gmra.mxu0 %v5142_v21  ;;  %2396 = vmatmul.mubr.f32.gmra.mxu1 %v5142_v21  ;;  %v1643_v25 = vadd.f32 %v1642_v30, %v5073_v9 }
 0x3de   : > { %2521 = vmatpush1.msra.mxu0 %v1845_v26  ;;  %v1644_v34 = vpop.f32.mrf.mxu1  ;;  %2724 = vmatpush1.msra.mxu1 %v1871_v29  ;;  %v1798_v26 = vld [vmem:[#allocation7 + $0xc8] sm:$0xff]  ;;  %v1832_v29 = vld [vmem:[#allocation7 + $0x298] sm:$0xff] }
 0x3df   : > { %v1645_v37 = vadd.f32 %v1644_v34, %v5076_v10  ;;  %2522 = vmatprep.subr.mxu0 %v1838_v31  ;;  %2192 = vmatprep.mubr.f32.mxu0 %v5148_v32  ;;  %v5162_v48 = vmax.f32 %v1643_v25, 0.0  ;;  %v1831_v34 = vld [vmem:[#allocation7 + $0x290] sm:$0xff] }
 0x3e0   : > { %2401 = vmatprep.mubr.f32.mxu1 %v5148_v32  ;;  %2523 = vmatpush1.msra.mxu0 %v1837_v33  ;;  %v1648_v40 = vpop.f32.mrf.mxu1  ;;  %v1797_v33 = vld [vmem:[#allocation7 + $0xc0] sm:$0xff] }
 0x3e1   : > { %v5158_v43 = vmax.f32 %v1645_v37, 0.0  ;;  %2193 = vmatmul.mubr.f32.gmra.mxu0 %v5152_v35  ;;  %2402 = vmatmul.mubr.f32.gmra.mxu1 %v5152_v35  ;;  %v1649_v54 = vadd.f32 %v1648_v40, %v5073_v9  ;;  %v1824_v40 = vld [vmem:[#allocation7 + $0x228] sm:$0xff] }
 0x3e2   : > { %2524 = vmatprep.subr.mxu0 %v1830_v38  ;;  %2725 = vmatprep.subr.mxu1 %v1864_v39  ;;  %v1650_v46 = vpop.f32.mrf.mxu1  ;;  %v1790_v39 = vld [vmem:[#allocation7 + $0x58] sm:$0xff] }
 0x3e3   : > { %v1651_v49 = vadd.f32 %v1650_v46, %v5076_v10  ;;  %2525 = vmatpush1.msra.mxu0 %v1829_v41  ;;  %2726 = vmatpush1.msra.mxu1 %v1863_v42  ;;  %v5173_v4 = vmax.f32 %v1649_v54, 0.0  ;;  %v1789_v46 = vld [vmem:[#allocation7 + $0x50] sm:$0xff]  ;;  %v2038_v54 = vld [vmem:[#allocation7 + $0xde8] sm:$0xff] }
 0x3e4   : > { %2198 = vmatprep.mubr.f32.mxu0 %v5158_v43  ;;  %2407 = vmatprep.mubr.f32.mxu1 %v5158_v43  ;;  %v1654_v55 = vpop.f32.mrf.mxu1 }
 0x3e5   : > { %v5168_v61 = vmax.f32 %v1651_v49, 0.0  ;;  %2199 = vmatmul.mubr.f32.gmra.mxu0 %v5162_v48  ;;  %2408 = vmatmul.mubr.f32.gmra.mxu1 %v5162_v48  ;;  %v1655_v8 = vadd.f32 %v1654_v55, %v5073_v9  ;;  %v1823_v49 = vld [vmem:[#allocation7 + $0x220] sm:$0xff]  ;;  %v1816_v55 = vld [vmem:[#allocation7 + $0x1b8] sm:$0xff] }
 0x3e6   : > { %2526 = vmatprep.subr.mxu0 %v1822_v51  ;;  %2727 = vmatprep.subr.mxu1 %v1856_v52  ;;  %v1656_v62 = vpop.f32.mrf.mxu1 }
 0x3e7   : > { %2527 = vmatpush1.msra.mxu0 %v1821_v56  ;;  %2728 = vmatpush1.msra.mxu1 %v1855_v58  ;;  %v1657_v57 = vadd.f32 %v1656_v62, %v5076_v10  ;;  %v5183_v22 = vmax.f32 %v1655_v8, 0.0  ;;  %v2037_v62 = vld [vmem:[#allocation7 + $0xde0] sm:$0xff] }
 0x3e8   : > { %2204 = vmatprep.mubr.f32.mxu0 %v5168_v61  ;;  %2413 = vmatprep.mubr.f32.mxu1 %v5168_v61  ;;  %v1660_v59 = vpop.f32.mrf.mxu1 }
 0x3e9   : > { %v5178_v63 = vmax.f32 %v1657_v57, 0.0  ;;  %2528 = vmatprep.subr.mxu0 %v1814_v2  ;;  %2729 = vmatprep.subr.mxu1 %v1848_v3  ;;  %v1661_v23 = vadd.f32 %v1660_v59, %v5073_v9  ;;  %v1815_v2 = vld [vmem:[#allocation7 + $0x1b0] sm:$0xff] }
 0x3ea   : > { %2205 = vmatmul.mubr.f32.gmra.mxu0 %v5173_v4  ;;  %2414 = vmatmul.mubr.f32.gmra.mxu1 %v5173_v4  ;;  %v1662_v1 = vpop.f32.mrf.mxu1 }
 0x3eb   : > { %2529 = vmatpush1.msra.mxu0 %v1813_v5  ;;  %2730 = vmatpush1.msra.mxu1 %v1847_v7  ;;  %v1663_v16 = vadd.f32 %v1662_v1, %v5076_v10  ;;  %v5193_v38 = vmax.f32 %v1661_v23, 0.0  ;;  %v2030_v5 = vld [vmem:[#allocation7 + $0xd78] sm:$0xff]  ;;  %v1808_v7 = vld [vmem:[#allocation7 + $0x148] sm:$0xff]  ;;  %v1807_v1 = vld [vmem:[#allocation7 + $0x140] sm:$0xff] }
 0x3ec   : > { %2530 = vmatprep.subr.mxu0 %v1806_v12  ;;  %2731 = vmatprep.subr.mxu1 %v1840_v13  ;;  %v1666_v20 = vpop.f32.mrf.mxu1  ;;  %v2029_v13 = vld [vmem:[#allocation7 + $0xd70] sm:$0xff]  ;;  %v1800_v23 = vld [vmem:[#allocation7 + $0xd8] sm:$0xff] }
 0x3ed   : > { %2210 = vmatprep.mubr.f32.mxu0 %v5178_v63  ;;  %2419 = vmatprep.mubr.f32.mxu1 %v5178_v63  ;;  %v5188_v30 = vmax.f32 %v1663_v16, 0.0  ;;  %v1667_v41 = vadd.f32 %v1666_v20, %v5073_v9  ;;  %v2022_v20 = vld [vmem:[#allocation7 + $0xd08] sm:$0xff] }
 0x3ee   : > { %2531 = vmatpush1.msra.mxu0 %v1805_v18  ;;  %2732 = vmatpush1.msra.mxu1 %v1839_v19  ;;  %v1668_v31 = vpop.f32.mrf.mxu1 }
 0x3ef   : > { %2211 = vmatmul.mubr.f32.gmra.mxu0 %v5183_v22  ;;  %2420 = vmatmul.mubr.f32.gmra.mxu1 %v5183_v22  ;;  %v1669_v25 = vadd.f32 %v1668_v31, %v5076_v10  ;;  %v5203_v58 = vmax.f32 %v1667_v41, 0.0  ;;  %v2021_v31 = vld [vmem:[#allocation7 + $0xd00] sm:$0xff] }
 0x3f0   : > { %2532 = vmatprep.subr.mxu0 %v1798_v26  ;;  %2733 = vmatprep.subr.mxu1 %v1832_v29  ;;  %v1672_v37 = vpop.f32.mrf.mxu1 }
 0x3f1   : > { %2533 = vmatpush1.msra.mxu0 %v1797_v33  ;;  %2734 = vmatpush1.msra.mxu1 %v1831_v34  ;;  %v5196_v42 = vmax.f32 %v1669_v25, 0.0  ;;  %v1673_v57 = vadd.f32 %v1672_v37, %v5073_v9  ;;  %v1799_v33 = vld [vmem:[#allocation7 + $0xd0] sm:$0xff] }
 0x3f2   : > { %2216 = vmatprep.mubr.f32.mxu0 %v5188_v30  ;;  %2425 = vmatprep.mubr.f32.mxu1 %v5188_v30  ;;  %v1674_v51 = vpop.f32.mrf.mxu1 }
 0x3f3   : > { %2217 = vmatmul.mubr.f32.gmra.mxu0 %v5193_v38  ;;  %2426 = vmatmul.mubr.f32.gmra.mxu1 %v5193_v38  ;;  %v1675_v52 = vadd.f32 %v1674_v51, %v5076_v10  ;;  %v5213_v18 = vmax.f32 %v1673_v57, 0.0  ;;  %v1791_v51 = vld [vmem:[#allocation7 + $0x60] sm:$0xff]  ;;  %v2039_v57 = vld [vmem:[#allocation7 + $0xdf0] sm:$0xff] }
 0x3f4   : > { %2534 = vmatprep.subr.mxu0 %v1790_v39  ;;  %2735 = vmatprep.subr.mxu1 %v1824_v40  ;;  %v1678_v56 = vpop.f32.mrf.mxu1  ;;  %v2014_v39 = vld [vmem:[#allocation7 + $0xc98] sm:$0xff]  ;;  %v1792_v40 = vld [vmem:[#allocation7 + $0x68] sm:$0xff] }
 0x3f5   : > { %2535 = vmatpush1.msra.mxu0 %v1789_v46  ;;  %2736 = vmatpush1.msra.mxu1 %v1823_v49  ;;  %v5208_v59 = vmax.f32 %v1675_v52, 0.0  ;;  %v1679_v19 = vadd.f32 %v1678_v56, %v5073_v9  ;;  %v2013_v49 = vld [vmem:[#allocation7 + $0xc90] sm:$0xff]  ;;  %v2040_v56 = vld [vmem:[#allocation7 + $0xdf8] sm:$0xff] }
 0x3f6   : > { %2222 = vmatprep.mubr.f32.mxu0 %v5196_v42  ;;  %2431 = vmatprep.mubr.f32.mxu1 %v5196_v42  ;;  %v1680_v3 = vpop.f32.mrf.mxu1 }
 0x3f7   : > { %2536 = vmatprep.subr.mxu0 %v2038_v54  ;;  %2737 = vmatprep.subr.mxu1 %v1816_v55  ;;  %v1681_v8 = vadd.f32 %v1680_v3, %v5076_v10  ;;  %v5223_v37 = vmax.f32 %v1679_v19, 0.0  ;;  %v2006_v55 = vld [vmem:[#allocation7 + $0xc28] sm:$0xff]  ;;  %v2005_v3 = vld [vmem:[#allocation7 + $0xc20] sm:$0xff]  ;;  %v1997_v19 = vld [vmem:[#allocation7 + $0xbb0] sm:$0xff] }
 0x3f8   : > { %2223 = vmatmul.mubr.f32.gmra.mxu0 %v5203_v58  ;;  %2432 = vmatmul.mubr.f32.gmra.mxu1 %v5203_v58  ;;  %v1684_v12 = vpop.f32.mrf.mxu1 }
 0x3f9   : > { %2537 = vmatpush2.msra.mxu0 %v2037_v62  ;;  %2738 = vmatpush1.msra.mxu1 %v1815_v2  ;;  %v5218_v26 = vmax.f32 %v1681_v8, 0.0  ;;  %v1685_v41 = vadd.f32 %v1684_v12, %v5073_v9  ;;  %v1998_v12 = vld [vmem:[#allocation7 + $0xbb8] sm:$0xff] }
 0x3fa   : > { %2538 = vmatprep.subr.mxu0 %v2030_v5  ;;  %2739 = vmatprep.subr.mxu1 %v1808_v7  ;;  %v1686_v16 = vpop.f32.mrf.mxu1 }
 0x3fb   : > { %2228 = vmatprep.mubr.f32.mxu0 %v5208_v59  ;;  %2437 = vmatprep.mubr.f32.mxu1 %v5208_v59  ;;  %v1687_v29 = vadd.f32 %v1686_v16, %v5076_v10  ;;  %v5233_v2 = vmax.f32 %v1685_v41, 0.0  ;;  %v2023_v41 = vld [vmem:[#allocation7 + $0xd10] sm:$0xff] }
 0x3fc   : > { %2539 = vmatpush2.msra.mxu0 %v2029_v13  ;;  %2740 = vmatpush1.msra.mxu1 %v1807_v1  ;;  %v1690_v34 = vpop.f32.mrf.mxu1  ;;  %v2032_v13 = vld [vmem:[#allocation7 + $0xd88] sm:$0xff] }
 0x3fd   : > { %2229 = vmatmul.mubr.f32.gmra.mxu0 %v5213_v18  ;;  %2438 = vmatmul.mubr.f32.gmra.mxu1 %v5213_v18  ;;  %v5226_v46 = vmax.f32 %v1687_v29, 0.0  ;;  %v1691_v7 = vadd.f32 %v1690_v34, %v5073_v9  ;;  %v2024_v34 = vld [vmem:[#allocation7 + $0xd18] sm:$0xff] }
 0x3fe   : > { %2540 = vmatprep.subr.mxu0 %v2022_v20  ;;  %2741 = vmatprep.subr.mxu1 %v1800_v23  ;;  %v1692_v25 = vpop.f32.mrf.mxu1  ;;  %v2031_v20 = vld [vmem:[#allocation7 + $0xd80] sm:$0xff] }
 0x3ff   : > { %2541 = vmatpush2.msra.mxu0 %v2021_v31  ;;  %2742 = vmatpush1.msra.mxu1 %v1799_v33  ;;  %v1693_v54 = vadd.f32 %v1692_v25, %v5076_v10  ;;  %v5243_v29 = vmax.f32 %v1691_v7, 0.0  ;;  %v1990_v33 = vld [vmem:[#allocation7 + $0xb48] sm:$0xff] }
 0x400   : > { %2234 = vmatprep.mubr.f32.mxu0 %v5218_v26  ;;  %2443 = vmatprep.mubr.f32.mxu1 %v5218_v26  ;;  %v1696_v52 = vpop.f32.mrf.mxu1 }
 0x401   : > { %2235 = vmatmul.mubr.f32.gmra.mxu0 %v5223_v37  ;;  %2444 = vmatmul.mubr.f32.gmra.mxu1 %v5223_v37  ;;  %v5238_v8 = vmax.f32 %v1693_v54, 0.0  ;;  %v1697_v31 = vadd.f32 %v1696_v52, %v5073_v9  ;;  %v1982_v54 = vld [vmem:[#allocation7 + $0xad8] sm:$0xff] }
 0x402   : > { %2542 = vmatprep.subr.mxu0 %v2014_v39  ;;  %2743 = vmatprep.subr.mxu1 %v1792_v40  ;;  %v1698_v62 = vpop.f32.mrf.mxu1  ;;  %v1989_v40 = vld [vmem:[#allocation7 + $0xb40] sm:$0xff] }
 0x403   : > { %2543 = vmatpush2.msra.mxu0 %v2013_v49  ;;  %2744 = vmatpush1.msra.mxu1 %v1791_v51  ;;  %v1699_v1 = vadd.f32 %v1698_v62, %v5076_v10  ;;  %v5253_v52 = vmax.f32 %v1697_v31, 0.0 }
 0x404   : > { %2240 = vmatprep.mubr.f32.mxu0 %v5226_v46  ;;  %2449 = vmatprep.mubr.f32.mxu1 %v5226_v46  ;;  %v1702_v5 = vpop.f32.mrf.mxu1 }
 0x405   : > { %2544 = vmatprep.subr.mxu0 %v2006_v55  ;;  %2745 = vmatprep.subr.mxu1 %v2040_v56  ;;  %v5248_v25 = vmax.f32 %v1699_v1, 0.0  ;;  %v2016_v55 = vld [vmem:[#allocation7 + $0xca8] sm:$0xff]  ;;  %v1703_v56 = vadd.f32 %v1702_v5, %v5073_v9  ;;  %v2008_v1 = vld [vmem:[#allocation7 + $0xc38] sm:$0xff] }
 0x406   : > { %2241 = vmatmul.mubr.f32.gmra.mxu0 %v5233_v2  ;;  %2450 = vmatmul.mubr.f32.gmra.mxu1 %v5233_v2  ;;  %v1704_v16 = vpop.f32.mrf.mxu1 }
 0x407   : > { %2545 = vmatpush2.msra.mxu0 %v2005_v3  ;;  %2746 = vmatpush2.msra.mxu1 %v2039_v57  ;;  %v1705_v39 = vadd.f32 %v1704_v16, %v5076_v10  ;;  %v1981_v3 = vld [vmem:[#allocation7 + $0xad0] sm:$0xff]  ;;  %v2015_v57 = vld [vmem:[#allocation7 + $0xca0] sm:$0xff]  ;;  %v5263_v16 = vmax.f32 %v1703_v56, 0.0  ;;  %v1992_v56 = vld [vmem:[#allocation7 + $0xb58] sm:$0xff] }
 0x408   : > { %2546 = vmatprep.subr.mxu0 %v1998_v12  ;;  %2747 = vmatprep.subr.mxu1 %v2032_v13  ;;  %v1708_v23 = vpop.f32.mrf.mxu1  ;;  %v1974_v13 = vld [vmem:[#allocation7 + $0xa68] sm:$0xff] }
 0x409   : > { %2246 = vmatprep.mubr.f32.mxu0 %v5238_v8  ;;  %2455 = vmatprep.mubr.f32.mxu1 %v5238_v8  ;;  %v5256_v62 = vmax.f32 %v1705_v39, 0.0  ;;  %v1966_v39 = vld [vmem:[#allocation7 + $0x9f8] sm:$0xff] }
 0x40a   : > { %2547 = vmatpush2.msra.mxu0 %v1997_v19  ;;  %2748 = vmatpush2.msra.mxu1 %v2031_v20  ;;  %v1710_v49 = vpop.f32.mrf.mxu1  ;;  %v1973_v19 = vld [vmem:[#allocation7 + $0xa60] sm:$0xff]  ;;  %v2007_v20 = vld [vmem:[#allocation7 + $0xc30] sm:$0xff] }
 0x40b   : > { %2247 = vmatmul.mubr.f32.gmra.mxu0 %v5243_v29  ;;  %2456 = vmatmul.mubr.f32.gmra.mxu1 %v5243_v29  ;;  %v1711_v12 = vadd.f32 %v1710_v49, %v5076_v10  ;;  %v1965_v49 = vld [vmem:[#allocation7 + $0x9f0] sm:$0xff] }
 0x40c   : > { %2548 = vmatprep.subr.mxu0 %v1990_v33  ;;  %2749 = vmatprep.subr.mxu1 %v2024_v34  ;;  %v1714_v51 = vpop.f32.mrf.mxu1  ;;  %v1709_v33 = vadd.f32 %v1708_v23, %v5073_v9 }
 0x40d   : > { %2549 = vmatpush2.msra.mxu0 %v1989_v40  ;;  %2750 = vmatpush2.msra.mxu1 %v2023_v41  ;;  %v5268_v34 = vmax.f32 %v1711_v12, 0.0  ;;  %v2000_v40 = vld [vmem:[#allocation7 + $0xbc8] sm:$0xff] }
 0x40e   : > { %2252 = vmatprep.mubr.f32.mxu0 %v5248_v25  ;;  %2461 = vmatprep.mubr.f32.mxu1 %v5248_v25  ;;  %v1716_v7 = vpop.f32.mrf.mxu1  ;;  %v5273_v23 = vmax.f32 %v1709_v33, 0.0  ;;  %v1983_v33 = vld [vmem:[#allocation7 + $0xae0] sm:$0xff] }
 0x40f   : > { %2253 = vmatmul.mubr.f32.gmra.mxu0 %v5253_v52  ;;  %2462 = vmatmul.mubr.f32.gmra.mxu1 %v5253_v52  ;;  %v1717_v41 = vadd.f32 %v1716_v7, %v5076_v10  ;;  %v1991_v7 = vld [vmem:[#allocation7 + $0xb50] sm:$0xff] }
 0x410   : > { %2550 = vmatprep.subr.mxu0 %v1982_v54  ;;  %2751 = vmatprep.subr.mxu1 %v2016_v55  ;;  %v1720_v5 = vpop.f32.mrf.mxu1  ;;  %v1999_v54 = vld [vmem:[#allocation7 + $0xbc0] sm:$0xff] }
 0x411   : > { %2551 = vmatpush2.msra.mxu0 %v1981_v3  ;;  %2752 = vmatpush2.msra.mxu1 %v2015_v57  ;;  %v1958_v3 = vld [vmem:[#allocation7 + $0x988] sm:$0xff]  ;;  %v1715_v57 = vadd.f32 %v1714_v51, %v5073_v9  ;;  %v5278_v12 = vmax.f32 %v1717_v41, 0.0  ;;  %v1721_v41 = vadd.f32 %v1720_v5, %v5073_v9  ;;  %v1967_v5 = vld [vmem:[#allocation7 + $0xa00] sm:$0xff] }
 0x412   : > { %2258 = vmatprep.mubr.f32.mxu0 %v5256_v62  ;;  %2467 = vmatprep.mubr.f32.mxu1 %v5256_v62  ;;  %v1722_v31 = vpop.f32.mrf.mxu1 }
 0x413   : > { %2552 = vmatprep.subr.mxu0 %v1974_v13  ;;  %2753 = vmatprep.subr.mxu1 %v2008_v1  ;;  %v1957_v13 = vld [vmem:[#allocation7 + $0x980] sm:$0xff]  ;;  %v1723_v1 = vadd.f32 %v1722_v31, %v5076_v10  ;;  %v5283_v51 = vmax.f32 %v1715_v57, 0.0  ;;  %v1949_v31 = vld [vmem:[#allocation7 + $0x910] sm:$0xff]  ;;  %v1968_v57 = vld [vmem:[#allocation7 + $0xa08] sm:$0xff] }
 0x414   : > { %2259 = vmatmul.mubr.f32.gmra.mxu0 %v5263_v16  ;;  %2468 = vmatmul.mubr.f32.gmra.mxu1 %v5263_v16  ;;  %v1726_v55 = vpop.f32.mrf.mxu1 }
 0x415   : > { %2553 = vmatpush2.msra.mxu0 %v1973_v19  ;;  %2754 = vmatpush2.msra.mxu1 %v2007_v20  ;;  %v1984_v19 = vld [vmem:[#allocation7 + $0xae8] sm:$0xff] }
 0x416   : > { %2554 = vmatprep.subr.mxu0 %v1966_v39  ;;  %2755 = vmatprep.subr.mxu1 %v2000_v40  ;;  %v1728_v20 = vpop.f32.mrf.mxu1  ;;  %v1950_v39 = vld [vmem:[#allocation7 + $0x918] sm:$0xff] }
 0x417   : > { %2264 = vmatprep.mubr.f32.mxu0 %v5268_v34  ;;  %2473 = vmatprep.mubr.f32.mxu1 %v5268_v34  ;;  %v1976_v40 = vld [vmem:[#allocation7 + $0xa78] sm:$0xff] }
 0x418   : > { %2555 = vmatpush2.msra.mxu0 %v1965_v49  ;;  %2756 = vmatpush2.msra.mxu1 %v1999_v54  ;;  %v5287_v49 = vmax.f32 %v1723_v1, 0.0  ;;  %v1975_v54 = vld [vmem:[#allocation7 + $0xa70] sm:$0xff]  ;;  %v1941_v1 = vld [vmem:[#allocation7 + $0x8a0] sm:$0xff] }
 0x419   : > { %2265 = vmatmul.mubr.f32.gmra.mxu0 %v5273_v23  ;;  %2474 = vmatmul.mubr.f32.gmra.mxu1 %v5273_v23 }
 0x41a   : > { %2757 = vmatprep.subr.mxu1 %v1992_v56  ;;  %2556 = vmatprep.subr.mxu0 %v1958_v3  ;;  %v1732_v56 = vpop.f32.mrf.mxu1  ;;  %v1729_v3 = vadd.f32 %v1728_v20, %v5076_v10  ;;  %v1960_v20 = vld [vmem:[#allocation7 + $0x998] sm:$0xff] }
 0x41b   : > { %2758 = vmatpush2.msra.mxu1 %v1991_v7  ;;  %2557 = vmatpush2.msra.mxu0 %v1957_v13  ;;  %v1942_v7 = vld [vmem:[#allocation7 + $0x8a8] sm:$0xff]  ;;  %v5293_v13 = vmax.f32 %v1721_v41, 0.0 }
 0x41c   : > { %2759 = vmatprep.subr.mxu1 %v1984_v19  ;;  %2270 = vmatprep.mubr.f32.mxu0 %v5278_v12  ;;  %v1734_v19 = vpop.f32.mrf.mxu1 }
 0x41d   : > { %2479 = vmatprep.mubr.f32.mxu1 %v5278_v12  ;;  %2760 = vmatpush2.msra.mxu1 %v1983_v33  ;;  %v5296_v33 = vmax.f32 %v1729_v3, 0.0  ;;  %v1735_v41 = vadd.f32 %v1734_v19, %v5076_v10  ;;  %v1951_v3 = vld [vmem:[#allocation7 + $0x920] sm:$0xff]  ;;  %v1943_v10 = vld [vmem:[#allocation7 + $0x8b0] sm:$0xff]  ;;  %v1936_v19 = vld [vmem:[#allocation7 + $0x848] sm:$0xff] }
 0x41e   : > { %2271 = vmatmul.mubr.f32.gmra.mxu0 %v5283_v51  ;;  %2480 = vmatmul.mubr.f32.gmra.mxu1 %v5283_v51 }
 0x41f   : > { %2558 = vmatprep.subr.mxu0 %v1950_v39  ;;  %2761 = vmatprep.subr.mxu1 %v1976_v40  ;;  %v1727_v39 = vadd.f32 %v1726_v55, %v5073_v9  ;;  %v1959_v40 = vld [vmem:[#allocation7 + $0x990] sm:$0xff]  ;;  %v1944_v55 = vld [vmem:[#allocation7 + $0x8b8] sm:$0xff] }
 0x420   : > { %2559 = vmatpush2.msra.mxu0 %v1949_v31  ;;  %2762 = vmatpush2.msra.mxu1 %v1975_v54  ;;  %v1952_v31 = vld [vmem:[#allocation7 + $0x928] sm:$0xff]  ;;  %v1933_v54 = vld [vmem:[#allocation7 + $0x830] sm:$0xff] }
 0x421   : > { %2763 = vmatprep.subr.mxu1 %v1968_v57  ;;  %2276 = vmatprep.mubr.f32.mxu0 %v5287_v49  ;;  %v5304_v57 = vmax.f32 %v1727_v39, 0.0 }
 0x422   : > { %2485 = vmatprep.mubr.f32.mxu1 %v5287_v49  ;;  %2560 = vmatprep.subr.mxu0 %v1942_v7  ;;  %v1926_v7 = vld [vmem:[#allocation7 + $0x7c8] sm:$0xff] }
 0x423   : > { %2764 = vmatpush2.msra.mxu1 %v1967_v5  ;;  %2277 = vmatmul.mubr.f32.gmra.mxu0 %v5293_v13  ;;  %v1733_v5 = vadd.f32 %v1732_v56, %v5073_v9  ;;  %v1918_v9 = vld [vmem:[#allocation7 + $0x758] sm:$0xff] }
 0x424   : > { %2486 = vmatmul.mubr.f32.gmra.mxu1 %v5293_v13  ;;  %2561 = vmatpush2.msra.mxu0 %v1941_v1  ;;  %v5308_v1 = vmax.f32 %v1735_v41, 0.0  ;;  %v1928_v56 = vld [vmem:[#allocation7 + $0x7d8] sm:$0xff]  ;;  %v1927_v41 = vld [vmem:[#allocation7 + $0x7d0] sm:$0xff] }
 0x425   : > { %2765 = vmatprep.subr.mxu1 %v1960_v20  ;;  %2562 = vmatprep.subr.mxu0 %v1934_v50  ;;  %v1925_v50 = vld [vmem:[#allocation7 + $0x7c0] sm:$0xff]  ;;  %v5312_v39 = vmax.f32 %v1733_v5, 0.0  ;;  %v3124_v5 = vld [vmem:[#allocation8 + $0x50] sm:$0xff] }
 0x426   : > { %2766 = vmatpush2.msra.mxu1 %v1959_v40  ;;  %2282 = vmatprep.mubr.f32.mxu0 %v5296_v33  ;;  %v1935_v20 = vld [vmem:[#allocation7 + $0x840] sm:$0xff]  ;;  %v1917_v40 = vld [vmem:[#allocation7 + $0x750] sm:$0xff] }
 0x427   : > { %2767 = vmatprep.subr.mxu1 %v1952_v31  ;;  %2491 = vmatprep.mubr.f32.mxu1 %v5296_v33  ;;  %v1920_v31 = vld [vmem:[#allocation7 + $0x768] sm:$0xff] }
 0x428   : > { %2563 = vmatpush2.msra.mxu0 %v1933_v54  ;;  %2768 = vmatpush2.msra.mxu1 %v1951_v3  ;;  %v1919_v54 = vld [vmem:[#allocation7 + $0x760] sm:$0xff]  ;;  %v3129_v3 = vld [vmem:[#allocation8 + $0x78] sm:$0xff] }
 0x429   : > { %2283 = vmatmul.mubr.f32.gmra.mxu0 %v5304_v57  ;;  %2492 = vmatmul.mubr.f32.gmra.mxu1 %v5304_v57 }
 0x42a   : > { %2769 = vmatprep.subr.mxu1 %v1944_v55  ;;  %2564 = vmatprep.subr.mxu0 %v1926_v7  ;;  %v6673_v55 = vmov 0.0   ;;  %v3128_v7 = vld [vmem:[#allocation8 + $0x70] sm:$0xff] }
 0x42b   : > { %2770 = vmatpush2.msra.mxu1 %v1943_v10  ;;  %2565 = vmatpush2.msra.mxu0 %v1925_v50  ;;  %v3146_v10 = vld [vmem:[#allocation8 + $0x100] sm:$0xff]  ;;  %v3175_v50 = vld [vmem:[#allocation8 + $0x1e8] sm:$0xff] }
 0x42c   : > { %2771 = vmatprep.subr.mxu1 %v1936_v19  ;;  %2288 = vmatprep.mubr.f32.mxu0 %v5308_v1 }
 0x42d   : > { %2497 = vmatprep.mubr.f32.mxu1 %v5308_v1  ;;  %2772 = vmatpush2.msra.mxu1 %v1935_v20 }
 0x42e   : > { %2289 = vmatmul.mubr.f32.gmra.mxu0 %v5312_v39  ;;  %2498 = vmatmul.mubr.f32.gmra.mxu1 %v5312_v39 }
 0x42f   : > { %2566 = vmatprep.subr.mxu0 %v1918_v9  ;;  %2773 = vmatprep.subr.mxu1 %v1928_v56  ;;  %v3137_v9 = vld [vmem:[#allocation8 + $0xb8] sm:$0xff] }
 0x430   : > { %2567 = vmatpush2.msra.mxu0 %v1917_v40  ;;  %2568 = vmatprep.mubr.f32.mxu0 %v5080_v14 }
 0x431   : > { %2774 = vmatpush2.msra.mxu1 %v1927_v41  ;;  %2777 = vmatprep.mubr.f32.mxu1 %v5080_v14  ;;  %v3127_v14 = vld [vmem:[#allocation8 + $0x68] sm:$0xff]  ;;  %v3136_v41 = vld [vmem:[#allocation8 + $0xb0] sm:$0xff] }
 0x432   : > { %2775 = vmatprep.subr.mxu1 %v1920_v31  ;;  %2569 = vmatmul.mubr.f32.vlgmr.msra.gmra.mxu0 %v5082_v15  ;;  %v3172_v31 = vld [vmem:[#allocation8 + $0x1d0] sm:$0xff] }
 0x433   : > { %2776 = vmatpush2.msra.mxu1 %v1919_v54  ;;  %2574 = vmatprep.mubr.f32.mxu0 %v5090_v24 }
 0x434   : > { %2778 = vmatmul.mubr.f32.vlgmr.msra.gmra.mxu1 %v5082_v15  ;;  %3243 = vmatprep.subr.mxu0 %v6673_v55  ;;  %v3126_v15 = vld [vmem:[#allocation8 + $0x60] sm:$0xff] }
 0x435   : > { %2783 = vmatprep.mubr.f32.mxu1 %v5090_v24  ;;  %3244 = vmatpush1.msra.mxu0 %v3129_v3  ;;  %v3125_v24 = vld [vmem:[#allocation8 + $0x58] sm:$0xff] }
 0x436   : > { %2575 = vmatmul.mubr.f32.gmra.mxu0 %v5092_v28  ;;  %3245 = vmatprep.subr.mxu0 %v6673_v55 }
 0x437   : > { %2580 = vmatprep.mubr.f32.mxu0 %v5099_v36  ;;  %3246 = vmatpush1.msra.mxu0 %v3128_v7 }
 0x438   : > { %2784 = vmatmul.mubr.f32.gmra.mxu1 %v5092_v28  ;;  %3247 = vmatprep.subr.mxu0 %v6673_v55  ;;  %v3123_v28 = vld [vmem:[#allocation8 + $0x48] sm:$0xff] }
 0x439   : > { %2789 = vmatprep.mubr.f32.mxu1 %v5099_v36  ;;  %3248 = vmatpush1.msra.mxu0 %v3127_v14  ;;  %v3122_v36 = vld [vmem:[#allocation8 + $0x40] sm:$0xff]  ;;  %v3171_v14 = vld [vmem:[#allocation8 + $0x1c8] sm:$0xff] }
 0x43a   : > { %2581 = vmatmul.mubr.f32.gmra.mxu0 %v5102_v27  ;;  %3249 = vmatprep.subr.mxu0 %v6673_v55 }
 0x43b   : > { %2586 = vmatprep.mubr.f32.mxu0 %v5109_v44  ;;  %3250 = vmatpush1.msra.mxu0 %v3126_v15  ;;  %v3135_v15 = vld [vmem:[#allocation8 + $0xa8] sm:$0xff] }
 0x43c   : > { %2790 = vmatmul.mubr.f32.gmra.mxu1 %v5102_v27  ;;  %3251 = vmatprep.subr.mxu0 %v6673_v55  ;;  %v3161_v27 = vld [vmem:[#allocation8 + $0x178] sm:$0xff] }
 0x43d   : > { %2795 = vmatprep.mubr.f32.mxu1 %v5109_v44  ;;  %3252 = vmatpush1.msra.mxu0 %v3125_v24  ;;  %v3121_v44 = vld [vmem:[#allocation8 + $0x38] sm:$0xff] }
 0x43e   : > { %2587 = vmatmul.mubr.f32.gmra.mxu0 %v5112_v47  ;;  %3253 = vmatprep.subr.mxu0 %v6673_v55  ;;  %v2042_v24 = vld [vmem:[#allocation10 + $0x4] ss:$8 sm:$0xf] }
 0x43f   : > { %2592 = vmatprep.mubr.f32.mxu0 %v5119_v60  ;;  %3254 = vmatpush1.msra.mxu0 %v3124_v5  ;;  %v2043_v5 = vld [vmem:[#allocation10 + $0x4] ss:$8 sm:$0xf0] }
 0x440   : > { %2796 = vmatmul.mubr.f32.gmra.mxu1 %v5112_v47  ;;  %3255 = vmatprep.subr.mxu0 %v6673_v55  ;;  %v3160_v47 = vld [vmem:[#allocation8 + $0x170] sm:$0xff] }
 0x441   : > { %2801 = vmatprep.mubr.f32.mxu1 %v5119_v60  ;;  %3256 = vmatpush1.msra.mxu0 %v3123_v28  ;;  %v3120_v60 = vld [vmem:[#allocation8 + $0x30] sm:$0xff] }
 0x442   : > { %2593 = vmatmul.mubr.f32.gmra.mxu0 %v5122_v0  ;;  %3257 = vmatprep.subr.mxu0 %v6673_v55 }
 0x443   : > { %2598 = vmatprep.mubr.f32.mxu0 %v5128_v6  ;;  %3258 = vmatpush1.msra.mxu0 %v3122_v36  ;;  %v3170_v36 = vld [vmem:[#allocation8 + $0x1c0] sm:$0xff] }
 0x444   : > { %2802 = vmatmul.mubr.f32.gmra.mxu1 %v5122_v0  ;;  %3259 = vmatprep.subr.mxu0 %v6673_v55  ;;  %v3159_v0 = vld [vmem:[#allocation8 + $0x168] sm:$0xff] }
 0x445   : > { %2807 = vmatprep.mubr.f32.mxu1 %v5128_v6  ;;  %3428 = vmatprep.subr.mxu1 %v6673_v55  ;;  %v3119_v6 = vld [vmem:[#allocation8 + $0x28] sm:$0xff] }
 0x446   : > { %2599 = vmatmul.mubr.f32.gmra.mxu0 %v5132_v11  ;;  %3429 = vmatpush1.msra.mxu1 %v3161_v27 }
 0x447   : > { %2604 = vmatprep.mubr.f32.mxu0 %v5138_v17  ;;  %3260 = vmatpush1.msra.mxu0 %v3121_v44 }
 0x448   : > { %2808 = vmatmul.mubr.f32.gmra.mxu1 %v5132_v11  ;;  %3261 = vmatprep.subr.mxu0 %v6673_v55  ;;  %v3158_v11 = vld [vmem:[#allocation8 + $0x160] sm:$0xff] }
 0x449   : > { %2813 = vmatprep.mubr.f32.mxu1 %v5138_v17  ;;  %3430 = vmatprep.subr.mxu1 %v6673_v55  ;;  %v3118_v17 = vld [vmem:[#allocation8 + $0x20] sm:$0xff] }
 0x44a   : > { %2605 = vmatmul.mubr.f32.gmra.mxu0 %v5142_v21  ;;  %3431 = vmatpush1.msra.mxu1 %v3160_v47  ;;  %v5487_v47 = vor.u32 %v2043_v5, %v2042_v24 }
 0x44b   : > { %2610 = vmatprep.mubr.f32.mxu0 %v5148_v32  ;;  %3262 = vmatpush1.msra.mxu0 %v3120_v60 }
 0x44c   : > { %2814 = vmatmul.mubr.f32.gmra.mxu1 %v5142_v21  ;;  %3263 = vmatprep.subr.mxu0 %v6673_v55  ;;  %v3157_v21 = vld [vmem:[#allocation8 + $0x158] sm:$0xff] }
 0x44d   : > { %2819 = vmatprep.mubr.f32.mxu1 %v5148_v32  ;;  %3432 = vmatprep.subr.mxu1 %v6673_v55  ;;  %v3117_v32 = vld [vmem:[#allocation8 + $0x18] sm:$0xff] }
 0x44e   : > { %2611 = vmatmul.mubr.f32.gmra.mxu0 %v5152_v35  ;;  %3433 = vmatpush1.msra.mxu1 %v3159_v0  ;;  %v3169_v0 = vld [vmem:[#allocation8 + $0x1b8] sm:$0xff] }
 0x44f   : > { %2616 = vmatprep.mubr.f32.mxu0 %v5158_v43  ;;  %3264 = vmatpush1.msra.mxu0 %v3119_v6 }
 0x450   : > { %2820 = vmatmul.mubr.f32.gmra.mxu1 %v5152_v35  ;;  %3265 = vmatprep.subr.mxu0 %v6673_v55  ;;  %v3156_v35 = vld [vmem:[#allocation8 + $0x150] sm:$0xff] }
 0x451   : > { %2825 = vmatprep.mubr.f32.mxu1 %v5158_v43  ;;  %3434 = vmatprep.subr.mxu1 %v6673_v55  ;;  %v3116_v43 = vld [vmem:[#allocation8 + $0x10] sm:$0xff] }
 0x452   : > { %2617 = vmatmul.mubr.f32.gmra.mxu0 %v5162_v48  ;;  %3435 = vmatpush1.msra.mxu1 %v3158_v11  ;;  %v5498_v11 = vrot.slane %v5487_v47, %v4908_v53  ;;  %v3167_v53 = vld [vmem:[#allocation8 + $0x1a8] sm:$0xff] }
 0x453   : > { %2622 = vmatprep.mubr.f32.mxu0 %v5168_v61  ;;  %3266 = vmatpush1.msra.mxu0 %v3118_v17 }
 0x454   : > { %2826 = vmatmul.mubr.f32.gmra.mxu1 %v5162_v48  ;;  %3267 = vmatprep.subr.mxu0 %v6673_v55  ;;  %v3155_v48 = vld [vmem:[#allocation8 + $0x148] sm:$0xff] }
 0x455   : > { %2831 = vmatprep.mubr.f32.mxu1 %v5168_v61  ;;  %3436 = vmatprep.subr.mxu1 %v6673_v55  ;;  %v3115_v61 = vld [vmem:[#allocation8 + $0x8] sm:$0xff] }
 0x456   : > { %2623 = vmatmul.mubr.f32.gmra.mxu0 %v5173_v4  ;;  %3437 = vmatpush1.msra.mxu1 %v3157_v21  ;;  %v3168_v21 = vld [vmem:[#allocation8 + $0x1b0] sm:$0xff] }
 0x457   : > { %2628 = vmatprep.mubr.f32.mxu0 %v5178_v63  ;;  %3268 = vmatpush1.msra.mxu0 %v3117_v32 }
 0x458   : > { %2832 = vmatmul.mubr.f32.gmra.mxu1 %v5173_v4  ;;  %3269 = vmatprep.subr.mxu0 %v6673_v55  ;;  %v3154_v4 = vld [vmem:[#allocation8 + $0x140] sm:$0xff] }
 0x459   : > { %2837 = vmatprep.mubr.f32.mxu1 %v5178_v63  ;;  %3438 = vmatprep.subr.mxu1 %v6673_v55  ;;  %v3114_v63 = vld [vmem:[#allocation8] sm:$0xff] }
 0x45a   : > { %2629 = vmatmul.mubr.f32.gmra.mxu0 %v5183_v22  ;;  %3439 = vmatpush1.msra.mxu1 %v3156_v35  ;;  %v3133_v35 = vld [vmem:[#allocation8 + $0x98] sm:$0xff] }
 0x45b   : > { %2634 = vmatprep.mubr.f32.mxu0 %v5188_v30  ;;  %3270 = vmatpush1.msra.mxu0 %v3116_v43 }
 0x45c   : > { %2838 = vmatmul.mubr.f32.gmra.mxu1 %v5183_v22  ;;  %3271 = vmatprep.subr.mxu0 %v6673_v55  ;;  %v3153_v22 = vld [vmem:[#allocation8 + $0x138] sm:$0xff] }
 0x45d   : > { %2843 = vmatprep.mubr.f32.mxu1 %v5188_v30  ;;  %3440 = vmatprep.subr.mxu1 %v6673_v55  ;;  %v3145_v30 = vld [vmem:[#allocation8 + $0xf8] sm:$0xff] }
 0x45e   : > { %2635 = vmatmul.mubr.f32.gmra.mxu0 %v5193_v38  ;;  %3441 = vmatpush1.msra.mxu1 %v3155_v48  ;;  %v2056_v48 = vsub.s32 2, %v4902_v45 }
 0x45f   : > { %2640 = vmatprep.mubr.f32.mxu0 %v5196_v42  ;;  %3272 = vmatpush1.msra.mxu0 %v3115_v61 }
 0x460   : > { %2844 = vmatmul.mubr.f32.gmra.mxu1 %v5193_v38  ;;  %3273 = vmatprep.subr.mxu0 %v6673_v55  ;;  %v3152_v38 = vld [vmem:[#allocation8 + $0x130] sm:$0xff] }
 0x461   : > { %2849 = vmatprep.mubr.f32.mxu1 %v5196_v42  ;;  %3442 = vmatprep.subr.mxu1 %v6673_v55  ;;  %v3144_v42 = vld [vmem:[#allocation8 + $0xf0] sm:$0xff] }
 0x462   : > { %2641 = vmatmul.mubr.f32.gmra.mxu0 %v5203_v58  ;;  %3443 = vmatpush1.msra.mxu1 %v3154_v4 }
 0x463   : > { %2646 = vmatprep.mubr.f32.mxu0 %v5208_v59  ;;  %3274 = vmatpush1.msra.mxu0 %v3114_v63 }
 0x464   : > { %2850 = vmatmul.mubr.f32.gmra.mxu1 %v5203_v58  ;;  %3275 = vmatprep.subr.mxu0 %v6673_v55  ;;  %v3151_v58 = vld [vmem:[#allocation8 + $0x128] sm:$0xff] }
 0x465   : > { %2855 = vmatprep.mubr.f32.mxu1 %v5208_v59  ;;  %3444 = vmatprep.subr.mxu1 %v6673_v55  ;;  %v3143_v59 = vld [vmem:[#allocation8 + $0xe8] sm:$0xff] }
 0x466   : > { %2647 = vmatmul.mubr.f32.gmra.mxu0 %v5213_v18  ;;  %3445 = vmatpush1.msra.mxu1 %v3153_v22  ;;  %v6694_v22 = vld [vmem:[#allocation16_spill] sm:$0xff] }
 0x467   : > { %2652 = vmatprep.mubr.f32.mxu0 %v5218_v26  ;;  %3276 = vmatpush2.msra.mxu0 %v3145_v30  ;;  %v5524_v30 = vrot.slane %v5487_v47, %v6694_v22 }
 0x468   : > { %2856 = vmatmul.mubr.f32.gmra.mxu1 %v5213_v18  ;;  %3277 = vmatprep.subr.mxu0 %v6673_v55  ;;  %v3150_v18 = vld [vmem:[#allocation8 + $0x120] sm:$0xff] }
 0x469   : > { %2861 = vmatprep.mubr.f32.mxu1 %v5218_v26  ;;  %3446 = vmatprep.subr.mxu1 %v6673_v55  ;;  %v3142_v26 = vld [vmem:[#allocation8 + $0xe0] sm:$0xff] }
 0x46a   : > { %2653 = vmatmul.mubr.f32.gmra.mxu0 %v5223_v37  ;;  %3447 = vmatpush1.msra.mxu1 %v3152_v38 }
 0x46b   : > { %2658 = vmatprep.mubr.f32.mxu0 %v5226_v46  ;;  %3278 = vmatpush2.msra.mxu0 %v3144_v42  ;;  %v3166_v42 = vld [vmem:[#allocation8 + $0x1a0] sm:$0xff] }
 0x46c   : > { %2862 = vmatmul.mubr.f32.gmra.mxu1 %v5223_v37  ;;  %3448 = vmatprep.subr.mxu1 %v6673_v55  ;;  %v3149_v37 = vld [vmem:[#allocation8 + $0x118] sm:$0xff] }
 0x46d   : > { %2867 = vmatprep.mubr.f32.mxu1 %v5226_v46  ;;  %3279 = vmatprep.subr.mxu0 %v6673_v55  ;;  %v3148_v46 = vld [vmem:[#allocation8 + $0x110] sm:$0xff] }
 0x46e   : > { %2659 = vmatmul.mubr.f32.gmra.mxu0 %v5233_v2  ;;  %3449 = vmatpush1.msra.mxu1 %v3151_v58  ;;  %v3131_v58 = vld [vmem:[#allocation8 + $0x88] sm:$0xff] }
 0x46f   : > { %2664 = vmatprep.mubr.f32.mxu0 %v5238_v8  ;;  %3280 = vmatpush2.msra.mxu0 %v3143_v59 }
 0x470   : > { %2868 = vmatmul.mubr.f32.gmra.mxu1 %v5233_v2  ;;  %3450 = vmatprep.subr.mxu1 %v6673_v55  ;;  %v3141_v2 = vld [vmem:[#allocation8 + $0xd8] sm:$0xff] }
 0x471   : > { %2873 = vmatprep.mubr.f32.mxu1 %v5238_v8  ;;  %3451 = vmatpush1.msra.mxu1 %v3150_v18  ;;  %v3147_v8 = vld [vmem:[#allocation8 + $0x108] sm:$0xff] }
 0x472   : > { %2665 = vmatmul.mubr.f32.gmra.mxu0 %v5243_v29  ;;  %3281 = vmatprep.subr.mxu0 %v6673_v55 }
 0x473   : > { %3452 = vmatprep.subr.mxu1 %v6673_v55  ;;  %2670 = vmatprep.mubr.f32.mxu0 %v5248_v25 }
 0x474   : > { %2874 = vmatmul.mubr.f32.gmra.mxu1 %v5243_v29  ;;  %3282 = vmatpush2.msra.mxu0 %v3142_v26  ;;  %v3140_v29 = vld [vmem:[#allocation8 + $0xd0] sm:$0xff]  ;;  %v3165_v26 = vld [vmem:[#allocation8 + $0x198] sm:$0xff] }
 0x475   : > { %2879 = vmatprep.mubr.f32.mxu1 %v5248_v25  ;;  %3453 = vmatpush1.msra.mxu1 %v3149_v37  ;;  %v3177_v25 = vld [vmem:[#allocation8 + $0x1f8] sm:$0xff] }
 0x476   : > { %3454 = vmatprep.subr.mxu1 %v6673_v55  ;;  %3283 = vmatprep.subr.mxu0 %v6673_v55 }
 0x477   : > { %3455 = vmatpush1.msra.mxu1 %v3148_v46  ;;  %2671 = vmatmul.mubr.f32.gmra.mxu0 %v5253_v52  ;;  %v3130_v46 = vld [vmem:[#allocation8 + $0x80] sm:$0xff] }
 0x478   : > { %2880 = vmatmul.mubr.f32.gmra.mxu1 %v5253_v52  ;;  %3284 = vmatpush2.msra.mxu0 %v3141_v2  ;;  %v3139_v52 = vld [vmem:[#allocation8 + $0xc8] sm:$0xff] }
 0x479   : > { %3456 = vmatprep.subr.mxu1 %v6673_v55  ;;  %2676 = vmatprep.mubr.f32.mxu0 %v5256_v62 }
 0x47a   : > { %2885 = vmatprep.mubr.f32.mxu1 %v5256_v62  ;;  %3457 = vmatpush1.msra.mxu1 %v3147_v8  ;;  %v3176_v62 = vld [vmem:[#allocation8 + $0x1f0] sm:$0xff] }
 0x47b   : > { %3285 = vmatprep.subr.mxu0 %v6673_v55  ;;  %3458 = vmatprep.subr.mxu1 %v6673_v55 }
 0x47c   : > { %3286 = vmatpush2.msra.mxu0 %v3140_v29  ;;  %3459 = vmatpush1.msra.mxu1 %v3146_v10 }
 0x47d   : > { %2677 = vmatmul.mubr.f32.gmra.mxu0 %v5263_v16  ;;  %2886 = vmatmul.mubr.f32.gmra.mxu1 %v5263_v16  ;;  %v3138_v16 = vld [vmem:[#allocation8 + $0xc0] sm:$0xff] }
 0x47e   : > { %3460 = vmatprep.subr.mxu1 %v6673_v55  ;;  %2682 = vmatprep.mubr.f32.mxu0 %v5268_v34 }
 0x47f   : > { %2891 = vmatprep.mubr.f32.mxu1 %v5268_v34  ;;  %3287 = vmatprep.subr.mxu0 %v6673_v55  ;;  %v3174_v34 = vld [vmem:[#allocation8 + $0x1e0] sm:$0xff] }
 0x480   : > { %3461 = vmatpush2.msra.mxu1 %v3177_v25  ;;  %3288 = vmatpush2.msra.mxu0 %v3139_v52  ;;  %v3164_v25 = vld [vmem:[#allocation8 + $0x190] sm:$0xff] }
 0x481   : > { %3462 = vmatprep.subr.mxu1 %v6673_v55  ;;  %2683 = vmatmul.mubr.f32.gmra.mxu0 %v5273_v23 }
 0x482   : > { %3463 = vmatpush2.msra.mxu1 %v3176_v62  ;;  %3289 = vmatprep.subr.mxu0 %v6673_v55 }
 0x483   : > { %2892 = vmatmul.mubr.f32.gmra.mxu1 %v5273_v23  ;;  %3464 = vmatprep.subr.mxu1 %v6673_v55 }
 0x484   : > { %2688 = vmatprep.mubr.f32.mxu0 %v5278_v12  ;;  %2897 = vmatprep.mubr.f32.mxu1 %v5278_v12  ;;  %v5443_v19 = vpop.f32.mrf.mxu0  ;;  %v5445_v20 = vpop.f32.mrf.mxu1  ;;  %v3173_v12 = vld [vmem:[#allocation8 + $0x1d8] sm:$0xff] }
 0x485   : > { %3290 = vmatpush2.msra.mxu0 %v3138_v16  ;;  %3465 = vmatpush2.msra.mxu1 %v3175_v50  ;;  %v2153_v29 = vadd.f32 %v5443_v19, %v5524_v30  ;;  %v3163_v19 = vld [vmem:[#allocation8 + $0x188] sm:$0xff] }
 0x486   : > { %3466 = vmatprep.subr.mxu1 %v6673_v55  ;;  %3291 = vmatprep.subr.mxu0 %v6673_v55  ;;  %v5449_v56 = vpop.f32.mrf.mxu0  ;;  %v5451_v23 = vpop.f32.mrf.mxu1 }
 0x487   : > { %3467 = vmatpush2.msra.mxu1 %v3174_v34  ;;  %2689 = vmatmul.mubr.f32.gmra.mxu0 %v5283_v51  ;;  %v2155_v61 = vadd.f32 %v5449_v56, %v5498_v11 }
 0x488   : > { %2898 = vmatmul.mubr.f32.gmra.mxu1 %v5283_v51  ;;  %3292 = vmatpush2.msra.mxu0 %v3137_v9  ;;  %v5455_v40 = vpop.f32.mrf.mxu1 }
 0x489   : > { %3468 = vmatprep.subr.mxu1 %v6673_v55  ;;  %2694 = vmatprep.mubr.f32.mxu0 %v5287_v49  ;;  %v5459_v54 = vpop.f32.mrf.mxu0  ;;  %v2923_v37 = vmax.f32 %v2155_v61, 0.0 }
 0x48a   : > { %2903 = vmatprep.mubr.f32.mxu1 %v5287_v49  ;;  %3469 = vmatpush2.msra.mxu1 %v3173_v12  ;;  %v5462_v3 = vpop.f32.mrf.mxu1  ;;  %v3193_v12 = vld [vmem:[#allocation8 + $0x278] sm:$0xff] }
 0x48b   : > { %3293 = vmatprep.subr.mxu0 %v6673_v55  ;;  %3470 = vmatprep.subr.mxu1 %v6673_v55  ;;  %v5466_v51 = vpop.f32.mrf.mxu0 }
 0x48c   : > { %3294 = vmatpush2.msra.mxu0 %v3136_v41  ;;  %3471 = vmatpush2.msra.mxu1 %v3172_v31  ;;  %v5468_v7 = vpop.f32.mrf.mxu1  ;;  %v2161_v52 = vadd.f32 %v5466_v51, %v5498_v11  ;;  %v2159_v31 = vadd.f32 %v5459_v54, %v5524_v30 }
 0x48d   : > { %2695 = vmatmul.mubr.f32.gmra.mxu0 %v5293_v13  ;;  %2904 = vmatmul.mubr.f32.gmra.mxu1 %v5293_v13  ;;  %v5472_v49 = vpop.f32.mrf.mxu0  ;;  %v2060_v13 = vsub.s32 3, %v4902_v45 }
 0x48e   : > { %3472 = vmatprep.subr.mxu1 %v6673_v55  ;;  %2700 = vmatprep.mubr.f32.mxu0 %v5296_v33  ;;  %v5476_v28 = vpop.f32.mrf.mxu1 }
 0x48f   : > { %2909 = vmatprep.mubr.f32.mxu1 %v5296_v33  ;;  %3295 = vmatprep.subr.mxu0 %v6673_v55  ;;  %v5480_v27 = vpop.f32.mrf.mxu0  ;;  %v3134_v33 = vld [vmem:[#allocation8 + $0xa0] sm:$0xff]  ;;  %v5505_v32 = vrot.slane %v5487_v47, %v2060_v13 }
 0x490   : > { %3473 = vmatpush2.msra.mxu1 %v3171_v14  ;;  %3296 = vmatpush2.msra.mxu0 %v3135_v15  ;;  %v5483_v44 = vpop.f32.mrf.mxu1  ;;  %v2167_v41 = vadd.f32 %v5480_v27, %v5498_v11 }
 0x491   : > { %3474 = vmatprep.subr.mxu1 %v6673_v55  ;;  %2701 = vmatmul.mubr.f32.gmra.mxu0 %v5304_v57  ;;  %v5489_v60 = vpop.f32.mrf.mxu0  ;;  %v2364_v38 = vadd.f32 %v5451_v23, %v5505_v32  ;;  %v2370_v50 = vadd.f32 %v5462_v3, %v5505_v32  ;;  %v2922_v23 = vmax.f32 %v2153_v29, 0.0  ;;  %v3162_v3 = vld [vmem:[#allocation8 + $0x180] sm:$0xff]  ;;  %v2376_v24 = vadd.f32 %v5476_v28, %v5505_v32 }
 0x492   : > { %3475 = vmatpush2.msra.mxu1 %v3170_v36  ;;  %3297 = vmatprep.subr.mxu0 %v6673_v55  ;;  %v5492_v6 = vpop.f32.mrf.mxu1  ;;  %v3192_v36 = vld [vmem:[#allocation8 + $0x270] sm:$0xff]  ;;  %v2930_v28 = vmax.f32 %v2159_v31, 0.0 }
 0x493   : > { %2910 = vmatmul.mubr.f32.gmra.mxu1 %v5304_v57  ;;  %3476 = vmatprep.subr.mxu1 %v6673_v55  ;;  %v5500_v17 = vpop.f32.mrf.mxu0  ;;  %v2925_v10 = vmax.f32 %v2364_v38, 0.0  ;;  %v2933_v15 = vmax.f32 %v2370_v50, 0.0 }
 0x494   : > { %2706 = vmatprep.mubr.f32.mxu0 %v5308_v1  ;;  %2915 = vmatprep.mubr.f32.mxu1 %v5308_v1  ;;  %v3132_v1 = vld [vmem:[#allocation8 + $0x90] sm:$0xff] }
 0x495   : > { %3298 = vmatpush2.msra.mxu0 %v3134_v33  ;;  %3477 = vmatpush2.msra.mxu1 %v3169_v0  ;;  %v5507_v57 = vpop.f32.mrf.mxu0  ;;  %v5509_v43 = vpop.f32.mrf.mxu1  ;;  %v2939_v33 = vmax.f32 %v2167_v41, 0.0  ;;  %v2173_v0 = vadd.f32 %v5500_v17, %v5498_v11 }
 0x496   : > { %3478 = vmatprep.subr.mxu1 %v6673_v55  ;;  %3299 = vmatprep.subr.mxu0 %v6673_v55 }
 0x497   : > { %3479 = vmatpush2.msra.mxu1 %v3168_v21  ;;  %2707 = vmatmul.mubr.f32.gmra.mxu0 %v5312_v39  ;;  %v5517_v4 = vpop.f32.mrf.mxu0  ;;  %v5519_v63 = vpop.f32.mrf.mxu1  ;;  %v2165_v21 = vadd.f32 %v5472_v49, %v5524_v30  ;;  %v3190_v49 = vld [vmem:[#allocation8 + $0x260] sm:$0xff] }
 0x498   : > { %2916 = vmatmul.mubr.f32.gmra.mxu1 %v5312_v39  ;;  %3300 = vmatpush2.msra.mxu0 %v3133_v35  ;;  %v5536_v39 = vrot.slane %v5487_v47, %v2056_v48  ;;  %v2382_v48 = vadd.f32 %v5492_v6, %v5505_v32  ;;  %v2171_v6 = vadd.f32 %v5489_v60, %v5524_v30  ;;  %v3188_v60 = vld [vmem:[#allocation8 + $0x250] sm:$0xff] }
 0x499   : > { %3480 = vmatprep.subr.mxu1 %v6673_v55  ;;  %3301 = vmatprep.subr.mxu0 %v6673_v55  ;;  %v5530_v59 = vpop.f32.mrf.mxu0  ;;  %v5532_v18 = vpop.f32.mrf.mxu1 }
 0x49a   : > { %3481 = vmatpush2.msra.mxu1 %v3167_v53  ;;  %3302 = vmatpush2.msra.mxu0 %v3132_v1  ;;  %v2362_v34 = vadd.f32 %v5445_v20, %v5536_v39  ;;  %v2931_v20 = vmax.f32 %v2161_v52, 0.0  ;;  %v2368_v54 = vadd.f32 %v5455_v40, %v5536_v39  ;;  %v3191_v40 = vld [vmem:[#allocation8 + $0x268] sm:$0xff]  ;;  %v2941_v1 = vmax.f32 %v2376_v24, 0.0 }
 0x49b   : > { %3482 = vmatprep.subr.mxu1 %v6673_v55  ;;  %3303 = vmatprep.subr.mxu0 %v6673_v55  ;;  %v5539_v2 = vpop.f32.mrf.mxu0  ;;  %v5541_v8 = vpop.f32.mrf.mxu1  ;;  %v2374_v17 = vadd.f32 %v5468_v7, %v5536_v39  ;;  %v3189_v7 = vld [vmem:[#allocation8 + $0x258] sm:$0xff] }
 0x49c   : > { %3483 = vmatpush2.msra.mxu1 %v3166_v42  ;;  %3304 = vmatpush2.msra.mxu0 %v3131_v58  ;;  %v2924_v5 = vmax.f32 %v2362_v34, 0.0  ;;  %v2932_v61 = vmax.f32 %v2368_v54, 0.0  ;;  %v2947_v42 = vmax.f32 %v2173_v0, 0.0  ;;  %v2179_v58 = vadd.f32 %v5517_v4, %v5498_v11  ;;  %v3185_v0 = vld [vmem:[#allocation8 + $0x238] sm:$0xff] }
 0x49d   : > { %3484 = vmatprep.subr.mxu1 %v6673_v55  ;;  %3305 = vmatprep.subr.mxu0 %v6673_v55  ;;  %v5549_v62 = vpop.f32.mrf.mxu0  ;;  %v5551_v16 = vpop.f32.mrf.mxu1  ;;  %v2380_v4 = vadd.f32 %v5483_v44, %v5536_v39  ;;  %v2185_v50 = vadd.f32 %v5539_v2, %v5498_v11  ;;  %v3187_v44 = vld [vmem:[#allocation8 + $0x248] sm:$0xff]  ;;  %v2394_v41 = vadd.f32 %v5541_v8, %v5505_v32 }
 0x49e   : > { %3485 = vmatpush2.msra.mxu1 %v3165_v26  ;;  %3306 = vmatpush2.msra.mxu0 %v3130_v46  ;;  %v2938_v26 = vmax.f32 %v2165_v21, 0.0  ;;  %v2388_v46 = vadd.f32 %v5519_v63, %v5505_v32  ;;  %v2955_v52 = vmax.f32 %v2179_v58, 0.0  ;;  %v2386_v2 = vadd.f32 %v5509_v43, %v5536_v39 }
 0x49f   : > { %3486 = vmatprep.subr.mxu1 %v6673_v55  ;;  %3307 = vmatprep.mubr.f32.mxu0 %v2923_v37  ;;  %v5558_v9 = vpop.f32.mrf.mxu0  ;;  %v5560_v56 = vpop.f32.mrf.mxu1  ;;  %v2949_v37 = vmax.f32 %v2382_v48, 0.0  ;;  %v2948_v31 = vmax.f32 %v2380_v4, 0.0 }
 0x4a0   : > { %3487 = vmatpush2.msra.mxu1 %v3164_v25  ;;  %3492 = vmatprep.mubr.f32.mxu1 %v2925_v10  ;;  %v2940_v25 = vmax.f32 %v2374_v17, 0.0  ;;  %v2191_v24 = vadd.f32 %v5558_v9, %v5498_v11  ;;  %v2956_v9 = vmax.f32 %v2386_v2, 0.0 }
 0x4a1   : > { %3488 = vmatprep.subr.mxu1 %v6673_v55  ;;  %3613 = vmatprep.subr.mxu0 %v6673_v55  ;;  %v5568_v51 = vpop.f32.mrf.mxu0  ;;  %v5570_v14 = vpop.f32.mrf.mxu1 }
 0x4a2   : > { %3489 = vmatpush2.msra.mxu1 %v3163_v19  ;;  %3308 = vmatmul.mubr.f32.vlgmr.msra.gmra.mxu0 %v2922_v23  ;;  %v2946_v19 = vmax.f32 %v2171_v6, 0.0  ;;  %v2177_v23 = vadd.f32 %v5507_v57, %v5524_v30 }
 0x4a3   : > { %3490 = vmatprep.subr.mxu1 %v6673_v55  ;;  %3614 = vmatpush1.msra.mxu0 %v3193_v12  ;;  %v5577_v27 = vpop.f32.mrf.mxu0  ;;  %v5579_v13 = vpop.f32.mrf.mxu1  ;;  %v2957_v12 = vmax.f32 %v2388_v46, 0.0 }
 0x4a4   : > { %3491 = vmatpush2.msra.mxu1 %v3162_v3  ;;  %3615 = vmatprep.subr.mxu0 %v6673_v55  ;;  %v2954_v8 = vmax.f32 %v2177_v23, 0.0 }
 0x4a5   : > { %3493 = vmatmul.mubr.f32.vlgmr.msra.gmra.mxu1 %v2924_v5  ;;  %3312 = vmatprep.mubr.f32.mxu0 %v2931_v20  ;;  %v5586_v35 = vpop.f32.mrf.mxu0  ;;  %v5588_v53 = vpop.f32.mrf.mxu1  ;;  %v3186_v20 = vld [vmem:[#allocation8 + $0x240] sm:$0xff]  ;;  %v2183_v5 = vadd.f32 %v5530_v59, %v5524_v30  ;;  %v5645_v59 = vld [vmem:[#allocation8 + $0x378] sm:$0xff] }
 0x4a6   : > { %3497 = vmatprep.mubr.f32.mxu1 %v2933_v15  ;;  %3616 = vmatpush1.msra.mxu0 %v3192_v36  ;;  %v2963_v15 = vmax.f32 %v2185_v50, 0.0  ;;  %v2965_v36 = vmax.f32 %v2394_v41, 0.0 }
 0x4a7   : > { %3313 = vmatmul.mubr.f32.gmra.mxu0 %v2930_v28  ;;  %3617 = vmatprep.subr.mxu0 %v6673_v55  ;;  %v5595_v22 = vpop.f32.mrf.mxu0  ;;  %v5597_v38 = vpop.f32.mrf.mxu1  ;;  %v2392_v28 = vadd.f32 %v5532_v18, %v5536_v39  ;;  %v2962_v48 = vmax.f32 %v2183_v5, 0.0  ;;  %v2189_v18 = vadd.f32 %v5549_v62, %v5524_v30  ;;  %v5666_v62 = vld [vmem:[#allocation8 + $0x370] sm:$0xff] }
 0x4a8   : > { %3618 = vmatpush1.msra.mxu0 %v3191_v40  ;;  %3317 = vmatprep.mubr.f32.mxu0 %v2939_v33  ;;  %v2400_v33 = vadd.f32 %v5560_v56, %v5505_v32  ;;  %v2197_v56 = vadd.f32 %v5577_v27, %v5498_v11  ;;  %v3184_v27 = vld [vmem:[#allocation8 + $0x230] sm:$0xff]  ;;  %v2412_v4 = vadd.f32 %v5597_v38, %v5505_v32 }
 0x4a9   : > { %3498 = vmatmul.mubr.f32.gmra.mxu1 %v2932_v61  ;;  %3619 = vmatprep.subr.mxu0 %v6673_v55  ;;  %v2964_v58 = vmax.f32 %v2392_v28, 0.0  ;;  %v2970_v46 = vmax.f32 %v2189_v18, 0.0 }
 0x4aa   : > { %3502 = vmatprep.mubr.f32.mxu1 %v2941_v1  ;;  %3620 = vmatpush1.msra.mxu0 %v3190_v49  ;;  %v5606_v29 = vpop.f32.mrf.mxu0  ;;  %v5608_v10 = vpop.f32.mrf.mxu1  ;;  %v2971_v1 = vmax.f32 %v2191_v24, 0.0  ;;  %v2973_v49 = vmax.f32 %v2400_v33, 0.0  ;;  %v2979_v6 = vmax.f32 %v2197_v56, 0.0 }
 0x4ab   : > { %3318 = vmatmul.mubr.f32.gmra.mxu0 %v2938_v26  ;;  %3621 = vmatprep.subr.mxu0 %v6673_v55  ;;  %v2398_v26 = vadd.f32 %v5551_v16, %v5536_v39  ;;  %v2195_v16 = vadd.f32 %v5568_v51, %v5524_v30  ;;  %v5687_v51 = vld [vmem:[#allocation8 + $0x368] sm:$0xff] }
 0x4ac   : > { %3322 = vmatprep.mubr.f32.mxu0 %v2947_v42  ;;  %3622 = vmatpush1.msra.mxu0 %v3189_v7  ;;  %v5615_v34 = vpop.f32.mrf.mxu0  ;;  %v5617_v63 = vpop.f32.mrf.mxu1  ;;  %v2406_v42 = vadd.f32 %v5579_v13, %v5505_v32  ;;  %v2203_v7 = vadd.f32 %v5595_v22, %v5498_v11  ;;  %v3183_v22 = vld [vmem:[#allocation8 + $0x228] sm:$0xff] }
 0x4ad   : > { %3503 = vmatmul.mubr.f32.gmra.mxu1 %v2940_v25  ;;  %3623 = vmatprep.subr.mxu0 %v6673_v55  ;;  %v2972_v50 = vmax.f32 %v2398_v26, 0.0  ;;  %v2209_v38 = vadd.f32 %v5615_v34, %v5498_v11  ;;  %v2418_v2 = vadd.f32 %v5617_v63, %v5505_v32  ;;  %v2410_v34 = vadd.f32 %v5588_v53, %v5536_v39  ;;  %v3180_v26 = vld [vmem:[#allocation8 + $0x210] sm:$0xff] }
 0x4ae   : > { %3507 = vmatprep.mubr.f32.mxu1 %v2949_v37  ;;  %3624 = vmatpush1.msra.mxu0 %v3188_v60  ;;  %v2981_v25 = vmax.f32 %v2406_v42, 0.0  ;;  %v2987_v23 = vmax.f32 %v2203_v7, 0.0  ;;  %v2207_v53 = vadd.f32 %v5606_v29, %v5524_v30  ;;  %v5725_v29 = vld [vmem:[#allocation8 + $0x358] sm:$0xff] }
 0x4af   : > { %3323 = vmatmul.mubr.f32.gmra.mxu0 %v2946_v19  ;;  %3625 = vmatprep.subr.mxu0 %v6673_v55  ;;  %v5627_v3 = vpop.f32.mrf.mxu0  ;;  %v5629_v57 = vpop.f32.mrf.mxu1  ;;  %v2404_v19 = vadd.f32 %v5570_v14, %v5536_v39  ;;  %v2995_v5 = vmax.f32 %v2209_v38, 0.0  ;;  %v2988_v56 = vmax.f32 %v2410_v34, 0.0 }
 0x4b0   : > { %3327 = vmatprep.mubr.f32.mxu0 %v2955_v52  ;;  %3626 = vmatpush1.msra.mxu0 %v3187_v44  ;;  %v2978_v44 = vmax.f32 %v2195_v16, 0.0  ;;  %v2994_v42 = vmax.f32 %v2207_v53, 0.0 }
 0x4b1   : > { %3508 = vmatmul.mubr.f32.gmra.mxu1 %v2948_v31  ;;  %3627 = vmatprep.subr.mxu0 %v6673_v55  ;;  %v5636_v43 = vpop.f32.mrf.mxu0  ;;  %v5638_v54 = vpop.f32.mrf.mxu1  ;;  %v2989_v31 = vmax.f32 %v2412_v4, 0.0 }
 0x4b2   : > { %3512 = vmatprep.mubr.f32.mxu1 %v2957_v12  ;;  %3628 = vmatpush1.msra.mxu0 %v3186_v20  ;;  %v2201_v12 = vadd.f32 %v5586_v35, %v5524_v30  ;;  %v3182_v20 = vld [vmem:[#allocation8 + $0x220] sm:$0xff]  ;;  %v2215_v63 = vadd.f32 %v5636_v43, %v5498_v11  ;;  %v2424_v28 = vadd.f32 %v5638_v54, %v5505_v32 }
 0x4b3   : > { %3328 = vmatmul.mubr.f32.gmra.mxu0 %v2954_v8  ;;  %3629 = vmatprep.subr.mxu0 %v6673_v55  ;;  %v5647_v21 = vpop.f32.mrf.mxu0  ;;  %v5649_v40 = vpop.f32.mrf.mxu1  ;;  %v5704_v35 = vld [vmem:[#allocation8 + $0x360] sm:$0xff]  ;;  %v2416_v43 = vadd.f32 %v5608_v10, %v5536_v39  ;;  %v2213_v54 = vadd.f32 %v5627_v3, %v5524_v30  ;;  %v2422_v3 = vadd.f32 %v5629_v57, %v5536_v39 }
 0x4b4   : > { %3332 = vmatprep.mubr.f32.mxu0 %v2963_v15  ;;  %4237 = vmatprep.subr.mxu1 %v6673_v55  ;;  %v2980_v15 = vmax.f32 %v2404_v19, 0.0  ;;  %v2219_v4 = vadd.f32 %v5647_v21, %v5524_v30  ;;  %v5763_v21 = vld [vmem:[#allocation8 + $0x348] sm:$0xff] }
 0x4b5   : > { %3513 = vmatmul.mubr.f32.gmra.mxu1 %v2956_v9  ;;  %3630 = vmatpush1.msra.mxu0 %v3185_v0  ;;  %v5656_v61 = vpop.f32.mrf.mxu0  ;;  %v5658_v17 = vpop.f32.mrf.mxu1  ;;  %v2997_v9 = vmax.f32 %v2418_v2, 0.0  ;;  %v3004_v38 = vmax.f32 %v2422_v3, 0.0 }
 0x4b6   : > { %3517 = vmatprep.mubr.f32.mxu1 %v2965_v36  ;;  %4269 = vmatpush1.msra.mxu1 %v5645_v59  ;;  %v2986_v36 = vmax.f32 %v2201_v12, 0.0  ;;  %v2221_v10 = vadd.f32 %v5656_v61, %v5498_v11  ;;  %v5746_v61 = vld [vmem:[#allocation8 + $0x350] sm:$0xff] }
 0x4b7   : > { %3333 = vmatmul.mubr.f32.gmra.mxu0 %v2962_v48  ;;  %3631 = vmatprep.subr.mxu0 %v6673_v55 }
 0x4b8   : > { %3337 = vmatprep.mubr.f32.mxu0 %v2971_v1  ;;  %4238 = vmatprep.subr.mxu1 %v6673_v55  ;;  %v5671_v13 = vpop.f32.mrf.mxu0  ;;  %v5673_v37 = vpop.f32.mrf.mxu1  ;;  %v3181_v1 = vld [vmem:[#allocation8 + $0x218] sm:$0xff] }
 0x4b9   : > { %3518 = vmatmul.mubr.f32.gmra.mxu1 %v2964_v58  ;;  %3632 = vmatpush1.msra.mxu0 %v3184_v27  ;;  %v3005_v27 = vmax.f32 %v2424_v28, 0.0  ;;  %v2430_v58 = vadd.f32 %v5658_v17, %v5505_v32  ;;  %v2434_v34 = vadd.f32 %v5673_v37, %v5536_v39  ;;  %v5791_v37 = vld [vmem:[#allocation8 + $0x338] sm:$0xff] }
 0x4ba   : > { %3522 = vmatprep.mubr.f32.mxu1 %v2973_v49  ;;  %4270 = vmatpush1.msra.mxu1 %v5666_v62  ;;  %v5680_v60 = vpop.f32.mrf.mxu0  ;;  %v5682_v52 = vpop.f32.mrf.mxu1  ;;  %v3003_v49 = vmax.f32 %v2215_v63, 0.0 }
 0x4bb   : > { %3338 = vmatmul.mubr.f32.gmra.mxu0 %v2970_v46  ;;  %3633 = vmatprep.subr.mxu0 %v6673_v55  ;;  %v2996_v46 = vmax.f32 %v2416_v43, 0.0  ;;  %v2227_v57 = vadd.f32 %v5680_v60, %v5498_v11  ;;  %v3013_v19 = vmax.f32 %v2430_v58, 0.0 }
 0x4bc   : > { %3342 = vmatprep.mubr.f32.mxu0 %v2979_v6  ;;  %4239 = vmatprep.subr.mxu1 %v6673_v55 }
 0x4bd   : > { %3523 = vmatmul.mubr.f32.gmra.mxu1 %v2972_v50  ;;  %3634 = vmatpush1.msra.mxu0 %v3183_v22  ;;  %v5694_v41 = vpop.f32.mrf.mxu0  ;;  %v5696_v14 = vpop.f32.mrf.mxu1  ;;  %v3011_v22 = vmax.f32 %v2221_v10, 0.0  ;;  %v3179_v50 = vld [vmem:[#allocation8 + $0x208] sm:$0xff]  ;;  %v3019_v2 = vmax.f32 %v2227_v57, 0.0 }
 0x4be   : > { %3527 = vmatprep.mubr.f32.mxu1 %v2981_v25  ;;  %4271 = vmatpush1.msra.mxu1 %v5687_v51  ;;  %v3002_v25 = vmax.f32 %v2213_v54, 0.0 }
 0x4bf   : > { %3343 = vmatmul.mubr.f32.gmra.mxu0 %v2978_v44  ;;  %3635 = vmatprep.subr.mxu0 %v6673_v55  ;;  %v5706_v24 = vpop.f32.mrf.mxu0  ;;  %v5708_v8 = vpop.f32.mrf.mxu1  ;;  %v2428_v44 = vadd.f32 %v5649_v40, %v5536_v39 }
 0x4c0   : > { %3347 = vmatprep.mubr.f32.mxu0 %v2987_v23  ;;  %4240 = vmatprep.subr.mxu1 %v6673_v55  ;;  %v2436_v23 = vadd.f32 %v5682_v52, %v5505_v32  ;;  %v3178_v52 = vld [vmem:[#allocation8 + $0x200] sm:$0xff]  ;;  %v2233_v53 = vadd.f32 %v5706_v24, %v5498_v11  ;;  %v3020_v24 = vmax.f32 %v2434_v34, 0.0 }
 0x4c1   : > { %3528 = vmatmul.mubr.f32.gmra.mxu1 %v2980_v15  ;;  %3636 = vmatpush1.msra.mxu0 %v3182_v20  ;;  %v5715_v33 = vpop.f32.mrf.mxu0  ;;  %v5717_v0 = vpop.f32.mrf.mxu1  ;;  %v2225_v15 = vadd.f32 %v5671_v13, %v5524_v30  ;;  %v3012_v63 = vmax.f32 %v2428_v44, 0.0  ;;  %v5830_v44 = vld [vmem:[#allocation8 + $0x328] sm:$0xff] }
 0x4c2   : > { %3532 = vmatprep.mubr.f32.mxu1 %v2989_v31  ;;  %4272 = vmatpush1.msra.mxu1 %v5704_v35  ;;  %v3010_v31 = vmax.f32 %v2219_v4, 0.0  ;;  %v3027_v54 = vmax.f32 %v2233_v53, 0.0  ;;  %v5847_v53 = vld [vmem:[#allocation8 + $0x320] sm:$0xff] }
 0x4c3   : > { %3348 = vmatmul.mubr.f32.gmra.mxu0 %v2986_v36  ;;  %3637 = vmatprep.subr.mxu0 %v6673_v55  ;;  %v5727_v48 = vpop.f32.mrf.mxu0  ;;  %v5729_v18 = vpop.f32.mrf.mxu1  ;;  %v5780_v36 = vld [vmem:[#allocation8 + $0x340] sm:$0xff]  ;;  %v3018_v43 = vmax.f32 %v2225_v15, 0.0 }
 0x4c4   : > { %3352 = vmatprep.mubr.f32.mxu0 %v2995_v5  ;;  %4241 = vmatprep.subr.mxu1 %v6673_v55  ;;  %v3021_v5 = vmax.f32 %v2436_v23, 0.0  ;;  %v2448_v58 = vadd.f32 %v5729_v18, %v5505_v32  ;;  %v2237_v18 = vadd.f32 %v5715_v33, %v5524_v30 }
 0x4c5   : > { %3533 = vmatmul.mubr.f32.gmra.mxu1 %v2988_v56  ;;  %3638 = vmatpush1.msra.mxu0 %v3181_v1 }
 0x4c6   : > { %3537 = vmatprep.mubr.f32.mxu1 %v2997_v9  ;;  %4273 = vmatpush1.msra.mxu1 %v5725_v29  ;;  %v5739_v6 = vpop.f32.mrf.mxu0  ;;  %v5741_v7 = vpop.f32.mrf.mxu1  ;;  %v2442_v9 = vadd.f32 %v5708_v8, %v5505_v32  ;;  %v3209_v8 = vld [vmem:[#allocation8 + $0x2f8] sm:$0xff] }
 0x4c7   : > { %3353 = vmatmul.mubr.f32.gmra.mxu0 %v2994_v42  ;;  %3639 = vmatprep.subr.mxu0 %v6673_v55  ;;  %v2440_v42 = vadd.f32 %v5696_v14, %v5536_v39  ;;  %v3208_v14 = vld [vmem:[#allocation8 + $0x2f0] sm:$0xff]  ;;  %v2452_v15 = vadd.f32 %v5741_v7, %v5536_v39 }
 0x4c8   : > { %4242 = vmatprep.subr.mxu1 %v6673_v55  ;;  %3357 = vmatprep.mubr.f32.mxu0 %v3003_v49  ;;  %v5749_v16 = vpop.f32.mrf.mxu0  ;;  %v5751_v17 = vpop.f32.mrf.mxu1  ;;  %v2231_v49 = vadd.f32 %v5694_v41, %v5524_v30  ;;  %v3029_v10 = vmax.f32 %v2442_v9, 0.0 }
 0x4c9   : > { %3538 = vmatmul.mubr.f32.gmra.mxu1 %v2996_v46  ;;  %3640 = vmatpush1.msra.mxu0 %v3180_v26  ;;  %v5813_v46 = vld [vmem:[#allocation8 + $0x330] sm:$0xff]  ;;  %v3028_v4 = vmax.f32 %v2440_v42, 0.0  ;;  %v2454_v23 = vadd.f32 %v5751_v17, %v5505_v32 }
 0x4ca   : > { %3542 = vmatprep.mubr.f32.mxu1 %v3005_v27  ;;  %4274 = vmatpush1.msra.mxu1 %v5746_v61  ;;  %v2239_v27 = vadd.f32 %v5727_v48, %v5498_v11  ;;  %v3026_v48 = vmax.f32 %v2231_v49, 0.0  ;;  %v3205_v49 = vld [vmem:[#allocation8 + $0x2d8] sm:$0xff] }
 0x4cb   : > { %3358 = vmatmul.mubr.f32.gmra.mxu0 %v3002_v25  ;;  %3641 = vmatprep.subr.mxu0 %v6673_v55  ;;  %v5765_v12 = vpop.f32.mrf.mxu0  ;;  %v5767_v60 = vpop.f32.mrf.mxu1 }
 0x4cc   : > { %4243 = vmatprep.subr.mxu1 %v6673_v55  ;;  %3642 = vmatpush1.msra.mxu0 %v3179_v50  ;;  %v3035_v57 = vmax.f32 %v2239_v27, 0.0  ;;  %v3037_v50 = vmax.f32 %v2448_v58, 0.0 }
 0x4cd   : > { %3543 = vmatmul.mubr.f32.gmra.mxu1 %v3004_v38  ;;  %3362 = vmatprep.mubr.f32.mxu0 %v3011_v22  ;;  %v5770_v20 = vpop.f32.mrf.mxu0  ;;  %v5772_v40 = vpop.f32.mrf.mxu1  ;;  %v2446_v22 = vadd.f32 %v5717_v0, %v5536_v39  ;;  %v3207_v38 = vld [vmem:[#allocation8 + $0x2e8] sm:$0xff] }
 0x4ce   : > { %4275 = vmatpush1.msra.mxu1 %v5763_v21  ;;  %3547 = vmatprep.mubr.f32.mxu1 %v3013_v19  ;;  %v2245_v19 = vadd.f32 %v5749_v16, %v5498_v11  ;;  %v2251_v9 = vadd.f32 %v5770_v20, %v5498_v11  ;;  %v5860_v20 = vld [vmem:[#allocation8 + $0x318] sm:$0xff] }
 0x4cf   : > { %3363 = vmatmul.mubr.f32.gmra.mxu0 %v3010_v31  ;;  %3643 = vmatprep.subr.mxu0 %v6673_v55  ;;  %v5786_v13 = vpop.f32.mrf.mxu0  ;;  %v5788_v28 = vpop.f32.mrf.mxu1  ;;  %v3034_v31 = vmax.f32 %v2237_v18, 0.0 }
 0x4d0   : > { %4244 = vmatprep.subr.mxu1 %v6673_v55  ;;  %3644 = vmatpush1.msra.mxu0 %v3178_v52  ;;  %v2243_v52 = vadd.f32 %v5739_v6, %v5524_v30  ;;  %v3043_v34 = vmax.f32 %v2245_v19, 0.0  ;;  %v3051_v27 = vmax.f32 %v2251_v9, 0.0 }
 0x4d1   : > { %3548 = vmatmul.mubr.f32.gmra.mxu1 %v3012_v63  ;;  %3367 = vmatprep.mubr.f32.mxu0 %v3019_v2  ;;  %v5793_v1 = vpop.f32.mrf.mxu0  ;;  %v5795_v56 = vpop.f32.mrf.mxu1  ;;  %v3036_v2 = vmax.f32 %v2446_v22, 0.0  ;;  %v3206_v63 = vld [vmem:[#allocation8 + $0x2e0] sm:$0xff] }
 0x4d2   : > { %4276 = vmatpush1.msra.mxu1 %v5780_v36  ;;  %3552 = vmatprep.mubr.f32.mxu1 %v3021_v5  ;;  %v3045_v5 = vmax.f32 %v2454_v23, 0.0 }
 0x4d3   : > { %3645 = vmatprep.subr.mxu0 %v6673_v55  ;;  %4245 = vmatprep.subr.mxu1 %v6673_v55 }
 0x4d4   : > { %3368 = vmatmul.mubr.f32.gmra.mxu0 %v3018_v43  ;;  %4277 = vmatpush1.msra.mxu1 %v5791_v37  ;;  %v5809_v26 = vpop.f32.mrf.mxu0  ;;  %v5811_v41 = vpop.f32.mrf.mxu1  ;;  %v2460_v43 = vadd.f32 %v5772_v40, %v5505_v32 }
 0x4d5   : > { %3553 = vmatmul.mubr.f32.gmra.mxu1 %v3020_v24  ;;  %3646 = vmatpush2.msra.mxu0 %v3209_v8  ;;  %v3042_v24 = vmax.f32 %v2243_v52, 0.0  ;;  %v3044_v8 = vmax.f32 %v2452_v15, 0.0 }
 0x4d6   : > { %3647 = vmatprep.subr.mxu0 %v6673_v55  ;;  %4246 = vmatprep.subr.mxu1 %v6673_v55  ;;  %v5817_v3 = vpop.f32.mrf.mxu0  ;;  %v5819_v25 = vpop.f32.mrf.mxu1  ;;  %v3053_v58 = vmax.f32 %v2460_v43, 0.0  ;;  %v3202_v43 = vld [vmem:[#allocation8 + $0x2c0] sm:$0xff] }
 0x4d7   : > { %3372 = vmatprep.mubr.f32.mxu0 %v3027_v54  ;;  %3557 = vmatprep.mubr.f32.mxu1 %v3029_v10  ;;  %v2249_v54 = vadd.f32 %v5765_v12, %v5524_v30  ;;  %v2458_v10 = vadd.f32 %v5767_v60, %v5536_v39  ;;  %v3204_v12 = vld [vmem:[#allocation8 + $0x2d0] sm:$0xff] }
 0x4d8   : > { %3648 = vmatpush2.msra.mxu0 %v3208_v14  ;;  %4278 = vmatpush1.msra.mxu1 %v5813_v46  ;;  %v2257_v14 = vadd.f32 %v5793_v1, %v5498_v11  ;;  %v2255_v1 = vadd.f32 %v5786_v13, %v5524_v30  ;;  %v5896_v13 = vld [vmem:[#allocation8 + $0x308] sm:$0xff] }
 0x4d9   : > { %3373 = vmatmul.mubr.f32.gmra.mxu0 %v3026_v48  ;;  %3558 = vmatmul.mubr.f32.gmra.mxu1 %v3028_v4  ;;  %v5832_v33 = vpop.f32.mrf.mxu0  ;;  %v5834_v0 = vpop.f32.mrf.mxu1  ;;  %v2466_v48 = vadd.f32 %v5795_v56, %v5505_v32  ;;  %v5877_v4 = vld [vmem:[#allocation8 + $0x310] sm:$0xff]  ;;  %v3050_v22 = vmax.f32 %v2249_v54, 0.0  ;;  %v2464_v56 = vadd.f32 %v5788_v28, %v5536_v39 }
 0x4da   : > { %3649 = vmatprep.subr.mxu0 %v6673_v55  ;;  %4247 = vmatprep.subr.mxu1 %v6673_v55  ;;  %v3059_v19 = vmax.f32 %v2257_v14, 0.0  ;;  %v3058_v28 = vmax.f32 %v2255_v1, 0.0  ;;  %v2267_v14 = vadd.f32 %v5832_v33, %v5524_v30 }
 0x4db   : > { %3650 = vmatpush2.msra.mxu0 %v3207_v38  ;;  %4279 = vmatpush1.msra.mxu1 %v5830_v44  ;;  %v5839_v16 = vpop.f32.mrf.mxu0  ;;  %v5841_v17 = vpop.f32.mrf.mxu1  ;;  %v3061_v23 = vmax.f32 %v2466_v48, 0.0  ;;  %v2263_v38 = vadd.f32 %v5817_v3, %v5498_v11  ;;  %v3060_v15 = vmax.f32 %v2464_v56, 0.0  ;;  %v2476_v48 = vadd.f32 %v5834_v0, %v5536_v39  ;;  %v3200_v0 = vld [vmem:[#allocation8 + $0x2b0] sm:$0xff] }
 0x4dc   : > { %3377 = vmatprep.mubr.f32.mxu0 %v3035_v57  ;;  %3562 = vmatprep.mubr.f32.mxu1 %v3037_v50  ;;  %v3052_v57 = vmax.f32 %v2458_v10, 0.0 }
 0x4dd   : > { %3378 = vmatmul.mubr.f32.gmra.mxu0 %v3034_v31  ;;  %3563 = vmatmul.mubr.f32.gmra.mxu1 %v3036_v2  ;;  %v2472_v31 = vadd.f32 %v5819_v25, %v5505_v32  ;;  %v3203_v2 = vld [vmem:[#allocation8 + $0x2c8] sm:$0xff]  ;;  %v2261_v25 = vadd.f32 %v5809_v26, %v5524_v30 }
 0x4de   : > { %3651 = vmatprep.subr.mxu0 %v6673_v55  ;;  %4248 = vmatprep.subr.mxu1 %v6673_v55  ;;  %v5855_v6 = vpop.f32.mrf.mxu0  ;;  %v5857_v7 = vpop.f32.mrf.mxu1 }
 0x4df   : > { %3652 = vmatpush2.msra.mxu0 %v3206_v63  ;;  %4280 = vmatpush1.msra.mxu1 %v5847_v53  ;;  %v3067_v63 = vmax.f32 %v2263_v38, 0.0  ;;  %v3069_v9 = vmax.f32 %v2472_v31, 0.0  ;;  %v3076_v38 = vmax.f32 %v2476_v48, 0.0  ;;  %v2482_v31 = vadd.f32 %v5857_v7, %v5536_v39 }
 0x4e0   : > { %3382 = vmatprep.mubr.f32.mxu0 %v3043_v34  ;;  %3567 = vmatprep.mubr.f32.mxu1 %v3045_v5  ;;  %v5862_v42 = vpop.f32.mrf.mxu0  ;;  %v5864_v40 = vpop.f32.mrf.mxu1  ;;  %v2470_v5 = vadd.f32 %v5811_v41, %v5536_v39  ;;  %v3066_v41 = vmax.f32 %v2261_v25, 0.0 }
 0x4e1   : > { %3653 = vmatprep.subr.mxu0 %v6673_v55  ;;  %4249 = vmatprep.subr.mxu1 %v6673_v55  ;;  %v2484_v1 = vadd.f32 %v5864_v40, %v5505_v32  ;;  %v2273_v40 = vadd.f32 %v5855_v6, %v5524_v30 }
 0x4e2   : > { %3383 = vmatmul.mubr.f32.gmra.mxu0 %v3042_v24  ;;  %3568 = vmatmul.mubr.f32.gmra.mxu1 %v3044_v8  ;;  %v5911_v24 = vld [vmem:[#allocation8 + $0x300] sm:$0xff]  ;;  %v2269_v8 = vadd.f32 %v5839_v16, %v5498_v11  ;;  %v3068_v10 = vmax.f32 %v2470_v5, 0.0  ;;  %v5924_v16 = vld [vmem:[#allocation8 + $0x3f8] sm:$0xff]  ;;  %v3199_v5 = vld [vmem:[#allocation8 + $0x2a8] sm:$0xff] }
 0x4e3   : > { %3654 = vmatpush2.msra.mxu0 %v3205_v49  ;;  %4281 = vmatpush1.msra.mxu1 %v5860_v20  ;;  %v5879_v60 = vpop.f32.mrf.mxu0  ;;  %v2478_v49 = vadd.f32 %v5841_v17, %v5505_v32 }
 0x4e4   : > { %3655 = vmatprep.subr.mxu0 %v6673_v55  ;;  %4250 = vmatprep.subr.mxu1 %v6673_v55  ;;  %v5883_v18 = vpop.f32.mrf.mxu1 }
 0x4e5   : > { %3387 = vmatprep.mubr.f32.mxu0 %v3051_v27  ;;  %3572 = vmatprep.mubr.f32.mxu1 %v3053_v58  ;;  %v5889_v50 = vpop.f32.mrf.mxu0  ;;  %v3201_v27 = vld [vmem:[#allocation8 + $0x2b8] sm:$0xff] }
 0x4e6   : > { %3656 = vmatpush2.msra.mxu0 %v3204_v12  ;;  %4282 = vmatpush1.msra.mxu1 %v5877_v4  ;;  %v5898_v52 = vpop.f32.mrf.mxu1  ;;  %v3075_v12 = vmax.f32 %v2269_v8, 0.0  ;;  %v3084_v8 = vmax.f32 %v2482_v31, 0.0 }
 0x4e7   : > { %3388 = vmatmul.mubr.f32.gmra.mxu0 %v3050_v22  ;;  %3573 = vmatmul.mubr.f32.gmra.mxu1 %v3052_v57  ;;  %v3077_v22 = vmax.f32 %v2478_v49, 0.0  ;;  %v2275_v57 = vadd.f32 %v5862_v42, %v5498_v11  ;;  %v3074_v42 = vmax.f32 %v2267_v14, 0.0  ;;  %v2490_v25 = vadd.f32 %v5898_v52, %v5505_v32  ;;  %v5977_v14 = vld [vmem:[#allocation8 + $0x3e0] sm:$0xff] }
 0x4e8   : > { %3657 = vmatprep.subr.mxu0 %v6673_v55  ;;  %4251 = vmatprep.subr.mxu1 %v6673_v55  ;;  %v2279_v52 = vadd.f32 %v5879_v60, %v5524_v30  ;;  %v2488_v49 = vadd.f32 %v5883_v18, %v5536_v39 }
 0x4e9   : > { %3658 = vmatpush2.msra.mxu0 %v3203_v2  ;;  %4283 = vmatpush1.msra.mxu1 %v5896_v13  ;;  %v5903_v3 = vpop.f32.mrf.mxu0  ;;  %v5905_v34 = vpop.f32.mrf.mxu1  ;;  %v3083_v2 = vmax.f32 %v2275_v57, 0.0 }
 0x4ea   : > { %3392 = vmatprep.mubr.f32.mxu0 %v3059_v19  ;;  %3577 = vmatprep.mubr.f32.mxu1 %v3061_v23  ;;  %v5945_v19 = vld [vmem:[#allocation8 + $0x3f0] sm:$0xff]  ;;  %v2285_v31 = vadd.f32 %v5903_v3, %v5524_v30 }
 0x4eb   : > { %3393 = vmatmul.mubr.f32.gmra.mxu0 %v3058_v28  ;;  %3578 = vmatmul.mubr.f32.gmra.mxu1 %v3060_v15  ;;  %v5917_v54 = vpop.f32.mrf.mxu0  ;;  %v5919_v26 = vpop.f32.mrf.mxu1  ;;  %v3085_v28 = vmax.f32 %v2484_v1, 0.0  ;;  %v2281_v15 = vadd.f32 %v5889_v50, %v5498_v11  ;;  %v3082_v50 = vmax.f32 %v2273_v40, 0.0  ;;  %v2068_v1 = vsub.s32 5, %v4902_v45 }
 0x4ec   : > { %3659 = vmatprep.subr.mxu0 %v6673_v55  ;;  %4252 = vmatprep.subr.mxu1 %v6673_v55  ;;  %v2496_v60 = vadd.f32 %v5919_v26, %v5505_v32 }
 0x4ed   : > { %3660 = vmatpush2.msra.mxu0 %v3202_v43  ;;  %4284 = vmatpush1.msra.mxu1 %v5911_v24 }
 0x4ee   : > { %3397 = vmatprep.mubr.f32.mxu0 %v3067_v63  ;;  %3582 = vmatprep.mubr.f32.mxu1 %v3069_v9  ;;  %v5926_v58 = vpop.f32.mrf.mxu0  ;;  %v5928_v17 = vpop.f32.mrf.mxu1  ;;  %v5960_v63 = vld [vmem:[#allocation8 + $0x3e8] sm:$0xff] }
 0x4ef   : > { %3661 = vmatprep.subr.mxu0 %v6673_v55  ;;  %4253 = vmatprep.subr.mxu1 %v6673_v55 }
 0x4f0   : > { %3398 = vmatmul.mubr.f32.gmra.mxu0 %v3066_v41  ;;  %3583 = vmatmul.mubr.f32.gmra.mxu1 %v3068_v10  ;;  %v5940_v56 = vpop.f32.mrf.mxu0  ;;  %v5942_v33 = vpop.f32.mrf.mxu1  ;;  %v3091_v41 = vmax.f32 %v2281_v15, 0.0  ;;  %v3093_v10 = vmax.f32 %v2490_v25, 0.0  ;;  %v3101_v15 = vmax.f32 %v2496_v60, 0.0  ;;  %v3195_v60 = vld [vmem:[#allocation8 + $0x288] sm:$0xff] }
 0x4f1   : > { %3662 = vmatpush2.msra.mxu0 %v3201_v27  ;;  %4285 = vmatpush2.msra.mxu1 %v5924_v16  ;;  %v3198_v27 = vld [vmem:[#allocation8 + $0x2a0] sm:$0xff]  ;;  %v2293_v25 = vadd.f32 %v5940_v56, %v5498_v11  ;;  %v2502_v3 = vadd.f32 %v5942_v33, %v5505_v32  ;;  %v2291_v32 = vadd.f32 %v5926_v58, %v5524_v30 }
 0x4f2   : > { %3663 = vmatprep.subr.mxu0 %v6673_v55  ;;  %4254 = vmatprep.subr.mxu1 %v6673_v55  ;;  %v5949_v23 = vpop.f32.mrf.mxu0  ;;  %v2500_v33 = vadd.f32 %v5928_v17, %v5536_v39 }
 0x4f3   : > { %3402 = vmatprep.mubr.f32.mxu0 %v3075_v12  ;;  %3587 = vmatprep.mubr.f32.mxu1 %v3077_v22  ;;  %v2287_v22 = vadd.f32 %v5917_v54, %v5498_v11  ;;  %v3197_v54 = vld [vmem:[#allocation8 + $0x298] sm:$0xff] }
 0x4f4   : > { %3664 = vmatpush2.msra.mxu0 %v3200_v0  ;;  %4286 = vmatpush2.msra.mxu1 %v5945_v19  ;;  %v5962_v6 = vpop.f32.mrf.mxu1  ;;  %v5964_v9 = vpop.f32.mrf.mxu0  ;;  %v3090_v0 = vmax.f32 %v2279_v52, 0.0  ;;  %v2064_v52 = vsub.s32 4, %v4902_v45 }
 0x4f5   : > { %6695 = vst [vmem:[#allocation16_spill] sm:$0xff] %v5962_v6  ;;  %3403 = vmatmul.mubr.f32.gmra.mxu0 %v3074_v42  ;;  %3588 = vmatmul.mubr.f32.gmra.mxu1 %v3076_v38  ;;  %v3092_v42 = vmax.f32 %v2488_v49, 0.0  ;;  %v5995_v38 = vld [vmem:[#allocation8 + $0x3d8] sm:$0xff]  ;;  %v6020_v49 = vrot.slane %v5487_v47, %v2068_v1 }
 0x4f6   : > { %3665 = vmatprep.subr.mxu0 %v6673_v55  ;;  %4255 = vmatprep.subr.mxu1 %v6673_v55  ;;  %v5968_v7 = vpop.f32.mrf.mxu1  ;;  %v5970_v43 = vpop.f32.mrf.mxu0 }
 0x4f7   : > { %6696 = vst [vmem:[#allocation17_spill] sm:$0xff] %v5968_v7  ;;  %3666 = vmatpush2.msra.mxu0 %v3199_v5  ;;  %4287 = vmatpush2.msra.mxu1 %v5960_v63  ;;  %v2573_v30 = vadd.f32 %v5964_v9, %v6020_v49 }
 0x4f8   : > { %3407 = vmatprep.mubr.f32.mxu0 %v3083_v2  ;;  %3592 = vmatprep.mubr.f32.mxu1 %v3085_v28  ;;  %v5979_v48 = vpop.f32.mrf.mxu1  ;;  %v5981_v12 = vpop.f32.mrf.mxu0  ;;  %v2494_v2 = vadd.f32 %v5905_v34, %v5536_v39  ;;  %v3099_v28 = vmax.f32 %v2287_v22, 0.0  ;;  %v3196_v34 = vld [vmem:[#allocation8 + $0x290] sm:$0xff]  ;;  %v6033_v22 = vld [vmem:[#allocation8 + $0x3c8] sm:$0xff]  ;;  %v6046_v39 = vld [vmem:[#allocation8 + $0x3c0] sm:$0xff] }
 0x4f9   : > { %6697 = vst [vmem:[#allocation18_spill] sm:$0xff] %v5979_v48  ;;  %3408 = vmatmul.mubr.f32.gmra.mxu0 %v3082_v50  ;;  %3593 = vmatmul.mubr.f32.gmra.mxu1 %v3084_v8  ;;  %v6016_v8 = vld [vmem:[#allocation8 + $0x3d0] sm:$0xff] }
 0x4fa   : > { %3667 = vmatprep.subr.mxu0 %v6673_v55  ;;  %4256 = vmatprep.subr.mxu1 %v6673_v55  ;;  %v5989_v18 = vpop.f32.mrf.mxu1  ;;  %v5991_v57 = vpop.f32.mrf.mxu0 }
 0x4fb   : > { %6698 = vst [vmem:[#allocation19_spill] sm:$0xff] %v5989_v18  ;;  %3668 = vmatpush2.msra.mxu0 %v3198_v27  ;;  %4288 = vmatpush2.msra.mxu1 %v5977_v14  ;;  %v3107_v27 = vmax.f32 %v2293_v25, 0.0  ;;  %v2927_v25 = vmax.f32 %v2573_v30, 0.0  ;;  %v6703_v18 = vmov 0.0  }
 0x4fc   : > { %3412 = vmatprep.mubr.f32.mxu0 %v3091_v41  ;;  %3597 = vmatprep.mubr.f32.mxu1 %v3093_v10  ;;  %v5997_v26 = vpop.f32.mrf.mxu1  ;;  %v5999_v40 = vpop.f32.mrf.mxu0  ;;  %v3098_v41 = vmax.f32 %v2285_v31, 0.0  ;;  %v3100_v10 = vmax.f32 %v2494_v2, 0.0  ;;  %v3106_v31 = vmax.f32 %v2291_v32, 0.0  ;;  %v3108_v2 = vmax.f32 %v2500_v33, 0.0 }
 0x4fd   : > { %6699 = vst [vmem:[#allocation20_spill] sm:$0xff] %v5997_v26  ;;  %3669 = vmatprep.subr.mxu0 %v6673_v55  ;;  %4257 = vmatprep.subr.mxu1 %v6673_v55 }
 0x4fe   : > { %3413 = vmatmul.mubr.f32.gmra.mxu0 %v3090_v0  ;;  %3598 = vmatmul.mubr.f32.gmra.mxu1 %v3092_v42  ;;  %v6009_v5 = vpop.f32.mrf.mxu1  ;;  %v6011_v50 = vpop.f32.mrf.mxu0  ;;  %v3109_v42 = vmax.f32 %v2502_v3, 0.0  ;;  %v3194_v3 = vld [vmem:[#allocation8 + $0x280] sm:$0xff] }
 0x4ff   : > { %6700 = vst [vmem:[#allocation21_spill] sm:$0xff] %v6009_v5  ;;  %3670 = vmatpush2.msra.mxu0 %v3197_v54  ;;  %4289 = vmatpush2.msra.mxu1 %v5995_v38  ;;  %v6040_v54 = vrot.slane %v5487_v47, %v2064_v52  ;;  %v2579_v52 = vadd.f32 %v5981_v12, %v6020_v49  ;;  %v6110_v5 = vld [vmem:[#allocation8 + $0x398] sm:$0xff] }
 0x500   : > { %3671 = vmatprep.subr.mxu0 %v6673_v55  ;;  %4258 = vmatprep.subr.mxu1 %v6673_v55  ;;  %v6024_v11 = vpop.f32.mrf.mxu1  ;;  %v6026_v56 = vpop.f32.mrf.mxu0  ;;  %6701 = vst [vmem:[#allocation22_spill] sm:$0xff] %v6110_v5 }
 0x501   : > { %3417 = vmatprep.mubr.f32.mxu0 %v3099_v28  ;;  %3602 = vmatprep.mubr.f32.mxu1 %v3101_v15  ;;  %v2571_v15 = vadd.f32 %v5949_v23, %v6040_v54  ;;  %v6071_v23 = vld [vmem:[#allocation8 + $0x3b0] sm:$0xff]  ;;  %v2577_v12 = vadd.f32 %v5970_v43, %v6040_v54  ;;  %v2935_v30 = vmax.f32 %v2579_v52, 0.0  ;;  %v6095_v43 = vld [vmem:[#allocation8 + $0x3a0] sm:$0xff]  ;;  %v2072_v52 = vsub.s32 6, %v4902_v45 }
 0x502   : > { %3672 = vmatpush2.msra.mxu0 %v3196_v34  ;;  %4290 = vmatpush2.msra.mxu1 %v6016_v8  ;;  %v6035_v1 = vpop.f32.mrf.mxu1  ;;  %v6037_v0 = vpop.f32.mrf.mxu0  ;;  %v6061_v34 = vld [vmem:[#allocation8 + $0x3b8] sm:$0xff]  ;;  %v2583_v26 = vadd.f32 %v5991_v57, %v6040_v54 }
 0x503   : > { %3418 = vmatmul.mubr.f32.gmra.mxu0 %v3098_v41  ;;  %3603 = vmatmul.mubr.f32.gmra.mxu1 %v3100_v10 }
 0x504   : > { %4259 = vmatprep.subr.mxu1 %v6673_v55  ;;  %3673 = vmatprep.subr.mxu0 %v6673_v55  ;;  %v6048_v58 = vpop.f32.mrf.mxu1  ;;  %v6050_v17 = vpop.f32.mrf.mxu0 }
 0x505   : > { %4291 = vmatpush2.msra.mxu1 %v6033_v22  ;;  %3674 = vmatpush2.msra.mxu0 %v3195_v60  ;;  %v6081_v60 = vld [vmem:[#allocation8 + $0x3a8] sm:$0xff]  ;;  %v2597_v6 = vadd.f32 %v6050_v17, %v6020_v49 }
 0x506   : > { %4260 = vmatprep.subr.mxu1 %v6673_v55  ;;  %3422 = vmatprep.mubr.f32.mxu0 %v3107_v27  ;;  %v6054_v28 = vpop.f32.mrf.mxu1  ;;  %v6056_v9 = vpop.f32.mrf.mxu0  ;;  %v2926_v27 = vmax.f32 %v2571_v15, 0.0 }
 0x507   : > { %3607 = vmatprep.mubr.f32.mxu1 %v3109_v42  ;;  %4292 = vmatpush2.msra.mxu1 %v6046_v39  ;;  %v2076_v42 = vsub.s32 7, %v4902_v45  ;;  %v2591_v45 = vadd.f32 %v6026_v56, %v6020_v49  ;;  %v6130_v56 = vrot.slane %v5487_v47, %v2072_v52  ;;  %v6152_v52 = vld [vmem:[#allocation8 + $0x380] sm:$0xff] }
 0x508   : > { %3423 = vmatmul.mubr.f32.gmra.mxu0 %v3106_v31  ;;  %3608 = vmatmul.mubr.f32.gmra.mxu1 %v3108_v2  ;;  %v6065_v41 = vpop.f32.mrf.mxu1  ;;  %v6067_v10 = vpop.f32.mrf.mxu0  ;;  %v2585_v31 = vadd.f32 %v5999_v40, %v6020_v49  ;;  %v2934_v40 = vmax.f32 %v2577_v12, 0.0 }
 0x509   : > { %3675 = vmatprep.subr.mxu0 %v6673_v55  ;;  %4261 = vmatprep.subr.mxu1 %v6673_v55 }
 0x50a   : > { %3676 = vmatpush2.msra.mxu0 %v3194_v3  ;;  %4293 = vmatpush2.msra.mxu1 %v6061_v34  ;;  %v6074_v32 = vpop.f32.mrf.mxu1  ;;  %v6076_v33 = vpop.f32.mrf.mxu0 }
 0x50b   : > { %4262 = vmatprep.subr.mxu1 %v6673_v55  ;;  %3677 = vmatprep.mubr.f32.mxu0 %v2927_v25 }
 0x50c   : > { %3798 = vmatprep.subr.mxu0 %v6673_v55  ;;  %4294 = vmatpush2.msra.mxu1 %v6071_v23  ;;  %v6088_v2 = vpop.f32.mrf.mxu1  ;;  %v6090_v15 = vpop.f32.mrf.mxu0 }
 0x50d   : > { %3678 = vmatmul.mubr.f32.vlgmr.msra.gmra.mxu0 %v2926_v27  ;;  %4263 = vmatprep.subr.mxu1 %v6673_v55  ;;  %v2943_v27 = vmax.f32 %v2585_v31, 0.0  ;;  %v2942_v31 = vmax.f32 %v2583_v26, 0.0  ;;  %v2798_v26 = vadd.f32 %v6024_v11, %v6130_v56  ;;  %v2595_v11 = vadd.f32 %v6037_v0, %v6040_v54 }
 0x50e   : > { %3799 = vmatpush1.msra.mxu0 %v5645_v59  ;;  %4295 = vmatpush2.msra.mxu1 %v6081_v60  ;;  %v6097_v25 = vpop.f32.mrf.mxu1  ;;  %v6099_v3 = vpop.f32.mrf.mxu0  ;;  %v6107_v59 = vrot.slane %v5487_v47, %v2076_v42 }
 0x50f   : > { %3800 = vmatprep.subr.mxu0 %v6673_v55  ;;  %4264 = vmatprep.subr.mxu1 %v6673_v55  ;;  %v2952_v0 = vmax.f32 %v2798_v26, 0.0  ;;  %v2609_v26 = vadd.f32 %v6090_v15, %v6020_v49 }
 0x510   : > { %3682 = vmatprep.mubr.f32.mxu0 %v2935_v30  ;;  %3801 = vmatpush1.msra.mxu0 %v5666_v62  ;;  %v6114_v12 = vpop.f32.mrf.mxu1  ;;  %v6116_v48 = vpop.f32.mrf.mxu0  ;;  %v2800_v57 = vadd.f32 %v6035_v1, %v6107_v59  ;;  %v6123_v62 = vld [vmem:[#allocation8 + $0x390] sm:$0xff]  ;;  %v6137_v1 = vld [vmem:[#allocation8 + $0x388] sm:$0xff] }
 0x511   : > { %4296 = vmatpush2.msra.mxu1 %v6095_v43  ;;  %3683 = vmatmul.mubr.f32.gmra.mxu0 %v2934_v40  ;;  %6702 = vst [vmem:[#allocation23_spill] sm:$0xff] %v6123_v62  ;;  %v2589_v40 = vadd.f32 %v6011_v50, %v6040_v54  ;;  %6704 = vst [vmem:[#allocation24_spill] sm:$0xff] %v6137_v1 }
 0x512   : > { %4265 = vmatprep.subr.mxu1 %v6673_v55  ;;  %3802 = vmatprep.subr.mxu0 %v6673_v55  ;;  %v6125_v42 = vpop.f32.mrf.mxu1  ;;  %v6127_v30 = vpop.f32.mrf.mxu0  ;;  %v2951_v55 = vmax.f32 %v2591_v45, 0.0  ;;  %v2953_v50 = vmax.f32 %v2800_v57, 0.0  ;;  %v2603_v57 = vadd.f32 %v6067_v10, %v6020_v49  ;;  %v2958_v10 = vmax.f32 %v2595_v11, 0.0 }
 0x513   : > { %4297 = vmatpush2.msra.mxu1 %v6110_v5  ;;  %3803 = vmatpush1.msra.mxu0 %v5687_v51  ;;  %v2806_v51 = vadd.f32 %v6054_v28, %v6107_v59  ;;  %v2950_v45 = vmax.f32 %v2589_v40, 0.0  ;;  %v2959_v28 = vmax.f32 %v2597_v6, 0.0 }
 0x514   : > { %4266 = vmatprep.subr.mxu1 %v6703_v18  ;;  %3687 = vmatprep.mubr.f32.mxu0 %v2943_v27  ;;  %v6141_v7 = vpop.f32.mrf.mxu1  ;;  %v6143_v47 = vpop.f32.mrf.mxu0  ;;  %v2967_v40 = vmax.f32 %v2603_v57, 0.0 }
 0x515   : > { %4298 = vmatpush2.msra.mxu1 %v6123_v62  ;;  %3688 = vmatmul.mubr.f32.gmra.mxu0 %v2942_v31  ;;  %v2812_v31 = vadd.f32 %v6074_v32, %v6107_v59  ;;  %v2601_v32 = vadd.f32 %v6056_v9, %v6040_v54  ;;  %v2818_v9 = vadd.f32 %v6097_v25, %v6107_v59 }
 0x516   : > { %3804 = vmatprep.subr.mxu0 %v6703_v18  ;;  %4267 = vmatprep.subr.mxu1 %v6703_v18  ;;  %v6154_v17 = vpop.f32.mrf.mxu1  ;;  %v6156_v27 = vpop.f32.mrf.mxu0  ;;  %v2824_v25 = vadd.f32 %v6125_v42, %v6107_v59 }
 0x517   : > { %3805 = vmatpush1.msra.mxu0 %v5704_v35  ;;  %4299 = vmatpush2.msra.mxu1 %v6137_v1  ;;  %v2804_v35 = vadd.f32 %v6048_v58, %v6130_v56  ;;  %v2961_v1 = vmax.f32 %v2806_v51, 0.0  ;;  %v2969_v58 = vmax.f32 %v2812_v31, 0.0 }
 0x518   : > { %4268 = vmatprep.subr.mxu1 %v6703_v18  ;;  %3692 = vmatprep.mubr.f32.mxu0 %v2951_v55  ;;  %v6167_v62 = vpop.f32.mrf.mxu1  ;;  %v6169_v5 = vpop.f32.mrf.mxu0 }
 0x519   : > { %3806 = vmatprep.subr.mxu0 %v6703_v18  ;;  %4300 = vmatpush2.msra.mxu1 %v6152_v52 }
 0x51a   : > { %3877 = vmatprep.mubr.f32.mxu1 %v2953_v50  ;;  %3693 = vmatmul.mubr.f32.gmra.mxu0 %v2950_v45  ;;  %v6175_v55 = vpop.f32.mrf.mxu1  ;;  %v6177_v6 = vpop.f32.mrf.mxu0  ;;  %v2960_v45 = vmax.f32 %v2804_v35, 0.0  ;;  %v2977_v35 = vmax.f32 %v2818_v9, 0.0 }
 0x51b   : > { %3807 = vmatpush1.msra.mxu0 %v5725_v29  ;;  %3878 = vmatmul.mubr.f32.vlgmr.msra.gmra.mxu1 %v2952_v0  ;;  %v2810_v29 = vadd.f32 %v6065_v41, %v6130_v56  ;;  %v2966_v41 = vmax.f32 %v2601_v32, 0.0 }
 0x51c   : > { %3808 = vmatprep.subr.mxu0 %v6703_v18  ;;  %3697 = vmatprep.mubr.f32.mxu0 %v2959_v28  ;;  %v6185_v51 = vpop.f32.mrf.mxu1  ;;  %v6187_v50 = vpop.f32.mrf.mxu0  ;;  %v2615_v28 = vadd.f32 %v6116_v48, %v6020_v49 }
 0x51d   : > { %3809 = vmatpush1.msra.mxu0 %v5746_v61  ;;  %3882 = vmatprep.mubr.f32.mxu1 %v2961_v1  ;;  %v2607_v61 = vadd.f32 %v6076_v33, %v6040_v54  ;;  %v2975_v1 = vmax.f32 %v2609_v26, 0.0  ;;  %v2968_v0 = vmax.f32 %v2810_v29, 0.0 }
 0x51e   : > { %3698 = vmatmul.mubr.f32.gmra.mxu0 %v2958_v10  ;;  %3810 = vmatprep.subr.mxu0 %v6703_v18  ;;  %v6195_v11 = vpop.f32.mrf.mxu1  ;;  %v6197_v15 = vpop.f32.mrf.mxu0  ;;  %v2613_v10 = vadd.f32 %v6099_v3, %v6040_v54  ;;  %v2983_v42 = vmax.f32 %v2615_v28, 0.0 }
 0x51f   : > { %3883 = vmatmul.mubr.f32.gmra.mxu1 %v2960_v45  ;;  %3811 = vmatpush1.msra.mxu0 %v5763_v21  ;;  %v2816_v21 = vadd.f32 %v6088_v2, %v6130_v56  ;;  %v2974_v32 = vmax.f32 %v2607_v61, 0.0  ;;  %v2621_v2 = vadd.f32 %v6143_v47, %v6020_v49 }
 0x520   : > { %3702 = vmatprep.mubr.f32.mxu0 %v2967_v40  ;;  %3887 = vmatprep.mubr.f32.mxu1 %v2969_v58  ;;  %v6206_v57 = vpop.f32.mrf.mxu1  ;;  %v6208_v31 = vpop.f32.mrf.mxu0  ;;  %v2985_v40 = vmax.f32 %v2824_v25, 0.0  ;;  %v2830_v58 = vadd.f32 %v6154_v17, %v6107_v59  ;;  %v2982_v9 = vmax.f32 %v2613_v10, 0.0  ;;  %v2619_v17 = vadd.f32 %v6127_v30, %v6040_v54 }
 0x521   : > { %3812 = vmatprep.subr.mxu0 %v6703_v18  ;;  %v2976_v3 = vmax.f32 %v2816_v21, 0.0  ;;  %v2991_v28 = vmax.f32 %v2621_v2, 0.0  ;;  %v2828_v25 = vadd.f32 %v6141_v7, %v6130_v56  ;;  %v2836_v30 = vadd.f32 %v6175_v55, %v6107_v59 }
 0x522   : > { %3703 = vmatmul.mubr.f32.gmra.mxu0 %v2966_v41  ;;  %v6213_v48 = vpop.f32.mrf.mxu1  ;;  %v6215_v33 = vpop.f32.mrf.mxu0  ;;  %v2993_v41 = vmax.f32 %v2830_v58, 0.0  ;;  %v2990_v21 = vmax.f32 %v2619_v17, 0.0  ;;  %v2625_v7 = vadd.f32 %v6156_v27, %v6040_v54  ;;  %v2842_v55 = vadd.f32 %v6195_v11, %v6107_v59 }
 0x523   : > { %3888 = vmatmul.mubr.f32.gmra.mxu1 %v2968_v0  ;;  %3813 = vmatpush1.msra.mxu0 %v5780_v36  ;;  %v2822_v36 = vadd.f32 %v6114_v12, %v6130_v56  ;;  %v2631_v2 = vadd.f32 %v6177_v6, %v6040_v54 }
 0x524   : > { %3707 = vmatprep.mubr.f32.mxu0 %v2975_v1  ;;  %3814 = vmatprep.subr.mxu0 %v6703_v18  ;;  %v6225_v26 = vpop.f32.mrf.mxu1  ;;  %v6227_v45 = vpop.f32.mrf.mxu0  ;;  %v2998_v58 = vmax.f32 %v2625_v7, 0.0 }
 0x525   : > { %3892 = vmatprep.mubr.f32.mxu1 %v2977_v35  ;;  %3815 = vmatpush1.msra.mxu0 %v5791_v37  ;;  %v2627_v37 = vadd.f32 %v6169_v5, %v6020_v49  ;;  %v2984_v1 = vmax.f32 %v2822_v36, 0.0  ;;  %v2633_v5 = vadd.f32 %v6187_v50, %v6020_v49  ;;  %v2848_v36 = vadd.f32 %v6213_v48, %v6107_v59 }
 0x526   : > { %3708 = vmatmul.mubr.f32.gmra.mxu0 %v2974_v32  ;;  %3816 = vmatprep.subr.mxu0 %v6703_v18  ;;  %v6233_v29 = vpop.f32.mrf.mxu1  ;;  %v6235_v47 = vpop.f32.mrf.mxu0  ;;  %v2992_v32 = vmax.f32 %v2828_v25, 0.0  ;;  %v2637_v48 = vadd.f32 %v6197_v15, %v6040_v54 }
 0x527   : > { %3893 = vmatmul.mubr.f32.gmra.mxu1 %v2976_v3  ;;  %3712 = vmatprep.mubr.f32.mxu0 %v2983_v42  ;;  %v2999_v35 = vmax.f32 %v2627_v37, 0.0  ;;  %v3007_v11 = vmax.f32 %v2633_v5, 0.0  ;;  %v3009_v3 = vmax.f32 %v2842_v55, 0.0  ;;  %v2846_v5 = vadd.f32 %v6206_v57, %v6130_v56 }
 0x528   : > { %3817 = vmatpush1.msra.mxu0 %v5813_v46  ;;  %3897 = vmatprep.mubr.f32.mxu1 %v2985_v40  ;;  %v6242_v12 = vpop.f32.mrf.mxu1  ;;  %v6244_v61 = vpop.f32.mrf.mxu0  ;;  %v3001_v40 = vmax.f32 %v2836_v30, 0.0  ;;  %v2854_v15 = vadd.f32 %v6233_v29, %v6107_v59  ;;  %v3014_v7 = vmax.f32 %v2637_v48, 0.0  ;;  %v2643_v57 = vadd.f32 %v6215_v33, %v6040_v54 }
 0x529   : > { %3818 = vmatprep.subr.mxu0 %v6703_v18  ;;  %v2649_v33 = vadd.f32 %v6235_v47, %v6040_v54 }
 0x52a   : > { %3713 = vmatmul.mubr.f32.gmra.mxu0 %v2982_v9  ;;  %v6251_v0 = vpop.f32.mrf.mxu1  ;;  %v6253_v46 = vpop.f32.mrf.mxu0 }
 0x52b   : > { %3898 = vmatmul.mubr.f32.gmra.mxu1 %v2984_v1  ;;  %3819 = vmatpush1.msra.mxu0 %v5830_v44  ;;  %v2834_v44 = vadd.f32 %v6167_v62, %v6130_v56  ;;  %v2639_v62 = vadd.f32 %v6208_v31, %v6020_v49  ;;  %v3017_v1 = vmax.f32 %v2848_v36, 0.0  ;;  %v2860_v29 = vadd.f32 %v6251_v0, %v6107_v59 }
 0x52c   : > { %3717 = vmatprep.mubr.f32.mxu0 %v2991_v28  ;;  %3902 = vmatprep.mubr.f32.mxu1 %v2993_v41  ;;  %v6262_v10 = vpop.f32.mrf.mxu1  ;;  %v6264_v42 = vpop.f32.mrf.mxu0  ;;  %v3006_v41 = vmax.f32 %v2631_v2, 0.0  ;;  %v3022_v2 = vmax.f32 %v2643_v57, 0.0  ;;  %v3030_v36 = vmax.f32 %v2649_v33, 0.0 }
 0x52d   : > { %3820 = vmatprep.subr.mxu0 %v6703_v18  ;;  %v3000_v6 = vmax.f32 %v2834_v44, 0.0  ;;  %v3015_v37 = vmax.f32 %v2639_v62, 0.0  ;;  %v3025_v44 = vmax.f32 %v2854_v15, 0.0  ;;  %v2858_v62 = vadd.f32 %v6242_v12, %v6130_v56 }
 0x52e   : > { %3718 = vmatmul.mubr.f32.gmra.mxu0 %v2990_v21  ;;  %v6269_v50 = vpop.f32.mrf.mxu1  ;;  %v6271_v27 = vpop.f32.mrf.mxu0  ;;  %v2864_v48 = vadd.f32 %v6262_v10, %v6130_v56 }
 0x52f   : > { %3903 = vmatmul.mubr.f32.gmra.mxu1 %v2992_v32  ;;  %3821 = vmatpush1.msra.mxu0 %v5847_v53  ;;  %v2840_v53 = vadd.f32 %v6185_v51, %v6130_v56  ;;  %v3016_v32 = vmax.f32 %v2846_v5, 0.0  ;;  %v2661_v10 = vadd.f32 %v6271_v27, %v6040_v54 }
 0x530   : > { %3722 = vmatprep.mubr.f32.mxu0 %v2999_v35  ;;  %3822 = vmatprep.subr.mxu0 %v6703_v18  ;;  %v6281_v9 = vpop.f32.mrf.mxu1  ;;  %v6283_v17 = vpop.f32.mrf.mxu0  ;;  %v3040_v5 = vmax.f32 %v2864_v48, 0.0 }
 0x531   : > { %3907 = vmatprep.mubr.f32.mxu1 %v3001_v40  ;;  %3823 = vmatpush1.msra.mxu0 %v5860_v20  ;;  %v2645_v20 = vadd.f32 %v6227_v45, %v6020_v49  ;;  %v3008_v30 = vmax.f32 %v2840_v53, 0.0  ;;  %v2870_v15 = vadd.f32 %v6281_v9, %v6130_v56  ;;  %v3046_v57 = vmax.f32 %v2661_v10, 0.0 }
 0x532   : > { %3723 = vmatmul.mubr.f32.gmra.mxu0 %v2998_v58  ;;  %3824 = vmatprep.subr.mxu0 %v6703_v18  ;;  %v6289_v28 = vpop.f32.mrf.mxu1  ;;  %v6291_v31 = vpop.f32.mrf.mxu0  ;;  %v2866_v58 = vadd.f32 %v6269_v50, %v6107_v59  ;;  %v2655_v50 = vadd.f32 %v6253_v46, %v6040_v54 }
 0x533   : > { %3908 = vmatmul.mubr.f32.gmra.mxu1 %v3000_v6  ;;  %3727 = vmatprep.mubr.f32.mxu0 %v3007_v11  ;;  %v3023_v35 = vmax.f32 %v2645_v20, 0.0  ;;  %v3033_v11 = vmax.f32 %v2860_v29, 0.0 }
 0x534   : > { %3825 = vmatpush1.msra.mxu0 %v5877_v4  ;;  %3912 = vmatprep.mubr.f32.mxu1 %v3009_v3  ;;  %v6298_v51 = vpop.f32.mrf.mxu1  ;;  %v2668_v25 = vpop.f32.mrf.mxu0  ;;  %v2651_v4 = vadd.f32 %v6244_v61, %v6020_v49  ;;  %v3041_v12 = vmax.f32 %v2866_v58, 0.0  ;;  %v3038_v20 = vmax.f32 %v2655_v50, 0.0 }
 0x535   : > { %3826 = vmatprep.subr.mxu0 %v6703_v18 }
 0x536   : > { %3728 = vmatmul.mubr.f32.gmra.mxu0 %v3006_v41  ;;  %v6305_v21 = vpop.f32.mrf.mxu1  ;;  %v3031_v0 = vmax.f32 %v2651_v4, 0.0  ;;  %v3032_v41 = vmax.f32 %v2858_v62, 0.0  ;;  %v2667_v4 = vadd.f32 %v6291_v31, %v6040_v54  ;;  %v3048_v31 = vmax.f32 %v2870_v15, 0.0 }
 0x537   : > { %3913 = vmatmul.mubr.f32.gmra.mxu1 %v3008_v30  ;;  %3827 = vmatpush1.msra.mxu0 %v5896_v13  ;;  %v6310_v45 = vpop.f32.mrf.mxu0  ;;  %v2852_v13 = vadd.f32 %v6225_v26, %v6130_v56  ;;  %v2657_v26 = vadd.f32 %v6264_v42, %v6020_v49 }
 0x538   : > { %3732 = vmatprep.mubr.f32.mxu0 %v3015_v37  ;;  %3917 = vmatprep.mubr.f32.mxu1 %v3017_v1  ;;  %v6316_v55 = vpop.f32.mrf.mxu1  ;;  %v2872_v37 = vadd.f32 %v6289_v28, %v6107_v59  ;;  %v2878_v28 = vadd.f32 %v6305_v21, %v6107_v59 }
 0x539   : > { %3828 = vmatprep.subr.mxu0 %v6703_v18  ;;  %v6321_v61 = vpop.f32.mrf.mxu0  ;;  %v3024_v3 = vmax.f32 %v2852_v13, 0.0  ;;  %v3039_v53 = vmax.f32 %v2657_v26, 0.0 }
 0x53a   : > { %3733 = vmatmul.mubr.f32.gmra.mxu0 %v3014_v7  ;;  %v6323_v40 = vpop.f32.mrf.mxu1  ;;  %v3057_v21 = vmax.f32 %v2878_v28, 0.0  ;;  %v2675_v9 = vadd.f32 %v6321_v61, %v6020_v49  ;;  %v2673_v61 = vadd.f32 %v6310_v45, %v6040_v54 }
 0x53b   : > { %3918 = vmatmul.mubr.f32.gmra.mxu1 %v3016_v32  ;;  %3829 = vmatpush1.msra.mxu0 %v5911_v24 }
 0x53c   : > { %3737 = vmatprep.mubr.f32.mxu0 %v3023_v35  ;;  %3830 = vmatprep.subr.mxu0 %v6703_v18  ;;  %v2884_v35 = vadd.f32 %v6323_v40, %v6107_v59  ;;  %v3063_v40 = vmax.f32 %v2675_v9, 0.0 }
 0x53d   : > { %3922 = vmatprep.mubr.f32.mxu1 %v3025_v44  ;;  %3831 = vmatpush2.msra.mxu0 %v5924_v16  ;;  %v6336_v24 = vpop.f32.mrf.mxu0  ;;  %v6338_v47 = vpop.f32.mrf.mxu1  ;;  %v2663_v16 = vadd.f32 %v6283_v17, %v6020_v49  ;;  %v3054_v44 = vmax.f32 %v2667_v4, 0.0 }
 0x53e   : > { %3738 = vmatmul.mubr.f32.gmra.mxu0 %v3022_v2  ;;  %3832 = vmatprep.subr.mxu0 %v6703_v18  ;;  %v3065_v33 = vmax.f32 %v2884_v35, 0.0  ;;  %v2679_v62 = vadd.f32 %v6336_v24, %v6040_v54 }
 0x53f   : > { %3923 = vmatmul.mubr.f32.gmra.mxu1 %v3024_v3  ;;  %3742 = vmatprep.mubr.f32.mxu0 %v3031_v0  ;;  %v2680_v42 = vpop.f32.mrf.mxu0  ;;  %v2889_v6 = vpop.f32.mrf.mxu1  ;;  %v3047_v30 = vmax.f32 %v2663_v16, 0.0  ;;  %v3062_v3 = vmax.f32 %v2673_v61, 0.0  ;;  %v6428_v61 = vld [vmem:[#allocation10 + $0x5] ss:$0 sm:$0xff] }
 0x540   : > { %3833 = vmatpush2.msra.mxu0 %v5945_v19  ;;  %3927 = vmatprep.mubr.f32.mxu1 %v3033_v11  ;;  %v2669_v19 = vadd.f32 %v2668_v25, %v6020_v49  ;;  %v2890_v2 = vadd.f32 %v2889_v6, %v6107_v59  ;;  %v2888_v6 = vadd.f32 %v6338_v47, %v6130_v56  ;;  %v3070_v16 = vmax.f32 %v2679_v62, 0.0  ;;  %v6707_v62 = vld [vmem:[#allocation17_spill] sm:$0xff] }
 0x541   : > { %3834 = vmatprep.subr.mxu0 %v6703_v18  ;;  %v6351_v1 = vpop.f32.mrf.mxu0 }
 0x542   : > { %3743 = vmatmul.mubr.f32.gmra.mxu0 %v3030_v36  ;;  %v3055_v27 = vmax.f32 %v2669_v19, 0.0  ;;  %v3073_v50 = vmax.f32 %v2890_v2, 0.0 }
 0x543   : > { %3928 = vmatmul.mubr.f32.gmra.mxu1 %v3032_v41  ;;  %3835 = vmatpush2.msra.mxu0 %v5960_v63  ;;  %v6355_v46 = vpop.f32.mrf.mxu1  ;;  %v2686_v17 = vpop.f32.mrf.mxu0  ;;  %v3049_v63 = vmax.f32 %v2872_v37, 0.0  ;;  %v3072_v37 = vmax.f32 %v2888_v6, 0.0 }
 0x544   : > { %3747 = vmatprep.mubr.f32.mxu0 %v3039_v53  ;;  %3932 = vmatprep.mubr.f32.mxu1 %v3041_v12  ;;  %v2685_v53 = vadd.f32 %v6351_v1, %v6040_v54  ;;  %v2894_v19 = vadd.f32 %v6355_v46, %v6130_v56 }
 0x545   : > { %3836 = vmatprep.subr.mxu0 %v6703_v18  ;;  %v2895_v25 = vpop.f32.mrf.mxu1 }
 0x546   : > { %3748 = vmatmul.mubr.f32.gmra.mxu0 %v3038_v20  ;;  %v2896_v36 = vadd.f32 %v2895_v25, %v6107_v59  ;;  %v3080_v28 = vmax.f32 %v2894_v19, 0.0 }
 0x547   : > { %3933 = vmatmul.mubr.f32.gmra.mxu1 %v3040_v5  ;;  %3837 = vmatpush2.msra.mxu0 %v5977_v14  ;;  %v6367_v7 = vpop.f32.mrf.mxu0  ;;  %v2876_v14 = vadd.f32 %v6298_v51, %v6130_v56  ;;  %v2681_v51 = vadd.f32 %v2680_v42, %v6020_v49 }
 0x548   : > { %3752 = vmatprep.mubr.f32.mxu0 %v3047_v30  ;;  %3838 = vmatprep.subr.mxu0 %v6703_v18  ;;  %v6374_v29 = vpop.f32.mrf.mxu1  ;;  %v3081_v41 = vmax.f32 %v2896_v36, 0.0  ;;  %v2691_v20 = vadd.f32 %v6367_v7, %v6040_v54 }
 0x549   : > { %3937 = vmatprep.mubr.f32.mxu1 %v3049_v63  ;;  %3839 = vmatpush2.msra.mxu0 %v5995_v38  ;;  %v2692_v32 = vpop.f32.mrf.mxu0  ;;  %v3056_v0 = vmax.f32 %v2876_v14, 0.0  ;;  %v2882_v38 = vadd.f32 %v6316_v55, %v6130_v56  ;;  %v3071_v55 = vmax.f32 %v2681_v51, 0.0  ;;  %v6705_v51 = vld [vmem:[#allocation22_spill] sm:$0xff] }
 0x54a   : > { %3753 = vmatmul.mubr.f32.gmra.mxu0 %v3046_v57  ;;  %3840 = vmatprep.subr.mxu0 %v6703_v18  ;;  %v2901_v13 = vpop.f32.mrf.mxu1  ;;  %v2693_v47 = vadd.f32 %v2692_v32, %v6020_v49  ;;  %v3086_v4 = vmax.f32 %v2691_v20, 0.0  ;;  %v6711_v20 = vld [vmem:[#allocation18_spill] sm:$0xff] }
 0x54b   : > { %3938 = vmatmul.mubr.f32.gmra.mxu1 %v3048_v31  ;;  %3757 = vmatprep.mubr.f32.mxu0 %v3055_v27  ;;  %v3064_v42 = vmax.f32 %v2882_v38, 0.0  ;;  %v2902_v48 = vadd.f32 %v2901_v13, %v6107_v59 }
 0x54c   : > { %3841 = vmatpush2.msra.mxu0 %v6016_v8  ;;  %3942 = vmatprep.mubr.f32.mxu1 %v3057_v21  ;;  %v2687_v8 = vadd.f32 %v2686_v17, %v6020_v49  ;;  %v3078_v17 = vmax.f32 %v2685_v53, 0.0  ;;  %v3087_v10 = vmax.f32 %v2693_v47, 0.0 }
 0x54d   : > { %3842 = vmatprep.subr.mxu0 %v6703_v18  ;;  %v2696_v11 = vpop.f32.mrf.mxu0  ;;  %v6388_v26 = vpop.f32.mrf.mxu1  ;;  %v3089_v30 = vmax.f32 %v2902_v48, 0.0 }
 0x54e   : > { %3758 = vmatmul.mubr.f32.gmra.mxu0 %v3054_v44  ;;  %v3079_v24 = vmax.f32 %v2687_v8, 0.0  ;;  %v2697_v25 = vadd.f32 %v2696_v11, %v6040_v54  ;;  %v2906_v21 = vadd.f32 %v6388_v26, %v6130_v56  ;;  %v6706_v26 = vld [vmem:[#allocation23_spill] sm:$0xff] }
 0x54f   : > { %3943 = vmatmul.mubr.f32.gmra.mxu1 %v3056_v0  ;;  %3843 = vmatpush2.msra.mxu0 %v6033_v22  ;;  %v2698_v45 = vpop.f32.mrf.mxu0  ;;  %v2907_v58 = vpop.f32.mrf.mxu1 }
 0x550   : > { %3762 = vmatprep.mubr.f32.mxu0 %v3063_v40  ;;  %3947 = vmatprep.mubr.f32.mxu1 %v3065_v33  ;;  %v2699_v46 = vadd.f32 %v2698_v45, %v6020_v49  ;;  %v2908_v5 = vadd.f32 %v2907_v58, %v6107_v59  ;;  %v3094_v31 = vmax.f32 %v2697_v25, 0.0  ;;  %v3096_v40 = vmax.f32 %v2906_v21, 0.0 }
 0x551   : > { %3844 = vmatprep.subr.mxu0 %v6703_v18  ;;  %v2702_v22 = vpop.f32.mrf.mxu0 }
 0x552   : > { %3763 = vmatmul.mubr.f32.gmra.mxu0 %v3062_v3  ;;  %v3095_v27 = vmax.f32 %v2699_v46, 0.0  ;;  %v3097_v9 = vmax.f32 %v2908_v5, 0.0  ;;  %v2703_v14 = vadd.f32 %v2702_v22, %v6040_v54 }
 0x553   : > { %3948 = vmatmul.mubr.f32.gmra.mxu1 %v3064_v42  ;;  %3845 = vmatpush2.msra.mxu0 %v6046_v39  ;;  %v2911_v12 = vpop.f32.mrf.mxu1  ;;  %v2704_v1 = vpop.f32.mrf.mxu0 }
 0x554   : > { %3767 = vmatprep.mubr.f32.mxu0 %v3071_v55  ;;  %3846 = vmatprep.subr.mxu0 %v6703_v18  ;;  %v2912_v33 = vadd.f32 %v2911_v12, %v6130_v56  ;;  %v3102_v38 = vmax.f32 %v2703_v14, 0.0  ;;  %v2782_v55 = vadd.f32 %v6707_v62, %v6107_v59  ;;  %v6710_v12 = vld [vmem:[#allocation19_spill] sm:$0xff] }
 0x555   : > { %3952 = vmatprep.mubr.f32.mxu1 %v3073_v50  ;;  %3847 = vmatpush2.msra.mxu0 %v6061_v34  ;;  %v2913_v39 = vpop.f32.mrf.mxu1  ;;  %v2900_v34 = vadd.f32 %v6374_v29, %v6130_v56  ;;  %v6709_v50 = vld [vmem:[#allocation16_spill] sm:$0xff] }
 0x556   : > { %3768 = vmatmul.mubr.f32.gmra.mxu0 %v3070_v16  ;;  %3848 = vmatprep.subr.mxu0 %v6703_v18  ;;  %v2914_v7 = vadd.f32 %v2913_v39, %v6107_v59  ;;  %v3104_v45 = vmax.f32 %v2912_v33, 0.0  ;;  %v2780_v22 = vadd.f32 %v6709_v50, %v6130_v56  ;;  %v2788_v16 = vadd.f32 %v6710_v12, %v6107_v59 }
 0x557   : > { %3953 = vmatmul.mubr.f32.gmra.mxu1 %v3072_v37  ;;  %3772 = vmatprep.mubr.f32.mxu0 %v3079_v24  ;;  %v2708_v15 = vpop.f32.mrf.mxu0  ;;  %v3088_v57 = vmax.f32 %v2900_v34, 0.0  ;;  %v2929_v37 = vmax.f32 %v2782_v55, 0.0 }
 0x558   : > { %3849 = vmatpush2.msra.mxu0 %v6071_v23  ;;  %3957 = vmatprep.mubr.f32.mxu1 %v3081_v41  ;;  %v2917_v63 = vpop.f32.mrf.mxu1  ;;  %v2705_v23 = vadd.f32 %v2704_v1, %v6020_v49  ;;  %v3105_v32 = vmax.f32 %v2914_v7, 0.0  ;;  %v2937_v46 = vmax.f32 %v2788_v16, 0.0 }
 0x559   : > { %3850 = vmatprep.subr.mxu0 %v6703_v18  ;;  %v2710_v35 = vpop.f32.mrf.mxu0  ;;  %v2918_v58 = vadd.f32 %v2917_v63, %v6130_v56 }
 0x55a   : > { %3773 = vmatmul.mubr.f32.gmra.mxu0 %v3078_v17  ;;  %v2919_v29 = vpop.f32.mrf.mxu1  ;;  %v2711_v13 = vadd.f32 %v2710_v35, %v6020_v49  ;;  %v2709_v49 = vadd.f32 %v2708_v15, %v6040_v54  ;;  %v6708_v54 = vld [vmem:[#allocation24_spill] sm:$0xff]  ;;  %v2928_v17 = vmax.f32 %v2780_v22, 0.0 }
 0x55b   : > { %3958 = vmatmul.mubr.f32.gmra.mxu1 %v3080_v28  ;;  %3851 = vmatpush2.msra.mxu0 %v6081_v60  ;;  %v3103_v60 = vmax.f32 %v2705_v23, 0.0  ;;  %v2920_v44 = vadd.f32 %v2919_v29, %v6107_v59  ;;  %v3112_v41 = vmax.f32 %v2918_v58, 0.0  ;;  %v6713_v23 = vld [vmem:[#allocation20_spill] sm:$0xff] }
 0x55c   : > { %3777 = vmatprep.mubr.f32.mxu0 %v3087_v10  ;;  %3962 = vmatprep.mubr.f32.mxu1 %v3089_v30  ;;  %v3111_v2 = vmax.f32 %v2711_v13, 0.0  ;;  %v3110_v53 = vmax.f32 %v2709_v49, 0.0  ;;  %v2786_v10 = vadd.f32 %v6711_v20, %v6130_v56 }
 0x55d   : > { %3852 = vmatprep.subr.mxu0 %v6703_v18  ;;  %v3113_v11 = vmax.f32 %v2920_v44, 0.0 }
 0x55e   : > { %3778 = vmatmul.mubr.f32.gmra.mxu0 %v3086_v4  ;;  %v2936_v25 = vmax.f32 %v2786_v10, 0.0  ;;  %v2792_v4 = vadd.f32 %v6713_v23, %v6130_v56 }
 0x55f   : > { %3963 = vmatmul.mubr.f32.gmra.mxu1 %v3088_v57  ;;  %3853 = vmatpush2.msra.mxu0 %v6095_v43 }
 0x560   : > { %3782 = vmatprep.mubr.f32.mxu0 %v3095_v27  ;;  %3854 = vmatprep.subr.mxu0 %v6703_v18  ;;  %v2944_v29 = vmax.f32 %v2792_v4, 0.0 }
 0x561   : > { %3967 = vmatprep.mubr.f32.mxu1 %v3097_v9  ;;  %3855 = vmatpush2.msra.mxu0 %v6705_v51 }
 0x562   : > { %3783 = vmatmul.mubr.f32.gmra.mxu0 %v3094_v31  ;;  %3856 = vmatprep.subr.mxu0 %v6703_v18  ;;  %v3309_v43 = vpop.f32.mrf.mxu0 }
 0x563   : > { %3968 = vmatmul.mubr.f32.gmra.mxu1 %v3096_v40  ;;  %3787 = vmatprep.mubr.f32.mxu0 %v3103_v60  ;;  %v3310_v0 = vadd.f32 %v3309_v43, %v6428_v61 }
 0x564   : > { %3857 = vmatpush2.msra.mxu0 %v6706_v26  ;;  %3972 = vmatprep.mubr.f32.mxu1 %v3105_v32  ;;  %v3311_v8 = vpop.f32.mrf.mxu0 }
 0x565   : > { %3858 = vmatprep.subr.mxu0 %v6703_v18  ;;  %v3494_v3 = vpop.f32.mrf.mxu1 }
 0x566   : > { %3788 = vmatmul.mubr.f32.gmra.mxu0 %v3102_v38  ;;  %v6440_v36 = vadd.f32 %v3494_v3, %v3310_v0 }
 0x567   : > { %3973 = vmatmul.mubr.f32.gmra.mxu1 %v3104_v45  ;;  %3859 = vmatpush2.msra.mxu0 %v6708_v54  ;;  %v3496_v42 = vpop.f32.mrf.mxu1  ;;  %v3314_v6 = vpop.f32.mrf.mxu0 }
 0x568   : > { %3792 = vmatprep.mubr.f32.mxu0 %v3111_v2  ;;  %3977 = vmatprep.mubr.f32.mxu1 %v3113_v11  ;;  %v3315_v24 = vadd.f32 %v3314_v6, %v6428_v61 }
 0x569   : > { %3860 = vmatprep.subr.mxu0 %v6703_v18  ;;  %v3499_v47 = vpop.f32.mrf.mxu1  ;;  %v3316_v48 = vpop.f32.mrf.mxu0  ;;  %v6712_v18 = vld [vmem:[#allocation21_spill] sm:$0xff] }
 0x56a   : > { %3793 = vmatmul.mubr.f32.gmra.mxu0 %v3110_v53  ;;  %v6449_v19 = vadd.f32 %v3499_v47, %v3315_v24  ;;  %v2794_v28 = vadd.f32 %v6712_v18, %v6107_v59 }
 0x56b   : > { %3978 = vmatmul.mubr.f32.gmra.mxu1 %v3112_v41  ;;  %3861 = vmatpush2.msra.mxu0 %v6152_v52  ;;  %v3501_v1 = vpop.f32.mrf.mxu1  ;;  %v3319_v39 = vpop.f32.mrf.mxu0 }
 0x56c   : > { %3862 = vmatprep.mubr.f32.mxu0 %v2929_v37  ;;  %v3320_v30 = vadd.f32 %v3319_v39, %v6428_v61  ;;  %v2945_v7 = vmax.f32 %v2794_v28, 0.0 }
 0x56d   : > { %v3504_v34 = vpop.f32.mrf.mxu1  ;;  %v3321_v5 = vpop.f32.mrf.mxu0 }
 0x56e   : > { %3863 = vmatmul.mubr.f32.vlgmr.msra.gmra.mxu0 %v2928_v17  ;;  %v6457_v15 = vadd.f32 %v3504_v34, %v3320_v30 }
 0x56f   : > { %3867 = vmatprep.mubr.f32.mxu0 %v2937_v46  ;;  %v3506_v52 = vpop.f32.mrf.mxu1  ;;  %v3324_v63 = vpop.f32.mrf.mxu0 }
 0x570   : > { %v3325_v27 = vadd.f32 %v3324_v63, %v6428_v61 }
 0x571   : > { %v3509_v57 = vpop.f32.mrf.mxu1  ;;  %v3326_v21 = vpop.f32.mrf.mxu0 }
 0x572   : > { %3868 = vmatmul.mubr.f32.gmra.mxu0 %v2936_v25  ;;  %v6462_v9 = vadd.f32 %v3509_v57, %v3325_v27 }
 0x573   : > { %3872 = vmatprep.mubr.f32.mxu0 %v2945_v7  ;;  %v3511_v59 = vpop.f32.mrf.mxu1  ;;  %v3329_v35 = vpop.f32.mrf.mxu0 }
 0x574   : > { %v3330_v31 = vadd.f32 %v3329_v35, %v6428_v61 }
 0x575   : > { %v3514_v60 = vpop.f32.mrf.mxu1  ;;  %v3331_v14 = vpop.f32.mrf.mxu0 }
 0x576   : > { %3873 = vmatmul.mubr.f32.gmra.mxu0 %v2944_v29  ;;  %v6465_v32 = vadd.f32 %v3514_v60, %v3330_v31 }
 0x577   : > { %v3516_v56 = vpop.f32.mrf.mxu1  ;;  %v3334_v13 = vpop.f32.mrf.mxu0 }
 0x578   : > { %v3335_v44 = vadd.f32 %v3334_v13, %v6428_v61 }
 0x579   : > { %v3519_v40 = vpop.f32.mrf.mxu1  ;;  %v3336_v33 = vpop.f32.mrf.mxu0 }
 0x57a   : > { %v6468_v51 = vadd.f32 %v3519_v40, %v3335_v44 }
 0x57b   : > { %v3521_v43 = vpop.f32.mrf.mxu1  ;;  %v3339_v0 = vpop.f32.mrf.mxu0 }
 0x57c   : > { %v3340_v38 = vadd.f32 %v3339_v0, %v6428_v61 }
 0x57d   : > { %v3524_v49 = vpop.f32.mrf.mxu1  ;;  %v3341_v2 = vpop.f32.mrf.mxu0 }
 0x57e   : > { %v6471_v11 = vadd.f32 %v3524_v49, %v3340_v38 }
 0x57f   : > { %v3526_v26 = vpop.f32.mrf.mxu1  ;;  %v3344_v8 = vpop.f32.mrf.mxu0 }
 0x580   : > { %v3345_v45 = vadd.f32 %v3344_v8, %v6428_v61 }
 0x581   : > { %v3529_v58 = vpop.f32.mrf.mxu1  ;;  %v3346_v3 = vpop.f32.mrf.mxu0 }
 0x582   : > { %v6474_v62 = vadd.f32 %v3529_v58, %v3345_v45 }
 0x583   : > { %v3531_v55 = vpop.f32.mrf.mxu1  ;;  %v3349_v54 = vpop.f32.mrf.mxu0 }
 0x584   : > { %v3350_v42 = vadd.f32 %v3349_v54, %v6428_v61 }
 0x585   : > { %v3534_v6 = vpop.f32.mrf.mxu1  ;;  %v3351_v50 = vpop.f32.mrf.mxu0 }
 0x586   : > { %v6477_v22 = vadd.f32 %v3534_v6, %v3350_v42 }
 0x587   : > { %v3536_v53 = vpop.f32.mrf.mxu1  ;;  %v3354_v24 = vpop.f32.mrf.mxu0 }
 0x588   : > { %v3355_v12 = vadd.f32 %v3354_v24, %v6428_v61 }
 0x589   : > { %v3539_v16 = vpop.f32.mrf.mxu1  ;;  %v3356_v41 = vpop.f32.mrf.mxu0 }
 0x58a   : > { %v6480_v47 = vadd.f32 %v3539_v16, %v3355_v12 }
 0x58b   : > { %v3541_v48 = vpop.f32.mrf.mxu1  ;;  %v3359_v37 = vpop.f32.mrf.mxu0 }
 0x58c   : > { %v3360_v1 = vadd.f32 %v3359_v37, %v6428_v61 }
 0x58d   : > { %v3544_v39 = vpop.f32.mrf.mxu1  ;;  %v3361_v17 = vpop.f32.mrf.mxu0 }
 0x58e   : > { %v6483_v20 = vadd.f32 %v3544_v39, %v3360_v1 }
 0x58f   : > { %v3546_v10 = vpop.f32.mrf.mxu1  ;;  %v3364_v30 = vpop.f32.mrf.mxu0 }
 0x590   : > { %v3365_v46 = vadd.f32 %v3364_v30, %v6428_v61 }
 0x591   : > { %v3549_v18 = vpop.f32.mrf.mxu1  ;;  %v3366_v28 = vpop.f32.mrf.mxu0 }
 0x592   : > { %v6486_v34 = vadd.f32 %v3549_v18, %v3365_v46 }
 0x593   : > { %v3551_v5 = vpop.f32.mrf.mxu1 }
 0x594   : > { %v3369_v52 = vpop.f32.mrf.mxu0 }
 0x595   : > { %v3370_v63 = vadd.f32 %v3369_v52, %v6428_v61  ;;  %v3554_v25 = vpop.f32.mrf.mxu1 }
 0x596   : > { %v3371_v23 = vpop.f32.mrf.mxu0 }
 0x597   : > { %v6489_v4 = vadd.f32 %v3554_v25, %v3370_v63  ;;  %v3556_v27 = vpop.f32.mrf.mxu1 }
 0x599   : > { %v3374_v7 = vpop.f32.mrf.mxu0  ;;  %v3559_v57 = vpop.f32.mrf.mxu1 }
 0x59a   : > { %v3375_v21 = vadd.f32 %v3374_v7, %v6428_v61 }
 0x59b   : > { %v3376_v59 = vpop.f32.mrf.mxu0  ;;  %v3561_v35 = vpop.f32.mrf.mxu1 }
 0x59c   : > { %v6492_v29 = vadd.f32 %v3559_v57, %v3375_v21 }
 0x59d   : > { %v3379_v31 = vpop.f32.mrf.mxu0  ;;  %v3564_v60 = vpop.f32.mrf.mxu1 }
 0x59e   : > { %v3380_v14 = vadd.f32 %v3379_v31, %v6428_v61 }
 0x59f   : > { %v3381_v56 = vpop.f32.mrf.mxu0  ;;  %v3566_v13 = vpop.f32.mrf.mxu1 }
 0x5a0   : > { %v6495_v44 = vadd.f32 %v3564_v60, %v3380_v14 }
 0x5a2   : > { %v3384_v40 = vpop.f32.mrf.mxu0  ;;  %v3569_v33 = vpop.f32.mrf.mxu1 }
 0x5a3   : > { %v3385_v43 = vadd.f32 %v3384_v40, %v6428_v61 }
 0x5a4   : > { %v3386_v0 = vpop.f32.mrf.mxu0  ;;  %v3571_v38 = vpop.f32.mrf.mxu1 }
 0x5a5   : > { %v6498_v49 = vadd.f32 %v3569_v33, %v3385_v43 }
 0x5a7   : > { %v3389_v2 = vpop.f32.mrf.mxu0  ;;  %v3574_v26 = vpop.f32.mrf.mxu1 }
 0x5a8   : > { %v3390_v8 = vadd.f32 %v3389_v2, %v6428_v61 }
 0x5a9   : > { %v3391_v45 = vpop.f32.mrf.mxu0  ;;  %v3576_v58 = vpop.f32.mrf.mxu1 }
 0x5aa   : > { %v6501_v3 = vadd.f32 %v3574_v26, %v3390_v8 }
 0x5ab   : > { %v3394_v55 = vpop.f32.mrf.mxu0  ;;  %v3579_v54 = vpop.f32.mrf.mxu1 }
 0x5ac   : > { %v3395_v42 = vadd.f32 %v3394_v55, %v6428_v61 }
 0x5ad   : > { %v3396_v6 = vpop.f32.mrf.mxu0  ;;  %v3581_v50 = vpop.f32.mrf.mxu1 }
 0x5ae   : > { %v6504_v53 = vadd.f32 %v3579_v54, %v3395_v42 }
 0x5b0   : > { %v3399_v24 = vpop.f32.mrf.mxu0  ;;  %v3584_v12 = vpop.f32.mrf.mxu1 }
 0x5b1   : > { %v3400_v16 = vadd.f32 %v3399_v24, %v6428_v61 }
 0x5b2   : > { %v3401_v41 = vpop.f32.mrf.mxu0  ;;  %v3586_v48 = vpop.f32.mrf.mxu1 }
 0x5b3   : > { %v6507_v37 = vadd.f32 %v3584_v12, %v3400_v16  ;;  %v3986_v16 = vld [vmem:[%s4810_s12 + $0x18] sm:$0xff] }
 0x5b5   : > { %v3404_v1 = vpop.f32.mrf.mxu0  ;;  %v3589_v39 = vpop.f32.mrf.mxu1 }
 0x5b6   : > { %v3405_v17 = vadd.f32 %v3404_v1, %v6428_v61 }
 0x5b7   : > { %v3406_v10 = vpop.f32.mrf.mxu0  ;;  %v3591_v30 = vpop.f32.mrf.mxu1 }
 0x5b8   : > { %v6510_v46 = vadd.f32 %v3589_v39, %v3405_v17  ;;  %v3987_v10 = vld [vmem:[%s4810_s12 + $0x20] sm:$0xff] }
 0x5b9   : > { %v3409_v18 = vpop.f32.mrf.mxu0  ;;  %v3594_v28 = vpop.f32.mrf.mxu1 }
 0x5ba   : > { %v3410_v5 = vadd.f32 %v3409_v18, %v6428_v61 }
 0x5bb   : > { %v3411_v52 = vpop.f32.mrf.mxu0  ;;  %v3596_v63 = vpop.f32.mrf.mxu1 }
 0x5bc   : > { %v6513_v25 = vadd.f32 %v3594_v28, %v3410_v5  ;;  %v3988_v63 = vld [vmem:[%s4810_s12 + $0x28] sm:$0xff] }
 0x5be   : > { %v3414_v23 = vpop.f32.mrf.mxu0  ;;  %v3599_v27 = vpop.f32.mrf.mxu1 }
 0x5bf   : > { %v3415_v7 = vadd.f32 %v3414_v23, %v6428_v61 }
 0x5c0   : > { %v3416_v57 = vpop.f32.mrf.mxu0  ;;  %v3601_v21 = vpop.f32.mrf.mxu1 }
 0x5c1   : > { %v6516_v59 = vadd.f32 %v3599_v27, %v3415_v7 }
 0x5c3   : > { %v3419_v35 = vpop.f32.mrf.mxu0  ;;  %v3604_v31 = vpop.f32.mrf.mxu1 }
 0x5c4   : > { %v3420_v60 = vadd.f32 %v3419_v35, %v6428_v61 }
 0x5c5   : > { %v3421_v14 = vpop.f32.mrf.mxu0  ;;  %v3606_v56 = vpop.f32.mrf.mxu1 }
 0x5c6   : > { %v6519_v13 = vadd.f32 %v3604_v31, %v3420_v60  ;;  %v3989_v31 = vld [vmem:[%s4810_s12 + $0x30] sm:$0xff] }
 0x5c8   : > { %v3424_v40 = vpop.f32.mrf.mxu0  ;;  %v3609_v33 = vpop.f32.mrf.mxu1 }
 0x5c9   : > { %v3425_v43 = vadd.f32 %v3424_v40, %v6428_v61 }
 0x5ca   : > { %v3426_v0 = vpop.f32.mrf.mxu0  ;;  %v3611_v38 = vpop.f32.mrf.mxu1 }
 0x5cb   : > { %v6522_v2 = vadd.f32 %v3609_v33, %v3425_v43  ;;  %v3990_v0 = vld [vmem:[%s4810_s12 + $0x38] sm:$0xff] }
 0x5cd   : > { %v3679_v26 = vpop.f32.mrf.mxu0 }
 0x5ce   : > { %v6525_v8 = vadd.f32 %v3679_v26, %v6440_v36 }
 0x5cf   : > { %v3681_v45 = vpop.f32.mrf.mxu0 }
 0x5d1   : > { %v3684_v58 = vpop.f32.mrf.mxu0 }
 0x5d2   : > { %v6528_v55 = vadd.f32 %v3684_v58, %v6449_v19 }
 0x5d3   : > { %v3686_v54 = vpop.f32.mrf.mxu0 }
 0x5d5   : > { %v3689_v42 = vpop.f32.mrf.mxu0 }
 0x5d6   : > { %v6531_v61 = vadd.f32 %v3689_v42, %v6457_v15 }
 0x5d7   : > { %v3691_v6 = vpop.f32.mrf.mxu0 }
 0x5d8   : > { %v3991_v6 = vld [vmem:[%s4810_s12 + $0x40] sm:$0xff] }
 0x5da   : > { %v3694_v50 = vpop.f32.mrf.mxu0 }
 0x5db   : > { %v3695_v24 = vadd.f32 %v3694_v50, %v6462_v9  ;;  %v3879_v12 = vpop.f32.mrf.mxu1 }
 0x5dc   : > { %v3696_v36 = vpop.f32.mrf.mxu0 }
 0x5dd   : > { %v3880_v41 = vadd.f32 %v3879_v12, %v3695_v24  ;;  %v3881_v48 = vpop.f32.mrf.mxu1 }
 0x5de   : > { %v3699_v1 = vpop.f32.mrf.mxu0  ;;  %v3992_v48 = vld [vmem:[%s4810_s12 + $0x48] sm:$0xff] }
 0x5df   : > { %v4010_v19 = vadd.f32 %v3986_v16, %v3880_v41  ;;  %v3700_v39 = vadd.f32 %v3699_v1, %v6465_v32  ;;  %v3884_v17 = vpop.f32.mrf.mxu1 }
 0x5e0   : > { %v3701_v30 = vpop.f32.mrf.mxu0 }
 0x5e1   : > { %4034 = vst [vmem:[%s6539_s9 + $0x18] sm:$0xff] %v4010_v19  ;;  %v3885_v15 = vadd.f32 %v3884_v17, %v3700_v39  ;;  %v3886_v9 = vpop.f32.mrf.mxu1 }
 0x5e2   : > { %v3704_v18 = vpop.f32.mrf.mxu0 }
 0x5e3   : > { %v4011_v28 = vadd.f32 %v3987_v10, %v3885_v15  ;;  %v3705_v5 = vadd.f32 %v3704_v18, %v6468_v51  ;;  %v3889_v52 = vpop.f32.mrf.mxu1  ;;  %v3993_v15 = vld [vmem:[%s4810_s12 + $0x50] sm:$0xff] }
 0x5e4   : > { %v3706_v32 = vpop.f32.mrf.mxu0 }
 0x5e5   : > { %4035 = vst [vmem:[%s6539_s9 + $0x20] sm:$0xff] %v4011_v28  ;;  %v3890_v23 = vadd.f32 %v3889_v52, %v3705_v5  ;;  %v3891_v27 = vpop.f32.mrf.mxu1  ;;  %v3994_v32 = vld [vmem:[%s4810_s12 + $0x58] sm:$0xff] }
 0x5e6   : > { %v3709_v7 = vpop.f32.mrf.mxu0 }
 0x5e7   : > { %v4012_v57 = vadd.f32 %v3988_v63, %v3890_v23  ;;  %v3710_v21 = vadd.f32 %v3709_v7, %v6471_v11  ;;  %v3894_v35 = vpop.f32.mrf.mxu1 }
 0x5e8   : > { %v3711_v60 = vpop.f32.mrf.mxu0 }
 0x5e9   : > { %4036 = vst [vmem:[%s6539_s9 + $0x28] sm:$0xff] %v4012_v57  ;;  %v3895_v14 = vadd.f32 %v3894_v35, %v3710_v21  ;;  %v3896_v56 = vpop.f32.mrf.mxu1 }
 0x5ea   : > { %v3714_v51 = vpop.f32.mrf.mxu0 }
 0x5eb   : > { %v4013_v40 = vadd.f32 %v3989_v31, %v3895_v14  ;;  %v3715_v33 = vadd.f32 %v3714_v51, %v6474_v62  ;;  %v3899_v43 = vpop.f32.mrf.mxu1  ;;  %v3995_v31 = vld [vmem:[%s4810_s12 + $0x60] sm:$0xff] }
 0x5ec   : > { %v3716_v38 = vpop.f32.mrf.mxu0 }
 0x5ed   : > { %4037 = vst [vmem:[%s6539_s9 + $0x30] sm:$0xff] %v4013_v40  ;;  %v3900_v26 = vadd.f32 %v3899_v43, %v3715_v33  ;;  %v3901_v45 = vpop.f32.mrf.mxu1  ;;  %v3996_v43 = vld [vmem:[%s4810_s12 + $0x68] sm:$0xff] }
 0x5ee   : > { %v3719_v11 = vpop.f32.mrf.mxu0 }
 0x5ef   : > { %v4014_v58 = vadd.f32 %v3990_v0, %v3900_v26  ;;  %v3720_v54 = vadd.f32 %v3719_v11, %v6477_v22  ;;  %v3904_v42 = vpop.f32.mrf.mxu1 }
 0x5f0   : > { %v3721_v50 = vpop.f32.mrf.mxu0 }
 0x5f1   : > { %4038 = vst [vmem:[%s6539_s9 + $0x38] sm:$0xff] %v4014_v58  ;;  %v3905_v24 = vadd.f32 %v3904_v42, %v3720_v54  ;;  %v3906_v12 = vpop.f32.mrf.mxu1  ;;  %v3997_v54 = vld [vmem:[%s4810_s12 + $0x70] sm:$0xff] }
 0x5f2   : > { %v3724_v62 = vpop.f32.mrf.mxu0 }
 0x5f3   : > { %v4015_v16 = vadd.f32 %v3991_v6, %v3905_v24  ;;  %v3725_v36 = vadd.f32 %v3724_v62, %v6480_v47  ;;  %v3909_v41 = vpop.f32.mrf.mxu1 }
 0x5f4   : > { %v3726_v1 = vpop.f32.mrf.mxu0 }
 0x5f5   : > { %4039 = vst [vmem:[%s6539_s9 + $0x40] sm:$0xff] %v4015_v16  ;;  %v3910_v19 = vadd.f32 %v3909_v41, %v3725_v36  ;;  %v3911_v39 = vpop.f32.mrf.mxu1  ;;  %v3998_v16 = vld [vmem:[%s4810_s12 + $0x78] sm:$0xff] }
 0x5f6   : > { %v3729_v22 = vpop.f32.mrf.mxu0 }
 0x5f7   : > { %v4016_v17 = vadd.f32 %v3992_v48, %v3910_v19  ;;  %v3730_v10 = vadd.f32 %v3729_v22, %v6483_v20  ;;  %v3914_v30 = vpop.f32.mrf.mxu1  ;;  %v3999_v22 = vld [vmem:[%s4810_s12 + $0x80] sm:$0xff] }
 0x5f8   : > { %v3731_v9 = vpop.f32.mrf.mxu0 }
 0x5f9   : > { %4040 = vst [vmem:[%s6539_s9 + $0x48] sm:$0xff] %v4016_v17  ;;  %v3915_v18 = vadd.f32 %v3914_v30, %v3730_v10  ;;  %v3916_v28 = vpop.f32.mrf.mxu1 }
 0x5fa   : > { %v3734_v47 = vpop.f32.mrf.mxu0  ;;  %v4000_v28 = vld [vmem:[%s4810_s12 + $0x88] sm:$0xff] }
 0x5fb   : > { %v4017_v5 = vadd.f32 %v3993_v15, %v3915_v18  ;;  %v3735_v52 = vadd.f32 %v3734_v47, %v6486_v34  ;;  %v3919_v63 = vpop.f32.mrf.mxu1 }
 0x5fc   : > { %v3736_v23 = vpop.f32.mrf.mxu0 }
 0x5fd   : > { %4041 = vst [vmem:[%s6539_s9 + $0x50] sm:$0xff] %v4017_v5  ;;  %v3920_v27 = vadd.f32 %v3919_v63, %v3735_v52  ;;  %v3921_v7 = vpop.f32.mrf.mxu1 }
 0x5fe   : > { %v3739_v20 = vpop.f32.mrf.mxu0 }
 0x5ff   : > { %v4018_v57 = vadd.f32 %v3994_v32, %v3920_v27  ;;  %v3740_v21 = vadd.f32 %v3739_v20, %v6489_v4  ;;  %v3924_v35 = vpop.f32.mrf.mxu1  ;;  %v4001_v27 = vld [vmem:[%s4810_s12 + $0x90] sm:$0xff] }
 0x600   : > { %v3741_v60 = vpop.f32.mrf.mxu0 }
 0x601   : > { %4042 = vst [vmem:[%s6539_s9 + $0x58] sm:$0xff] %v4018_v57  ;;  %v3925_v14 = vadd.f32 %v3924_v35, %v3740_v21  ;;  %v3926_v56 = vpop.f32.mrf.mxu1  ;;  %v4002_v60 = vld [vmem:[%s4810_s12 + $0x98] sm:$0xff] }
 0x602   : > { %v3744_v34 = vpop.f32.mrf.mxu0 }
 0x603   : > { %v4019_v51 = vadd.f32 %v3995_v31, %v3925_v14  ;;  %v3745_v40 = vadd.f32 %v3744_v34, %v6492_v29  ;;  %v3929_v33 = vpop.f32.mrf.mxu1 }
 0x604   : > { %v3746_v0 = vpop.f32.mrf.mxu0 }
 0x605   : > { %4043 = vst [vmem:[%s6539_s9 + $0x60] sm:$0xff] %v4019_v51  ;;  %v3930_v38 = vadd.f32 %v3929_v33, %v3745_v40  ;;  %v3931_v26 = vpop.f32.mrf.mxu1 }
 0x606   : > { %v3749_v4 = vpop.f32.mrf.mxu0 }
 0x607   : > { %v4020_v45 = vadd.f32 %v3996_v43, %v3930_v38  ;;  %v3750_v11 = vadd.f32 %v3749_v4, %v6495_v44  ;;  %v3934_v58 = vpop.f32.mrf.mxu1  ;;  %v4003_v43 = vld [vmem:[%s4810_s12 + $0xa0] sm:$0xff] }
 0x608   : > { %v3751_v42 = vpop.f32.mrf.mxu0 }
 0x609   : > { %4044 = vst [vmem:[%s6539_s9 + $0x68] sm:$0xff] %v4020_v45  ;;  %v3935_v6 = vadd.f32 %v3934_v58, %v3750_v11  ;;  %v3936_v50 = vpop.f32.mrf.mxu1  ;;  %v4004_v58 = vld [vmem:[%s4810_s12 + $0xa8] sm:$0xff] }
 0x60a   : > { %v3754_v29 = vpop.f32.mrf.mxu0 }
 0x60b   : > { %v4021_v24 = vadd.f32 %v3997_v54, %v3935_v6  ;;  %v3755_v12 = vadd.f32 %v3754_v29, %v6498_v49  ;;  %v3939_v62 = vpop.f32.mrf.mxu1 }
 0x60c   : > { %v3756_v36 = vpop.f32.mrf.mxu0 }
 0x60d   : > { %4045 = vst [vmem:[%s6539_s9 + $0x70] sm:$0xff] %v4021_v24  ;;  %v3940_v41 = vadd.f32 %v3939_v62, %v3755_v12  ;;  %v3941_v48 = vpop.f32.mrf.mxu1  ;;  %v4005_v12 = vld [vmem:[%s4810_s12 + $0xb0] sm:$0xff] }
 0x60e   : > { %v3759_v44 = vpop.f32.mrf.mxu0 }
 0x60f   : > { %v4022_v1 = vadd.f32 %v3998_v16, %v3940_v41  ;;  %v3760_v19 = vadd.f32 %v3759_v44, %v6501_v3  ;;  %v3944_v39 = vpop.f32.mrf.mxu1 }
 0x610   : > { %v3761_v17 = vpop.f32.mrf.mxu0 }
 0x611   : > { %4046 = vst [vmem:[%s6539_s9 + $0x78] sm:$0xff] %v4022_v1  ;;  %v3945_v10 = vadd.f32 %v3944_v39, %v3760_v19  ;;  %v3946_v30 = vpop.f32.mrf.mxu1  ;;  %v4006_v1 = vld [vmem:[%s4810_s12 + $0xb8] sm:$0xff]  ;;  %v3983_v17 = vld [vmem:[%s4810_s12] sm:$0xff] }
 0x612   : > { %v3764_v49 = vpop.f32.mrf.mxu0 }
 0x613   : > { %v4023_v15 = vadd.f32 %v3999_v22, %v3945_v10  ;;  %v3765_v9 = vadd.f32 %v3764_v49, %v6504_v53  ;;  %v3949_v18 = vpop.f32.mrf.mxu1 }
 0x614   : > { %v3766_v47 = vpop.f32.mrf.mxu0 }
 0x615   : > { %4047 = vst [vmem:[%s6539_s9 + $0x80] sm:$0xff] %v4023_v15  ;;  %v3950_v5 = vadd.f32 %v3949_v18, %v3765_v9  ;;  %v3951_v52 = vpop.f32.mrf.mxu1  ;;  %v3984_v9 = vld [vmem:[%s4810_s12 + $0x8] sm:$0xff] }
 0x616   : > { %v3769_v3 = vpop.f32.mrf.mxu0  ;;  %v3985_v52 = vld [vmem:[%s4810_s12 + $0x10] sm:$0xff]  ;;  %s4535_s12 = sshll.u32 %s4617_s14, 4  ;;  %s4536_s12 = int_to_ptr.vmem [resolvable:$false] %s4535_s12 }
 0x617   : > { %v4024_v63 = vadd.f32 %v4000_v28, %v3950_v5  ;;  %v3770_v32 = vadd.f32 %v3769_v3, %v6507_v37  ;;  %v3954_v23 = vpop.f32.mrf.mxu1  ;;  %s4537_s29 = scalar_lea.vmem %s4536_s12, 6144  ;;  %p4538_p10 = scmp.lt.s32.totalorder %s6615_s16, %s4536_s12 }
 0x618   : > { %v3771_v7 = vpop.f32.mrf.mxu0  ;;  %p4539_p1 = scmp.lt.s32.totalorder %s4537_s29, %s4531_s10 }
 0x619   : > { %4048 = vst [vmem:[%s6539_s9 + $0x88] sm:$0xff] %v4024_v63  ;;  %v3955_v20 = vadd.f32 %v3954_v23, %v3770_v32  ;;  %v3956_v57 = vpop.f32.mrf.mxu1 }
 0x61a   : > { %v3774_v53 = vpop.f32.mrf.mxu0  ;;  %p4540_p6 = por %p4539_p1, %p4538_p10 }
 0x61b   : > { %v4025_v21 = vadd.f32 %v4001_v27, %v3955_v20  ;;  %v3775_v35 = vadd.f32 %v3774_v53, %v6510_v46  ;;  %v3959_v31 = vpop.f32.mrf.mxu1 }
 0x61c   : > { %v3776_v14 = vpop.f32.mrf.mxu0  ;;  %p4541_p2 = pnand %p4540_p6, %p4534_p5 }
 0x61d   : > { %4049 = vst [vmem:[%s6539_s9 + $0x90] sm:$0xff] %v4025_v21  ;;  %v3960_v56 = vadd.f32 %v3959_v31, %v3775_v35  ;;  %v3961_v34 = vpop.f32.mrf.mxu1 }
 0x61e   : > { %v3779_v37 = vpop.f32.mrf.mxu0 }
 0x61f   : > { %v4026_v51 = vadd.f32 %v4002_v60, %v3960_v56  ;;  %v3780_v40 = vadd.f32 %v3779_v37, %v6513_v25  ;;  %v3964_v33 = vpop.f32.mrf.mxu1 }
 0x620   : > { %v3781_v0 = vpop.f32.mrf.mxu0 }
 0x621   : > { %4050 = vst [vmem:[%s6539_s9 + $0x98] sm:$0xff] %v4026_v51  ;;  %v3965_v38 = vadd.f32 %v3964_v33, %v3780_v40  ;;  %v3966_v26 = vpop.f32.mrf.mxu1 }
 0x622   : > { %v3784_v46 = vpop.f32.mrf.mxu0 }
 0x623   : > { %v4027_v4 = vadd.f32 %v4003_v43, %v3965_v38  ;;  %v3785_v45 = vadd.f32 %v3784_v46, %v6516_v59  ;;  %v3969_v11 = vpop.f32.mrf.mxu1 }
 0x624   : > { %v3786_v54 = vpop.f32.mrf.mxu0 }
 0x625   : > { %4051 = vst [vmem:[%s6539_s9 + $0xa0] sm:$0xff] %v4027_v4  ;;  %v3970_v42 = vadd.f32 %v3969_v11, %v3785_v45  ;;  %v3971_v6 = vpop.f32.mrf.mxu1 }
 0x626   : > { %v3789_v25 = vpop.f32.mrf.mxu0 }
 0x627   : > { %v4028_v50 = vadd.f32 %v4004_v58, %v3970_v42  ;;  %v3790_v29 = vadd.f32 %v3789_v25, %v6519_v13  ;;  %v3974_v24 = vpop.f32.mrf.mxu1 }
 0x628   : > { %v3791_v62 = vpop.f32.mrf.mxu0 }
 0x629   : > { %4052 = vst [vmem:[%s6539_s9 + $0xa8] sm:$0xff] %v4028_v50  ;;  %v3975_v16 = vadd.f32 %v3974_v24, %v3790_v29  ;;  %v3976_v59 = vpop.f32.mrf.mxu1 }
 0x62a   : > { %v3794_v36 = vpop.f32.mrf.mxu0 }
 0x62b   : > { %v4029_v41 = vadd.f32 %v4005_v12, %v3975_v16  ;;  %v3795_v48 = vadd.f32 %v3794_v36, %v6522_v2  ;;  %v3979_v44 = vpop.f32.mrf.mxu1 }
 0x62c   : > { %v3796_v19 = vpop.f32.mrf.mxu0 }
 0x62d   : > { %4053 = vst [vmem:[%s6539_s9 + $0xb0] sm:$0xff] %v4029_v41  ;;  %v3980_v13 = vadd.f32 %v3979_v44, %v3795_v48  ;;  %v3981_v39 = vpop.f32.mrf.mxu1 }
 0x62e   : > { %v3864_v22 = vpop.f32.mrf.mxu0 }
 0x62f   : > { %v4030_v10 = vadd.f32 %v4006_v1, %v3980_v13  ;;  %v3865_v30 = vadd.f32 %v3864_v22, %v6525_v8 }
 0x630   : > { %v3866_v49 = vpop.f32.mrf.mxu0 }
 0x631   : > { %4054 = vst [vmem:[%s6539_s9 + $0xb8] sm:$0xff] %v4030_v10  ;;  %v4007_v15 = vadd.f32 %v3983_v17, %v3865_v30 }
 0x632   : > { %v3869_v2 = vpop.f32.mrf.mxu0 }
 0x633   : > { %4031 = vst [vmem:[%s6539_s9] sm:$0xff] %v4007_v15  ;;  %v3870_v18 = vadd.f32 %v3869_v2, %v6528_v55 }
 0x634   : > { %v3871_v28 = vpop.f32.mrf.mxu0 }
 0x635   : > { %v4008_v47 = vadd.f32 %v3984_v9, %v3870_v18 }
 0x636   : > { %v3874_v5 = vpop.f32.mrf.mxu0 }
 0x637   : > { %4032 = vst [vmem:[%s6539_s9 + $0x8] sm:$0xff] %v4008_v47  ;;  %v3875_v8 = vadd.f32 %v3874_v5, %v6531_v61 }
 0x638   : > { %v3876_v3 = vpop.f32.mrf.mxu0 }
 0x639   : > { %v4009_v55 = vadd.f32 %v3985_v52, %v3875_v8 }
 0x63b   : > { %4033 = vst [vmem:[%s6539_s9 + $0x10] sm:$0xff] %v4009_v55 }
 0x63c   : > { %4544 = shalt.err (!%p4541_p2)
}
 0x63d   : > { %s4545_s27 = scalar_lea.hbm %s6613_s8, 3072  ;;  %s4549_s26 = scalar_lea.hbm %s6665_s6, 6144 }
 0x63e   : > { %p4546_p4 = scmp.ne.s32.totalorder %s6613_s8, %s4545_s27  ;;  %p4550_p11 = scmp.lt.s32.totalorder %s6613_s8, %s6665_s6 }
 0x63f   : > { %p4551_p3 = scmp.lt.s32.totalorder %s4549_s26, %s4545_s27 }
 0x640   : > { %p4547_p8 = pnand %p4546_p4, %p6714_p9 }
 0x641   : > { %p4552_p12 = por %p4551_p3, %p4550_p11 }
 0x642   : > { %p4548_p0 = pneg %p4547_p8 }
 0x644   : > { %p4553_p7 = pnand %p4552_p12, %p4548_p0 }
 0x646   : > { %4556 = shalt.err (!%p4553_p7)
}
 0x647   : > { %s4618_s17 = smov 128   ;;  %s4619_s18 = smov 8  }
 0x648   : > { %4321 = dma.vmem_to_hbm [thread:$0]  (%p6714_p9), %s6615_s16, 3072, %s6613_s8, %s4056_s25, %s4618_s17, %s4618_s17, %s4619_s18  }
 0x649 PF: > { %s4084_s10 = sand.u32 1, %s4591_s21   ;;  %p6715_p13 = scmp.ne.s32.totalorder %s6679_s28, 0 }
 0x64a   : > { %p6716_p5 = scmp.ge.s32.totalorder %s4603_s24, 2  ;;  %s4085_s14 = scalar_lea.sflag [#allocation4], %s4084_s10 }
 0x64c   : > { %p4341_p10 = pnand %p6716_p5, %p6715_p13 }
 0x64e   : > { %p4342_p1 = pneg %p4341_p10 }
 0x650   : > { %4586 = dma.done.wait (%p4342_p1), %s4085_s14, 3072  }
 0x651   : > { %4588 = vsyncadd (%p4342_p1), %s4085_s14, 4294964224  ;;  %p21_p6 = scmp.ge.s32.totalorder %s4746_s20, 4   ;;  %s6717_s21 = smov %s4595_s22 }
 0x652   : > { %s6718_s22 = smov %s4599_s23  ;;  %s6719_s23 = smov %s4762_s7 }
 0x653   : > { %s6720_s24 = smov %s4746_s20  ;;  %23 = sbr.rel (!%p21_p6) target bundleno = 7 (0x7), region = 112 }
 0x658   :  { %4090 = vsyncpa [#allocation3], 1 }
 0x659   :  { %4092 = vsyncpa [#allocation3 + $0x1], 1 }
 0x65a   :  { %4093 = vsyncpa [#allocation6], 1 }
 0x65b   :  { %4094 = vsyncpa [#allocation9], 1 }
 0x65c   :  { %4095 = vsyncpa [#allocation4], 1 }
 0x65d   :  { %4097 = vsyncpa [#allocation4 + $0x1], 1 }

</bundles_post_ra>
